<compile_context>
chip_gen: v5e
topology: v5e:2x2
jax: 0.10.0
libtpu: 0.0.40
codegen_flags: <defaults>
</compile_context>

<pallas_src>
import math
import functools

import jax
import jax.numpy as jnp
from jax.experimental import pallas as pl
from jax.experimental.pallas import tpu as pltpu


_VMEM_LIMIT = 32 * 1024 * 1024     # safe on v5e / v6e / v7x

# Preferred tile sizes (multiples of (8, 128)); small dims fall back to full-dim blocks.
_TM = 256
_TN = 256
_TK = 512
_TM_ROW = 256


def _pick_tile(dim, pref):
    """Full-dim block for small dims, otherwise a (8,128)-aligned tile."""
    return dim if dim <= pref else pref


def _pad_dim(x, axis, tile):
    rem = (-x.shape[axis]) % tile
    if rem == 0:
        return x
    pad = [(0, 0)] * x.ndim
    pad[axis] = (0, rem)
    return jnp.pad(x, pad)


def _layernorm(z, gamma, beta):
    mean = jnp.mean(z, axis=-1, keepdims=True)
    var = jnp.mean((z - mean) ** 2, axis=-1, keepdims=True)
    zn = (z - mean) * jax.lax.rsqrt(var + 1e-5)       # torch LayerNorm eps
    return zn * gamma + beta


# ----------------------------------------------------------------------------
# Pallas kernels
# ----------------------------------------------------------------------------

def _matmul_kernel(x_ref, w_ref, b_ref, o_ref, acc_ref):
    @pl.when(pl.program_id(2) == 0)
    def _():
        acc_ref[...] = jnp.zeros_like(acc_ref)

    acc_ref[...] += jnp.dot(x_ref[...].astype(jnp.bfloat16), w_ref[...],
                            preferred_element_type=jnp.float32)

    @pl.when(pl.program_id(2) == pl.num_programs(2) - 1)
    def _():
        o_ref[...] = (acc_ref[...] + b_ref[...]).astype(o_ref.dtype)


def linear_pallas(x, w, b):
    """x: [M, K] f32, w: [K, N] bf16, b: [1, N] f32 -> [M, N] f32."""
    M, K = x.shape
    N = w.shape[1]
    tm = _pick_tile(M, _TM)
    tn = _pick_tile(N, _TN)
    tk = _pick_tile(K, _TK)

    xp = _pad_dim(_pad_dim(x, 0, tm), 1, tk)
    wp = _pad_dim(_pad_dim(w, 0, tk), 1, tn)
    bp = _pad_dim(b, 1, tn)
    Mp, Kp = xp.shape
    Np = wp.shape[1]

    out = pl.pallas_call(
        _matmul_kernel,
        out_shape=jax.ShapeDtypeStruct((Mp, Np), jnp.float32),
        grid=(Mp // tm, Np // tn, Kp // tk),
        in_specs=[
            pl.BlockSpec((tm, tk), lambda i, j, k: (i, k)),
            pl.BlockSpec((tk, tn), lambda i, j, k: (k, j)),
            pl.BlockSpec((1, tn), lambda i, j, k: (0, j)),
        ],
        out_specs=pl.BlockSpec((tm, tn), lambda i, j, k: (i, j)),
        scratch_shapes=[pltpu.VMEM((tm, tn), jnp.float32)],
        compiler_params=pltpu.CompilerParams(
            dimension_semantics=("parallel", "parallel", "arbitrary"),
            vmem_limit_bytes=_VMEM_LIMIT),
    )(xp, wp, bp)

    if (Mp, Np) != (M, N):
        out = out[:M, :N]
    return out


def _proj_addln_kernel(x_ref, w_ref, b_ref, r_ref, g_ref, beta_ref, o_ref):
    y = jnp.dot(x_ref[...].astype(jnp.bfloat16), w_ref[...],
                preferred_element_type=jnp.float32) + b_ref[...]
    z = r_ref[...] + y
    o_ref[...] = _layernorm(z, g_ref[...], beta_ref[...]).astype(o_ref.dtype)


def proj_addln_pallas(x2d, w, b, res2d, gamma, beta):
    """LayerNorm(res + (x @ w + b)), row-tiled. x:[M,D], w:[D,D] bf16."""
    M, D = x2d.shape
    tm = _pick_tile(M, _TM_ROW)
    xp = _pad_dim(x2d, 0, tm)
    rp = _pad_dim(res2d, 0, tm)
    Mp = xp.shape[0]

    out = pl.pallas_call(
        _proj_addln_kernel,
        out_shape=jax.ShapeDtypeStruct((Mp, D), jnp.float32),
        grid=(Mp // tm,),
        in_specs=[
            pl.BlockSpec((tm, D), lambda i: (i, 0)),
            pl.BlockSpec((D, D), lambda i: (0, 0)),
            pl.BlockSpec((1, D), lambda i: (0, 0)),
            pl.BlockSpec((tm, D), lambda i: (i, 0)),
            pl.BlockSpec((1, D), lambda i: (0, 0)),
            pl.BlockSpec((1, D), lambda i: (0, 0)),
        ],
        out_specs=pl.BlockSpec((tm, D), lambda i: (i, 0)),
        compiler_params=pltpu.CompilerParams(
            dimension_semantics=("parallel",),
            vmem_limit_bytes=_VMEM_LIMIT),
    )(xp, w, b, rp, gamma, beta)
    return out[:M] if Mp != M else out


def _ffn_addln_kernel(x_ref, w1_ref, b1_ref, w2_ref, b2_ref, g_ref, beta_ref, o_ref):
    x = x_ref[...]
    h = jnp.dot(x.astype(jnp.bfloat16), w1_ref[...],
                preferred_element_type=jnp.float32) + b1_ref[...]
    h = jnp.maximum(h, 0.0)
    y = jnp.dot(h.astype(jnp.bfloat16), w2_ref[...],
                preferred_element_type=jnp.float32) + b2_ref[...]
    z = x + y
    o_ref[...] = _layernorm(z, g_ref[...], beta_ref[...]).astype(o_ref.dtype)


def ffn_addln_pallas(x2d, w1, b1, w2, b2, gamma, beta):
    """LayerNorm(x + FFN(x)) with FFN = ReLU(x@w1+b1)@w2+b2, row-tiled over x."""
    # TODO(synk): tile d_ff / d_model for very large FFN widths (weights are kept
    # fully VMEM-resident per row-tile here, fine for small/medium d_ff).
    M, D = x2d.shape
    F = w1.shape[1]
    tm = _pick_tile(M, _TM_ROW)
    xp = _pad_dim(x2d, 0, tm)
    Mp = xp.shape[0]

    out = pl.pallas_call(
        _ffn_addln_kernel,
        out_shape=jax.ShapeDtypeStruct((Mp, D), jnp.float32),
        grid=(Mp // tm,),
        in_specs=[
            pl.BlockSpec((tm, D), lambda i: (i, 0)),
            pl.BlockSpec((D, F), lambda i: (0, 0)),
            pl.BlockSpec((1, F), lambda i: (0, 0)),
            pl.BlockSpec((F, D), lambda i: (0, 0)),
            pl.BlockSpec((1, D), lambda i: (0, 0)),
            pl.BlockSpec((1, D), lambda i: (0, 0)),
            pl.BlockSpec((1, D), lambda i: (0, 0)),
        ],
        out_specs=pl.BlockSpec((tm, D), lambda i: (i, 0)),
        compiler_params=pltpu.CompilerParams(
            dimension_semantics=("parallel",),
            vmem_limit_bytes=_VMEM_LIMIT),
    )(xp, w1, b1, w2, b2, gamma, beta)
    return out[:M] if Mp != M else out


def _mha_kernel(q_ref, kv_ref, m_ref, o_ref, *, num_heads, scale):
    q = q_ref[0]            # (Sq, D)  f32
    kv = kv_ref[0]          # (Sk, 2D) f32
    mask = m_ref[0]         # (Sq, Sk) int32, 1 = keep, 0 = masked

    D = q.shape[-1]
    dk = D // num_heads

    qb = (q * scale).astype(jnp.bfloat16)          # fold 1/sqrt(dk) into Q
    kb = kv[:, :D].astype(jnp.bfloat16)
    vb = kv[:, D:].astype(jnp.bfloat16)

    neg = jnp.float32(-1e9)
    masked = (mask == 0)

    outs = []
    for h in range(num_heads):
        sl = slice(h * dk, (h + 1) * dk)
        # Contract the last axis of both operands: no explicit K transpose.
        s = jax.lax.dot_general(qb[:, sl], kb[:, sl],
                                (((1,), (1,)), ((), ())),
                                preferred_element_type=jnp.float32)
        s = jnp.where(masked, neg, s)
        s = s - jnp.max(s, axis=-1, keepdims=True)
        p = jnp.exp(s)
        p = p * pl.reciprocal(jnp.sum(p, axis=-1, keepdims=True), approx=True)
        outs.append(jnp.dot(p.astype(jnp.bfloat16), vb[:, sl],
                            preferred_element_type=jnp.float32))

    o_ref[0] = jnp.concatenate(outs, axis=-1).astype(o_ref.dtype)


def attention_pallas(q, kv, mask3, scale, num_heads):
    """q: [B,Sq,D] f32, kv: [B,Sk,2D] f32, mask3: [B,Sq,Sk] int32 -> [B,Sq,D] f32."""
    # TODO(synk): for long sequences convert to a flash-style online-softmax with a
    # KV-tile grid axis instead of materializing the full (Sq, Sk) score matrix.
    B, Sq, D = q.shape
    Sk = kv.shape[1]
    return pl.pallas_call(
        functools.partial(_mha_kernel, num_heads=num_heads, scale=scale),
        out_shape=jax.ShapeDtypeStruct((B, Sq, D), jnp.float32),
        grid=(B,),
        in_specs=[
            pl.BlockSpec((1, Sq, D), lambda b: (b, 0, 0)),
            pl.BlockSpec((1, Sk, 2 * D), lambda b: (b, 0, 0)),
            pl.BlockSpec((1, Sq, Sk), lambda b: (b, 0, 0)),
        ],
        out_specs=pl.BlockSpec((1, Sq, D), lambda b: (b, 0, 0)),
        compiler_params=pltpu.CompilerParams(
            dimension_semantics=("parallel",),
            vmem_limit_bytes=_VMEM_LIMIT),
    )(q, kv, mask3)


# ----------------------------------------------------------------------------
# Model building blocks (JAX glue around the Pallas kernels)
# ----------------------------------------------------------------------------

def attention_block(ap, norm_p, q_in, kv_in, mask, num_heads):
    """Full PyTorch sub-block: LayerNorm(q_in + MHA(q_in, kv_in, kv_in, mask))."""
    B, Sq, D = q_in.shape
    Sk = kv_in.shape[1]
    dk = D // num_heads

    q = linear_pallas(q_in.reshape(B * Sq, D), ap["wq"], ap["bq"]).reshape(B, Sq, D)
    kv = linear_pallas(kv_in.reshape(B * Sk, D), ap["wkv"], ap["bkv"]).reshape(B, Sk, 2 * D)

    mask3 = jnp.broadcast_to(mask, (B, 1, Sq, Sk))[:, 0].astype(jnp.int32)
    attn = attention_pallas(q, kv, mask3, 1.0 / math.sqrt(dk), num_heads)

    out = proj_addln_pallas(attn.reshape(B * Sq, D), ap["wo"], ap["bo"],
                            q_in.reshape(B * Sq, D),
                            norm_p["gamma"], norm_p["beta"])
    return out.reshape(B, Sq, D)


def ffn_block(fp, norm_p, x):
    """LayerNorm(x + FFN(x))."""
    B, S, D = x.shape
    out = ffn_addln_pallas(x.reshape(B * S, D), fp["w1"], fp["b1"],
                           fp["w2"], fp["b2"],
                           norm_p["gamma"], norm_p["beta"])
    return out.reshape(B, S, D)


def encoder_layer(p, x, mask, num_heads):
    x = attention_block(p["self_attn"], p["norm1"], x, x, mask, num_heads)
    x = ffn_block(p["ff"], p["norm2"], x)
    return x


def decoder_layer(p, x, enc_out, src_mask, tgt_mask, num_heads):
    x = attention_block(p["self_attn"], p["norm1"], x, x, tgt_mask, num_heads)
    x = attention_block(p["cross_attn"], p["norm2"], x, enc_out, src_mask, num_heads)
    x = ffn_block(p["ff"], p["norm3"], x)
    return x


def generate_masks(src, tgt):
    src_mask = (src != 0)[:, None, None, :]                       # (B,1,1,Ss)
    tgt_pad = (tgt != 0)[:, None, :, None]                        # (B,1,St,1)
    St = tgt.shape[1]
    nopeak = jnp.tril(jnp.ones((St, St), dtype=jnp.bool_))        # causal
    tgt_mask = tgt_pad & nopeak[None, None, :, :]                 # (B,1,St,St)
    return src_mask, tgt_mask


def transformer_forward(params, src, tgt, num_heads):
    src_mask, tgt_mask = generate_masks(src, tgt)

    emb = params["shared_embedding"]                              # (V, D)
    pos = params["pos_embedding"]                                 # (max_seq, D)

    src_embedded = jnp.take(emb, src, axis=0) + pos[None, :src.shape[1], :]
    tgt_embedded = jnp.take(emb, tgt, axis=0) + pos[None, :tgt.shape[1], :]
    # TODO(synk): nn.Dropout omitted (eval-mode / identity semantics).

    enc_output = src_embedded
    for lp in params["encoder_layers"]:
        enc_output = encoder_layer(lp, enc_output, src_mask, num_heads)

    dec_output = tgt_embedded
    for lp in params["decoder_layers"]:
        dec_output = decoder_layer(lp, dec_output, enc_output,
                                   src_mask, tgt_mask, num_heads)

    B, St, D = dec_output.shape
    logits = linear_pallas(dec_output.reshape(B * St, D),
                           params["fc_w"], params["fc_b"])
    return logits.reshape(B, St, params["fc_w"].shape[1])


# ----------------------------------------------------------------------------
# Deterministic parameter initialization
# ----------------------------------------------------------------------------

def _init_linear(key, d_in, d_out):
    k1, k2 = jax.random.split(key)
    w = (jax.random.normal(k1, (d_in, d_out), jnp.float32) * 0.05).astype(jnp.bfloat16)
    b = jax.random.normal(k2, (1, d_out), jnp.float32) * 0.05
    return {"w": w, "b": b}


def _init_mha(key, d_model):
    ks = jax.random.split(key, 4)
    q = _init_linear(ks[0], d_model, d_model)
    k = _init_linear(ks[1], d_model, d_model)
    v = _init_linear(ks[2], d_model, d_model)
    o = _init_linear(ks[3], d_model, d_model)
    # K and V projections fused into one [D, 2D] weight.
    return {"wq": q["w"], "bq": q["b"],
            "wkv": jnp.concatenate([k["w"], v["w"]], axis=1),
            "bkv": jnp.concatenate([k["b"], v["b"]], axis=1),
            "wo": o["w"], "bo": o["b"]}


def _init_ff(key, d_model, d_ff):
    k1, k2 = jax.random.split(key)
    l1 = _init_linear(k1, d_model, d_ff)
    l2 = _init_linear(k2, d_ff, d_model)
    return {"w1": l1["w"], "b1": l1["b"], "w2": l2["w"], "b2": l2["b"]}


def _init_norm(d_model):
    return {"gamma": jnp.ones((1, d_model), jnp.float32),
            "beta": jnp.zeros((1, d_model), jnp.float32)}


def init_transformer_params(key, src_vocab, tgt_vocab, d_model, num_heads,
                            num_layers, d_ff, max_seq_length):
    keys = jax.random.split(key, 4 + 2 * num_layers)
    params = {
        "shared_embedding":
            jax.random.normal(keys[0], (src_vocab, d_model), jnp.float32) * 0.05,
        "pos_embedding":
            jax.random.normal(keys[1], (max_seq_length, d_model), jnp.float32) * 0.05,
    }
    fc = _init_linear(keys[2], d_model, tgt_vocab)
    params["fc_w"], params["fc_b"] = fc["w"], fc["b"]

    enc_layers, dec_layers = [], []
    for i in range(num_layers):
        ek = jax.random.split(keys[3 + i], 2)
        enc_layers.append({"self_attn": _init_mha(ek[0], d_model),
                           "ff": _init_ff(ek[1], d_model, d_ff),
                           "norm1": _init_norm(d_model),
                           "norm2": _init_norm(d_model)})
        dk = jax.random.split(keys[3 + num_layers + i], 3)
        dec_layers.append({"self_attn": _init_mha(dk[0], d_model),
                           "cross_attn": _init_mha(dk[1], d_model),
                           "ff": _init_ff(dk[2], d_model, d_ff),
                           "norm1": _init_norm(d_model),
                           "norm2": _init_norm(d_model),
                           "norm3": _init_norm(d_model)})
    params["encoder_layers"] = enc_layers
    params["decoder_layers"] = dec_layers
    return params


# ----------------------------------------------------------------------------
# Main
# ----------------------------------------------------------------------------

if __name__ == "__main__":
    # Small config consistent with the module's constructor.
    B = 2
    S_SRC = 8
    S_TGT = 8
    SRC_VOCAB = 16
    TGT_VOCAB = 16
    D_MODEL = 32
    NUM_HEADS = 4
    NUM_LAYERS = 2
    D_FF = 64
    MAX_SEQ = 16

    root = jax.random.PRNGKey(0)
    k_params, k_src, k_tgt = jax.random.split(root, 3)

    params = init_transformer_params(k_params, SRC_VOCAB, TGT_VOCAB, D_MODEL,
                                     NUM_HEADS, NUM_LAYERS, D_FF, MAX_SEQ)

    src = jax.random.randint(k_src, (B, S_SRC), 0, SRC_VOCAB, dtype=jnp.int32)
    tgt = jax.random.randint(k_tgt, (B, S_TGT), 0, TGT_VOCAB, dtype=jnp.int32)

    fwd = jax.jit(functools.partial(transformer_forward, num_heads=NUM_HEADS))
    out = fwd(params, src, tgt)
    out = jax.block_until_ready(out)

    assert out.shape == (B, S_TGT, TGT_VOCAB), out.shape
    assert out.dtype == jnp.float32
    assert bool(jnp.all(jnp.isfinite(out)))
    print("KERNEL_OK")
</pallas_src>

<mosaic_0001>
module attributes {stable_mosaic.version = 11 : i64} {
  func.func @_matmul_kernel(%arg0: i32, %arg1: i32, %arg2: i32, %arg3: memref<16x32xf32, #tpu.memory_space<vmem>>, %arg4: memref<32x32xbf16, #tpu.memory_space<vmem>>, %arg5: memref<1x32xf32, #tpu.memory_space<vmem>>, %arg6: memref<16x32xf32, #tpu.memory_space<vmem>>, %arg7: memref<16x32xf32, #tpu.memory_space<vmem>>) attributes {dimension_semantics = [#tpu.dimension_semantics<parallel>, #tpu.dimension_semantics<parallel>, #tpu.dimension_semantics<arbitrary>], iteration_bounds = array<i64: 1, 1, 1>, scalar_prefetch = 0 : i64, scratch_operands = 1 : i64, tpu.core_type = #tpu.core_type<tc>, window_params = [{transform_indices = @transform_0, window_bounds = array<i64: 16, 32>}, {transform_indices = @transform_1, window_bounds = array<i64: 32, 32>}, {transform_indices = @transform_2, window_bounds = array<i64: 1, 32>}, {transform_indices = @transform_3, window_bounds = array<i64: 16, 32>}]} {
    %c0_i32 = arith.constant 0 : i32
    %0 = arith.cmpi eq, %arg2, %c0_i32 : i32
    %1 = arith.extui %0 : i1 to i32
    %c0_i32_0 = arith.constant 0 : i32
    %2 = arith.cmpi ne, %1, %c0_i32_0 : i32
    scf.if %2 {
      %cst_10 = arith.constant 0.000000e+00 : f32
      %13 = vector.broadcast %cst_10 : f32 to vector<16x32xf32>
      %c0_11 = arith.constant 0 : index
      %c0_12 = arith.constant 0 : index
      %14 = vector.load %arg7[%c0_11, %c0_12] : memref<16x32xf32, #tpu.memory_space<vmem>>, vector<16x32xf32>
      tpu.vector_store %arg7[%c0_11, %c0_12], %13 {strides = array<i32>} : memref<16x32xf32, #tpu.memory_space<vmem>>, vector<16x32xf32>,
    } else {
    }
    %c0 = arith.constant 0 : index
    %c0_1 = arith.constant 0 : index
    %3 = vector.load %arg7[%c0, %c0_1] : memref<16x32xf32, #tpu.memory_space<vmem>>, vector<16x32xf32>
    %c0_2 = arith.constant 0 : index
    %c0_3 = arith.constant 0 : index
    %4 = vector.load %arg3[%c0_2, %c0_3] : memref<16x32xf32, #tpu.memory_space<vmem>>, vector<16x32xf32>
    %5 = arith.truncf %4 : vector<16x32xf32> to vector<16x32xbf16>
    %c0_4 = arith.constant 0 : index
    %c0_5 = arith.constant 0 : index
    %6 = vector.load %arg4[%c0_4, %c0_5] : memref<32x32xbf16, #tpu.memory_space<vmem>>, vector<32x32xbf16>
    %cst = arith.constant dense<0.000000e+00> : vector<16x32xf32>
    %7 = tpu.matmul %5, %6, %cst {dimension_numbers = #tpu.dot_dimension_numbers<[1], [0], [0], [1], [0, 0, 1, 1], [], []>} : vector<16x32xbf16>, vector<32x32xbf16>, vector<16x32xf32> -> vector<16x32xf32>
    %8 = arith.addf %3, %7 : vector<16x32xf32>
    %c0_6 = arith.constant 0 : index
    %c0_7 = arith.constant 0 : index
    %9 = vector.load %arg7[%c0_6, %c0_7] : memref<16x32xf32, #tpu.memory_space<vmem>>, vector<16x32xf32>
    tpu.vector_store %arg7[%c0_6, %c0_7], %8 {strides = array<i32>} : memref<16x32xf32, #tpu.memory_space<vmem>>, vector<16x32xf32>,
    %c0_i32_8 = arith.constant 0 : i32
    %10 = arith.cmpi eq, %arg2, %c0_i32_8 : i32
    %11 = arith.extui %10 : i1 to i32
    %c0_i32_9 = arith.constant 0 : i32
    %12 = arith.cmpi ne, %11, %c0_i32_9 : i32
    scf.if %12 {
      %c0_10 = arith.constant 0 : index
      %c0_11 = arith.constant 0 : index
      %13 = vector.load %arg7[%c0_10, %c0_11] : memref<16x32xf32, #tpu.memory_space<vmem>>, vector<16x32xf32>
      %c0_12 = arith.constant 0 : index
      %c0_13 = arith.constant 0 : index
      %14 = vector.load %arg5[%c0_12, %c0_13] : memref<1x32xf32, #tpu.memory_space<vmem>>, vector<1x32xf32>
      %15 = vector.broadcast %14 : vector<1x32xf32> to vector<16x32xf32>
      %16 = arith.addf %13, %15 : vector<16x32xf32>
      %c0_14 = arith.constant 0 : index
      %c0_15 = arith.constant 0 : index
      %17 = vector.load %arg6[%c0_14, %c0_15] : memref<16x32xf32, #tpu.memory_space<vmem>>, vector<16x32xf32>
      tpu.vector_store %arg6[%c0_14, %c0_15], %16 {strides = array<i32>} : memref<16x32xf32, #tpu.memory_space<vmem>>, vector<16x32xf32>,
    } else {
    }
    return
  }
  func.func @transform_0(%arg0: i32, %arg1: i32, %arg2: i32) -> (i32, i32) {
    %c0_i32 = arith.constant 0 : i32
    return %arg0, %arg2 : i32, i32
  }
  func.func @transform_1(%arg0: i32, %arg1: i32, %arg2: i32) -> (i32, i32) {
    %c0_i32 = arith.constant 0 : i32
    return %arg2, %arg1 : i32, i32
  }
  func.func @transform_2(%arg0: i32, %arg1: i32, %arg2: i32) -> (i32, i32) {
    %c0_i32 = arith.constant 0 : i32
    %c0_i32_0 = arith.constant 0 : i32
    return %c0_i32, %arg1 : i32, i32
  }
  func.func @transform_3(%arg0: i32, %arg1: i32, %arg2: i32) -> (i32, i32) {
    %c0_i32 = arith.constant 0 : i32
    return %arg0, %arg1 : i32, i32
  }
}

module attributes {stable_mosaic.version = 11 : i64} {
  func.func @_proj_addln_kernel(%arg0: i32, %arg1: memref<16x32xf32, #tpu.memory_space<vmem>>, %arg2: memref<32x32xbf16, #tpu.memory_space<vmem>>, %arg3: memref<1x32xf32, #tpu.memory_space<vmem>>, %arg4: memref<16x32xf32, #tpu.memory_space<vmem>>, %arg5: memref<1x32xf32, #tpu.memory_space<vmem>>, %arg6: memref<1x32xf32, #tpu.memory_space<vmem>>, %arg7: memref<16x32xf32, #tpu.memory_space<vmem>>) attributes {dimension_semantics = [#tpu.dimension_semantics<parallel>], iteration_bounds = array<i64: 1>, scalar_prefetch = 0 : i64, scratch_operands = 0 : i64, tpu.core_type = #tpu.core_type<tc>, window_params = [{transform_indices = @transform_0, window_bounds = array<i64: 16, 32>}, {pipeline_mode = #tpu.pipeline_mode<synchronous>, transform_indices = @transform_1, window_bounds = array<i64: 32, 32>}, {pipeline_mode = #tpu.pipeline_mode<synchronous>, transform_indices = @transform_2, window_bounds = array<i64: 1, 32>}, {transform_indices = @transform_3, window_bounds = array<i64: 16, 32>}, {pipeline_mode = #tpu.pipeline_mode<synchronous>, transform_indices = @transform_4, window_bounds = array<i64: 1, 32>}, {pipeline_mode = #tpu.pipeline_mode<synchronous>, transform_indices = @transform_5, window_bounds = array<i64: 1, 32>}, {transform_indices = @transform_6, window_bounds = array<i64: 16, 32>}]} {
    %c0 = arith.constant 0 : index
    %c0_0 = arith.constant 0 : index
    %0 = vector.load %arg1[%c0, %c0_0] : memref<16x32xf32, #tpu.memory_space<vmem>>, vector<16x32xf32>
    %1 = arith.truncf %0 : vector<16x32xf32> to vector<16x32xbf16>
    %c0_1 = arith.constant 0 : index
    %c0_2 = arith.constant 0 : index
    %2 = vector.load %arg2[%c0_1, %c0_2] : memref<32x32xbf16, #tpu.memory_space<vmem>>, vector<32x32xbf16>
    %cst = arith.constant dense<0.000000e+00> : vector<16x32xf32>
    %3 = tpu.matmul %1, %2, %cst {dimension_numbers = #tpu.dot_dimension_numbers<[1], [0], [0], [1], [0, 0, 1, 1], [], []>} : vector<16x32xbf16>, vector<32x32xbf16>, vector<16x32xf32> -> vector<16x32xf32>
    %c0_3 = arith.constant 0 : index
    %c0_4 = arith.constant 0 : index
    %4 = vector.load %arg3[%c0_3, %c0_4] : memref<1x32xf32, #tpu.memory_space<vmem>>, vector<1x32xf32>
    %5 = vector.broadcast %4 : vector<1x32xf32> to vector<16x32xf32>
    %6 = arith.addf %3, %5 : vector<16x32xf32>
    %c0_5 = arith.constant 0 : index
    %c0_6 = arith.constant 0 : index
    %7 = vector.load %arg4[%c0_5, %c0_6] : memref<16x32xf32, #tpu.memory_space<vmem>>, vector<16x32xf32>
    %8 = arith.addf %7, %6 : vector<16x32xf32>
    %c0_7 = arith.constant 0 : index
    %c0_8 = arith.constant 0 : index
    %9 = vector.load %arg5[%c0_7, %c0_8] : memref<1x32xf32, #tpu.memory_space<vmem>>, vector<1x32xf32>
    %c0_9 = arith.constant 0 : index
    %c0_10 = arith.constant 0 : index
    %10 = vector.load %arg6[%c0_9, %c0_10] : memref<1x32xf32, #tpu.memory_space<vmem>>, vector<1x32xf32>
    %cst_11 = arith.constant dense<0.000000e+00> : vector<16xf32>
    %11 = vector.multi_reduction <add>, %8, %cst_11 [1] : vector<16x32xf32> to vector<16xf32>
    %12 = vector.shape_cast %11 : vector<16xf32> to vector<16x1xf32>
    %cst_12 = arith.constant 3.200000e+01 : f32
    %13 = vector.broadcast %cst_12 : f32 to vector<16x1xf32>
    %14 = arith.divf %12, %13 : vector<16x1xf32>
    %15 = vector.broadcast %14 : vector<16x1xf32> to vector<16x32xf32>
    %16 = arith.subf %8, %15 : vector<16x32xf32>
    %17 = arith.mulf %16, %16 : vector<16x32xf32>
    %cst_13 = arith.constant dense<0.000000e+00> : vector<16xf32>
    %18 = vector.multi_reduction <add>, %17, %cst_13 [1] : vector<16x32xf32> to vector<16xf32>
    %19 = vector.shape_cast %18 : vector<16xf32> to vector<16x1xf32>
    %cst_14 = arith.constant 3.200000e+01 : f32
    %20 = vector.broadcast %cst_14 : f32 to vector<16x1xf32>
    %21 = arith.divf %19, %20 : vector<16x1xf32>
    %22 = vector.broadcast %14 : vector<16x1xf32> to vector<16x32xf32>
    %23 = arith.subf %8, %22 : vector<16x32xf32>
    %cst_15 = arith.constant 9.99999974E-6 : f32
    %24 = vector.broadcast %cst_15 : f32 to vector<16x1xf32>
    %25 = arith.addf %21, %24 : vector<16x1xf32>
    %26 = math.rsqrt %25 : vector<16x1xf32>
    %27 = vector.broadcast %26 : vector<16x1xf32> to vector<16x32xf32>
    %28 = arith.mulf %23, %27 : vector<16x32xf32>
    %29 = vector.broadcast %9 : vector<1x32xf32> to vector<16x32xf32>
    %30 = arith.mulf %28, %29 : vector<16x32xf32>
    %31 = vector.broadcast %10 : vector<1x32xf32> to vector<16x32xf32>
    %32 = arith.addf %30, %31 : vector<16x32xf32>
    %c0_16 = arith.constant 0 : index
    %c0_17 = arith.constant 0 : index
    %33 = vector.load %arg7[%c0_16, %c0_17] : memref<16x32xf32, #tpu.memory_space<vmem>>, vector<16x32xf32>
    tpu.vector_store %arg7[%c0_16, %c0_17], %32 {strides = array<i32>} : memref<16x32xf32, #tpu.memory_space<vmem>>, vector<16x32xf32>,
    return
  }
  func.func @transform_0(%arg0: i32) -> (i32, i32) {
    %c0_i32 = arith.constant 0 : i32
    %c0_i32_0 = arith.constant 0 : i32
    return %arg0, %c0_i32 : i32, i32
  }
  func.func @transform_1(%arg0: i32) -> (i32, i32) {
    %c0_i32 = arith.constant 0 : i32
    %c0_i32_0 = arith.constant 0 : i32
    %c0_i32_1 = arith.constant 0 : i32
    return %c0_i32, %c0_i32_0 : i32, i32
  }
  func.func @transform_2(%arg0: i32) -> (i32, i32) {
    %c0_i32 = arith.constant 0 : i32
    %c0_i32_0 = arith.constant 0 : i32
    %c0_i32_1 = arith.constant 0 : i32
    return %c0_i32, %c0_i32_0 : i32, i32
  }
  func.func @transform_3(%arg0: i32) -> (i32, i32) {
    %c0_i32 = arith.constant 0 : i32
    %c0_i32_0 = arith.constant 0 : i32
    return %arg0, %c0_i32 : i32, i32
  }
  func.func @transform_4(%arg0: i32) -> (i32, i32) {
    %c0_i32 = arith.constant 0 : i32
    %c0_i32_0 = arith.constant 0 : i32
    %c0_i32_1 = arith.constant 0 : i32
    return %c0_i32, %c0_i32_0 : i32, i32
  }
  func.func @transform_5(%arg0: i32) -> (i32, i32) {
    %c0_i32 = arith.constant 0 : i32
    %c0_i32_0 = arith.constant 0 : i32
    %c0_i32_1 = arith.constant 0 : i32
    return %c0_i32, %c0_i32_0 : i32, i32
  }
  func.func @transform_6(%arg0: i32) -> (i32, i32) {
    %c0_i32 = arith.constant 0 : i32
    %c0_i32_0 = arith.constant 0 : i32
    return %arg0, %c0_i32 : i32, i32
  }
}

module attributes {stable_mosaic.version = 11 : i64} {
  func.func @_matmul_kernel(%arg0: i32, %arg1: i32, %arg2: i32, %arg3: memref<16x32xf32, #tpu.memory_space<vmem>>, %arg4: memref<32x64xbf16, #tpu.memory_space<vmem>>, %arg5: memref<1x64xf32, #tpu.memory_space<vmem>>, %arg6: memref<16x64xf32, #tpu.memory_space<vmem>>, %arg7: memref<16x64xf32, #tpu.memory_space<vmem>>) attributes {dimension_semantics = [#tpu.dimension_semantics<parallel>, #tpu.dimension_semantics<parallel>, #tpu.dimension_semantics<arbitrary>], iteration_bounds = array<i64: 1, 1, 1>, scalar_prefetch = 0 : i64, scratch_operands = 1 : i64, tpu.core_type = #tpu.core_type<tc>, window_params = [{transform_indices = @transform_0, window_bounds = array<i64: 16, 32>}, {transform_indices = @transform_1, window_bounds = array<i64: 32, 64>}, {transform_indices = @transform_2, window_bounds = array<i64: 1, 64>}, {transform_indices = @transform_3, window_bounds = array<i64: 16, 64>}]} {
    %c0_i32 = arith.constant 0 : i32
    %0 = arith.cmpi eq, %arg2, %c0_i32 : i32
    %1 = arith.extui %0 : i1 to i32
    %c0_i32_0 = arith.constant 0 : i32
    %2 = arith.cmpi ne, %1, %c0_i32_0 : i32
    scf.if %2 {
      %cst_10 = arith.constant 0.000000e+00 : f32
      %13 = vector.broadcast %cst_10 : f32 to vector<16x64xf32>
      %c0_11 = arith.constant 0 : index
      %c0_12 = arith.constant 0 : index
      %14 = vector.load %arg7[%c0_11, %c0_12] : memref<16x64xf32, #tpu.memory_space<vmem>>, vector<16x64xf32>
      tpu.vector_store %arg7[%c0_11, %c0_12], %13 {strides = array<i32>} : memref<16x64xf32, #tpu.memory_space<vmem>>, vector<16x64xf32>,
    } else {
    }
    %c0 = arith.constant 0 : index
    %c0_1 = arith.constant 0 : index
    %3 = vector.load %arg7[%c0, %c0_1] : memref<16x64xf32, #tpu.memory_space<vmem>>, vector<16x64xf32>
    %c0_2 = arith.constant 0 : index
    %c0_3 = arith.constant 0 : index
    %4 = vector.load %arg3[%c0_2, %c0_3] : memref<16x32xf32, #tpu.memory_space<vmem>>, vector<16x32xf32>
    %5 = arith.truncf %4 : vector<16x32xf32> to vector<16x32xbf16>
    %c0_4 = arith.constant 0 : index
    %c0_5 = arith.constant 0 : index
    %6 = vector.load %arg4[%c0_4, %c0_5] : memref<32x64xbf16, #tpu.memory_space<vmem>>, vector<32x64xbf16>
    %cst = arith.constant dense<0.000000e+00> : vector<16x64xf32>
    %7 = tpu.matmul %5, %6, %cst {dimension_numbers = #tpu.dot_dimension_numbers<[1], [0], [0], [1], [0, 0, 1, 1], [], []>} : vector<16x32xbf16>, vector<32x64xbf16>, vector<16x64xf32> -> vector<16x64xf32>
    %8 = arith.addf %3, %7 : vector<16x64xf32>
    %c0_6 = arith.constant 0 : index
    %c0_7 = arith.constant 0 : index
    %9 = vector.load %arg7[%c0_6, %c0_7] : memref<16x64xf32, #tpu.memory_space<vmem>>, vector<16x64xf32>
    tpu.vector_store %arg7[%c0_6, %c0_7], %8 {strides = array<i32>} : memref<16x64xf32, #tpu.memory_space<vmem>>, vector<16x64xf32>,
    %c0_i32_8 = arith.constant 0 : i32
    %10 = arith.cmpi eq, %arg2, %c0_i32_8 : i32
    %11 = arith.extui %10 : i1 to i32
    %c0_i32_9 = arith.constant 0 : i32
    %12 = arith.cmpi ne, %11, %c0_i32_9 : i32
    scf.if %12 {
      %c0_10 = arith.constant 0 : index
      %c0_11 = arith.constant 0 : index
      %13 = vector.load %arg7[%c0_10, %c0_11] : memref<16x64xf32, #tpu.memory_space<vmem>>, vector<16x64xf32>
      %c0_12 = arith.constant 0 : index
      %c0_13 = arith.constant 0 : index
      %14 = vector.load %arg5[%c0_12, %c0_13] : memref<1x64xf32, #tpu.memory_space<vmem>>, vector<1x64xf32>
      %15 = vector.broadcast %14 : vector<1x64xf32> to vector<16x64xf32>
      %16 = arith.addf %13, %15 : vector<16x64xf32>
      %c0_14 = arith.constant 0 : index
      %c0_15 = arith.constant 0 : index
      %17 = vector.load %arg6[%c0_14, %c0_15] : memref<16x64xf32, #tpu.memory_space<vmem>>, vector<16x64xf32>
      tpu.vector_store %arg6[%c0_14, %c0_15], %16 {strides = array<i32>} : memref<16x64xf32, #tpu.memory_space<vmem>>, vector<16x64xf32>,
    } else {
    }
    return
  }
  func.func @transform_0(%arg0: i32, %arg1: i32, %arg2: i32) -> (i32, i32) {
    %c0_i32 = arith.constant 0 : i32
    return %arg0, %arg2 : i32, i32
  }
  func.func @transform_1(%arg0: i32, %arg1: i32, %arg2: i32) -> (i32, i32) {
    %c0_i32 = arith.constant 0 : i32
    return %arg2, %arg1 : i32, i32
  }
  func.func @transform_2(%arg0: i32, %arg1: i32, %arg2: i32) -> (i32, i32) {
    %c0_i32 = arith.constant 0 : i32
    %c0_i32_0 = arith.constant 0 : i32
    return %c0_i32, %arg1 : i32, i32
  }
  func.func @transform_3(%arg0: i32, %arg1: i32, %arg2: i32) -> (i32, i32) {
    %c0_i32 = arith.constant 0 : i32
    return %arg0, %arg1 : i32, i32
  }
}

module attributes {stable_mosaic.version = 11 : i64} {
  func.func @_mha_kernel(%arg0: i32, %arg1: memref<1x8x32xf32, #tpu.memory_space<vmem>>, %arg2: memref<1x8x64xf32, #tpu.memory_space<vmem>>, %arg3: memref<1x8x8xi32, #tpu.memory_space<vmem>>, %arg4: memref<1x8x32xf32, #tpu.memory_space<vmem>>) attributes {dimension_semantics = [#tpu.dimension_semantics<parallel>], iteration_bounds = array<i64: 2>, scalar_prefetch = 0 : i64, scratch_operands = 0 : i64, tpu.core_type = #tpu.core_type<tc>, window_params = [{transform_indices = @transform_0, window_bounds = array<i64: 1, 8, 32>}, {transform_indices = @transform_1, window_bounds = array<i64: 1, 8, 64>}, {transform_indices = @transform_2, window_bounds = array<i64: 1, 8, 8>}, {transform_indices = @transform_3, window_bounds = array<i64: 1, 8, 32>}]} {
    %c0 = arith.constant 0 : index
    %c0_0 = arith.constant 0 : index
    %c0_1 = arith.constant 0 : index
    %0 = vector.load %arg1[%c0, %c0_0, %c0_1] : memref<1x8x32xf32, #tpu.memory_space<vmem>>, vector<1x8x32xf32>
    %1 = vector.shape_cast %0 : vector<1x8x32xf32> to vector<8x32xf32>
    %c0_2 = arith.constant 0 : index
    %c0_3 = arith.constant 0 : index
    %c0_4 = arith.constant 0 : index
    %2 = vector.load %arg2[%c0_2, %c0_3, %c0_4] : memref<1x8x64xf32, #tpu.memory_space<vmem>>, vector<1x8x64xf32>
    %3 = vector.shape_cast %2 : vector<1x8x64xf32> to vector<8x64xf32>
    %c0_5 = arith.constant 0 : index
    %c0_6 = arith.constant 0 : index
    %c0_7 = arith.constant 0 : index
    %4 = vector.load %arg3[%c0_5, %c0_6, %c0_7] : memref<1x8x8xi32, #tpu.memory_space<vmem>>, vector<1x8x8xi32>
    %5 = vector.shape_cast %4 : vector<1x8x8xi32> to vector<8x8xi32>
    %cst = arith.constant 0.353553385 : f32
    %6 = vector.broadcast %cst : f32 to vector<8x32xf32>
    %7 = arith.mulf %1, %6 : vector<8x32xf32>
    %8 = arith.truncf %7 : vector<8x32xf32> to vector<8x32xbf16>
    %9 = vector.extract_strided_slice %3 {offsets = [0, 0], sizes = [8, 32], strides = [1, 1]} : vector<8x64xf32> to vector<8x32xf32>
    %10 = arith.truncf %9 : vector<8x32xf32> to vector<8x32xbf16>
    %11 = vector.extract_strided_slice %3 {offsets = [0, 32], sizes = [8, 32], strides = [1, 1]} : vector<8x64xf32> to vector<8x32xf32>
    %12 = arith.truncf %11 : vector<8x32xf32> to vector<8x32xbf16>
    %c0_i32 = arith.constant 0 : i32
    %13 = vector.broadcast %c0_i32 : i32 to vector<8x8xi32>
    %14 = arith.cmpi eq, %5, %13 : vector<8x8xi32>
    %15 = vector.extract_strided_slice %8 {offsets = [0, 0], sizes = [8, 8], strides = [1, 1]} : vector<8x32xbf16> to vector<8x8xbf16>
    %16 = vector.extract_strided_slice %10 {offsets = [0, 0], sizes = [8, 8], strides = [1, 1]} : vector<8x32xbf16> to vector<8x8xbf16>
    %cst_8 = arith.constant dense<0.000000e+00> : vector<8x8xf32>
    %17 = tpu.matmul %15, %16, %cst_8 {dimension_numbers = #tpu.dot_dimension_numbers<[1], [1], [0], [0], [0, 0, 1, 0], [], []>} : vector<8x8xbf16>, vector<8x8xbf16>, vector<8x8xf32> -> vector<8x8xf32>
    %cst_9 = arith.constant -1.000000e+09 : f32
    %18 = vector.broadcast %cst_9 : f32 to vector<8x8xf32>
    %19 = arith.select %14, %18, %17 : vector<8x8xi1>, vector<8x8xf32>
    %cst_10 = arith.constant dense<0xFF800000> : vector<8xf32>
    %20 = vector.multi_reduction <maximumf>, %19, %cst_10 [1] : vector<8x8xf32> to vector<8xf32>
    %21 = vector.shape_cast %20 : vector<8xf32> to vector<8x1xf32>
    %22 = vector.broadcast %21 : vector<8x1xf32> to vector<8x8xf32>
    %23 = arith.subf %19, %22 : vector<8x8xf32>
    %24 = math.exp %23 : vector<8x8xf32>
    %cst_11 = arith.constant dense<0.000000e+00> : vector<8xf32>
    %25 = vector.multi_reduction <add>, %24, %cst_11 [1] : vector<8x8xf32> to vector<8xf32>
    %26 = vector.shape_cast %25 : vector<8xf32> to vector<8x1xf32>
    %27 = tpu.reciprocal %26 {approx = true} : vector<8x1xf32> -> vector<8x1xf32>
    %28 = vector.broadcast %27 : vector<8x1xf32> to vector<8x8xf32>
    %29 = arith.mulf %24, %28 : vector<8x8xf32>
    %30 = arith.truncf %29 : vector<8x8xf32> to vector<8x8xbf16>
    %31 = vector.extract_strided_slice %12 {offsets = [0, 0], sizes = [8, 8], strides = [1, 1]} : vector<8x32xbf16> to vector<8x8xbf16>
    %cst_12 = arith.constant dense<0.000000e+00> : vector<8x8xf32>
    %32 = tpu.matmul %30, %31, %cst_12 {dimension_numbers = #tpu.dot_dimension_numbers<[1], [0], [0], [1], [0, 0, 1, 1], [], []>} : vector<8x8xbf16>, vector<8x8xbf16>, vector<8x8xf32> -> vector<8x8xf32>
    %33 = vector.extract_strided_slice %8 {offsets = [0, 8], sizes = [8, 8], strides = [1, 1]} : vector<8x32xbf16> to vector<8x8xbf16>
    %34 = vector.extract_strided_slice %10 {offsets = [0, 8], sizes = [8, 8], strides = [1, 1]} : vector<8x32xbf16> to vector<8x8xbf16>
    %cst_13 = arith.constant dense<0.000000e+00> : vector<8x8xf32>
    %35 = tpu.matmul %33, %34, %cst_13 {dimension_numbers = #tpu.dot_dimension_numbers<[1], [1], [0], [0], [0, 0, 1, 0], [], []>} : vector<8x8xbf16>, vector<8x8xbf16>, vector<8x8xf32> -> vector<8x8xf32>
    %cst_14 = arith.constant -1.000000e+09 : f32
    %36 = vector.broadcast %cst_14 : f32 to vector<8x8xf32>
    %37 = arith.select %14, %36, %35 : vector<8x8xi1>, vector<8x8xf32>
    %cst_15 = arith.constant dense<0xFF800000> : vector<8xf32>
    %38 = vector.multi_reduction <maximumf>, %37, %cst_15 [1] : vector<8x8xf32> to vector<8xf32>
    %39 = vector.shape_cast %38 : vector<8xf32> to vector<8x1xf32>
    %40 = vector.broadcast %39 : vector<8x1xf32> to vector<8x8xf32>
    %41 = arith.subf %37, %40 : vector<8x8xf32>
    %42 = math.exp %41 : vector<8x8xf32>
    %cst_16 = arith.constant dense<0.000000e+00> : vector<8xf32>
    %43 = vector.multi_reduction <add>, %42, %cst_16 [1] : vector<8x8xf32> to vector<8xf32>
    %44 = vector.shape_cast %43 : vector<8xf32> to vector<8x1xf32>
    %45 = tpu.reciprocal %44 {approx = true} : vector<8x1xf32> -> vector<8x1xf32>
    %46 = vector.broadcast %45 : vector<8x1xf32> to vector<8x8xf32>
    %47 = arith.mulf %42, %46 : vector<8x8xf32>
    %48 = arith.truncf %47 : vector<8x8xf32> to vector<8x8xbf16>
    %49 = vector.extract_strided_slice %12 {offsets = [0, 8], sizes = [8, 8], strides = [1, 1]} : vector<8x32xbf16> to vector<8x8xbf16>
    %cst_17 = arith.constant dense<0.000000e+00> : vector<8x8xf32>
    %50 = tpu.matmul %48, %49, %cst_17 {dimension_numbers = #tpu.dot_dimension_numbers<[1], [0], [0], [1], [0, 0, 1, 1], [], []>} : vector<8x8xbf16>, vector<8x8xbf16>, vector<8x8xf32> -> vector<8x8xf32>
    %51 = vector.extract_strided_slice %8 {offsets = [0, 16], sizes = [8, 8], strides = [1, 1]} : vector<8x32xbf16> to vector<8x8xbf16>
    %52 = vector.extract_strided_slice %10 {offsets = [0, 16], sizes = [8, 8], strides = [1, 1]} : vector<8x32xbf16> to vector<8x8xbf16>
    %cst_18 = arith.constant dense<0.000000e+00> : vector<8x8xf32>
    %53 = tpu.matmul %51, %52, %cst_18 {dimension_numbers = #tpu.dot_dimension_numbers<[1], [1], [0], [0], [0, 0, 1, 0], [], []>} : vector<8x8xbf16>, vector<8x8xbf16>, vector<8x8xf32> -> vector<8x8xf32>
    %cst_19 = arith.constant -1.000000e+09 : f32
    %54 = vector.broadcast %cst_19 : f32 to vector<8x8xf32>
    %55 = arith.select %14, %54, %53 : vector<8x8xi1>, vector<8x8xf32>
    %cst_20 = arith.constant dense<0xFF800000> : vector<8xf32>
    %56 = vector.multi_reduction <maximumf>, %55, %cst_20 [1] : vector<8x8xf32> to vector<8xf32>
    %57 = vector.shape_cast %56 : vector<8xf32> to vector<8x1xf32>
    %58 = vector.broadcast %57 : vector<8x1xf32> to vector<8x8xf32>
    %59 = arith.subf %55, %58 : vector<8x8xf32>
    %60 = math.exp %59 : vector<8x8xf32>
    %cst_21 = arith.constant dense<0.000000e+00> : vector<8xf32>
    %61 = vector.multi_reduction <add>, %60, %cst_21 [1] : vector<8x8xf32> to vector<8xf32>
    %62 = vector.shape_cast %61 : vector<8xf32> to vector<8x1xf32>
    %63 = tpu.reciprocal %62 {approx = true} : vector<8x1xf32> -> vector<8x1xf32>
    %64 = vector.broadcast %63 : vector<8x1xf32> to vector<8x8xf32>
    %65 = arith.mulf %60, %64 : vector<8x8xf32>
    %66 = arith.truncf %65 : vector<8x8xf32> to vector<8x8xbf16>
    %67 = vector.extract_strided_slice %12 {offsets = [0, 16], sizes = [8, 8], strides = [1, 1]} : vector<8x32xbf16> to vector<8x8xbf16>
    %cst_22 = arith.constant dense<0.000000e+00> : vector<8x8xf32>
    %68 = tpu.matmul %66, %67, %cst_22 {dimension_numbers = #tpu.dot_dimension_numbers<[1], [0], [0], [1], [0, 0, 1, 1], [], []>} : vector<8x8xbf16>, vector<8x8xbf16>, vector<8x8xf32> -> vector<8x8xf32>
    %69 = vector.extract_strided_slice %8 {offsets = [0, 24], sizes = [8, 8], strides = [1, 1]} : vector<8x32xbf16> to vector<8x8xbf16>
    %70 = vector.extract_strided_slice %10 {offsets = [0, 24], sizes = [8, 8], strides = [1, 1]} : vector<8x32xbf16> to vector<8x8xbf16>
    %cst_23 = arith.constant dense<0.000000e+00> : vector<8x8xf32>
    %71 = tpu.matmul %69, %70, %cst_23 {dimension_numbers = #tpu.dot_dimension_numbers<[1], [1], [0], [0], [0, 0, 1, 0], [], []>} : vector<8x8xbf16>, vector<8x8xbf16>, vector<8x8xf32> -> vector<8x8xf32>
    %cst_24 = arith.constant -1.000000e+09 : f32
    %72 = vector.broadcast %cst_24 : f32 to vector<8x8xf32>
    %73 = arith.select %14, %72, %71 : vector<8x8xi1>, vector<8x8xf32>
    %cst_25 = arith.constant dense<0xFF800000> : vector<8xf32>
    %74 = vector.multi_reduction <maximumf>, %73, %cst_25 [1] : vector<8x8xf32> to vector<8xf32>
    %75 = vector.shape_cast %74 : vector<8xf32> to vector<8x1xf32>
    %76 = vector.broadcast %75 : vector<8x1xf32> to vector<8x8xf32>
    %77 = arith.subf %73, %76 : vector<8x8xf32>
    %78 = math.exp %77 : vector<8x8xf32>
    %cst_26 = arith.constant dense<0.000000e+00> : vector<8xf32>
    %79 = vector.multi_reduction <add>, %78, %cst_26 [1] : vector<8x8xf32> to vector<8xf32>
    %80 = vector.shape_cast %79 : vector<8xf32> to vector<8x1xf32>
    %81 = tpu.reciprocal %80 {approx = true} : vector<8x1xf32> -> vector<8x1xf32>
    %82 = vector.broadcast %81 : vector<8x1xf32> to vector<8x8xf32>
    %83 = arith.mulf %78, %82 : vector<8x8xf32>
    %84 = arith.truncf %83 : vector<8x8xf32> to vector<8x8xbf16>
    %85 = vector.extract_strided_slice %12 {offsets = [0, 24], sizes = [8, 8], strides = [1, 1]} : vector<8x32xbf16> to vector<8x8xbf16>
    %cst_27 = arith.constant dense<0.000000e+00> : vector<8x8xf32>
    %86 = tpu.matmul %84, %85, %cst_27 {dimension_numbers = #tpu.dot_dimension_numbers<[1], [0], [0], [1], [0, 0, 1, 1], [], []>} : vector<8x8xbf16>, vector<8x8xbf16>, vector<8x8xf32> -> vector<8x8xf32>
    %87 = tpu.concatenate %32, %50, %68, %86 in 1 : vector<8x8xf32>, vector<8x8xf32>, vector<8x8xf32>, vector<8x8xf32> -> vector<8x32xf32>
    %c0_28 = arith.constant 0 : index
    %c0_29 = arith.constant 0 : index
    %c0_30 = arith.constant 0 : index
    %88 = vector.load %arg4[%c0_28, %c0_29, %c0_30] : memref<1x8x32xf32, #tpu.memory_space<vmem>>, vector<1x8x32xf32>
    %89 = vector.shape_cast %88 : vector<1x8x32xf32> to vector<8x32xf32>
    %90 = vector.shape_cast %87 : vector<8x32xf32> to vector<1x8x32xf32>
    tpu.vector_store %arg4[%c0_28, %c0_29, %c0_30], %90 {strides = array<i32>} : memref<1x8x32xf32, #tpu.memory_space<vmem>>, vector<1x8x32xf32>,
    return
  }
  func.func @transform_0(%arg0: i32) -> (i32, i32, i32) {
    %c0_i32 = arith.constant 0 : i32
    %c0_i32_0 = arith.constant 0 : i32
    %c0_i32_1 = arith.constant 0 : i32
    return %arg0, %c0_i32, %c0_i32_0 : i32, i32, i32
  }
  func.func @transform_1(%arg0: i32) -> (i32, i32, i32) {
    %c0_i32 = arith.constant 0 : i32
    %c0_i32_0 = arith.constant 0 : i32
    %c0_i32_1 = arith.constant 0 : i32
    return %arg0, %c0_i32, %c0_i32_0 : i32, i32, i32
  }
  func.func @transform_2(%arg0: i32) -> (i32, i32, i32) {
    %c0_i32 = arith.constant 0 : i32
    %c0_i32_0 = arith.constant 0 : i32
    %c0_i32_1 = arith.constant 0 : i32
    return %arg0, %c0_i32, %c0_i32_0 : i32, i32, i32
  }
  func.func @transform_3(%arg0: i32) -> (i32, i32, i32) {
    %c0_i32 = arith.constant 0 : i32
    %c0_i32_0 = arith.constant 0 : i32
    %c0_i32_1 = arith.constant 0 : i32
    return %arg0, %c0_i32, %c0_i32_0 : i32, i32, i32
  }
}

module attributes {stable_mosaic.version = 11 : i64} {
  func.func @_matmul_kernel(%arg0: i32, %arg1: i32, %arg2: i32, %arg3: memref<16x32xf32, #tpu.memory_space<vmem>>, %arg4: memref<32x64xbf16, #tpu.memory_space<vmem>>, %arg5: memref<1x64xf32, #tpu.memory_space<vmem>>, %arg6: memref<16x64xf32, #tpu.memory_space<vmem>>, %arg7: memref<16x64xf32, #tpu.memory_space<vmem>>) attributes {dimension_semantics = [#tpu.dimension_semantics<parallel>, #tpu.dimension_semantics<parallel>, #tpu.dimension_semantics<arbitrary>], iteration_bounds = array<i64: 1, 1, 1>, scalar_prefetch = 0 : i64, scratch_operands = 1 : i64, tpu.core_type = #tpu.core_type<tc>, window_params = [{transform_indices = @transform_0, window_bounds = array<i64: 16, 32>}, {transform_indices = @transform_1, window_bounds = array<i64: 32, 64>}, {transform_indices = @transform_2, window_bounds = array<i64: 1, 64>}, {transform_indices = @transform_3, window_bounds = array<i64: 16, 64>}]} {
    %c0_i32 = arith.constant 0 : i32
    %0 = arith.cmpi eq, %arg2, %c0_i32 : i32
    %1 = arith.extui %0 : i1 to i32
    %c0_i32_0 = arith.constant 0 : i32
    %2 = arith.cmpi ne, %1, %c0_i32_0 : i32
    scf.if %2 {
      %cst_10 = arith.constant 0.000000e+00 : f32
      %13 = vector.broadcast %cst_10 : f32 to vector<16x64xf32>
      %c0_11 = arith.constant 0 : index
      %c0_12 = arith.constant 0 : index
      %14 = vector.load %arg7[%c0_11, %c0_12] : memref<16x64xf32, #tpu.memory_space<vmem>>, vector<16x64xf32>
      tpu.vector_store %arg7[%c0_11, %c0_12], %13 {strides = array<i32>} : memref<16x64xf32, #tpu.memory_space<vmem>>, vector<16x64xf32>,
    } else {
    }
    %c0 = arith.constant 0 : index
    %c0_1 = arith.constant 0 : index
    %3 = vector.load %arg7[%c0, %c0_1] : memref<16x64xf32, #tpu.memory_space<vmem>>, vector<16x64xf32>
    %c0_2 = arith.constant 0 : index
    %c0_3 = arith.constant 0 : index
    %4 = vector.load %arg3[%c0_2, %c0_3] : memref<16x32xf32, #tpu.memory_space<vmem>>, vector<16x32xf32>
    %5 = arith.truncf %4 : vector<16x32xf32> to vector<16x32xbf16>
    %c0_4 = arith.constant 0 : index
    %c0_5 = arith.constant 0 : index
    %6 = vector.load %arg4[%c0_4, %c0_5] : memref<32x64xbf16, #tpu.memory_space<vmem>>, vector<32x64xbf16>
    %cst = arith.constant dense<0.000000e+00> : vector<16x64xf32>
    %7 = tpu.matmul %5, %6, %cst {dimension_numbers = #tpu.dot_dimension_numbers<[1], [0], [0], [1], [0, 0, 1, 1], [], []>} : vector<16x32xbf16>, vector<32x64xbf16>, vector<16x64xf32> -> vector<16x64xf32>
    %8 = arith.addf %3, %7 : vector<16x64xf32>
    %c0_6 = arith.constant 0 : index
    %c0_7 = arith.constant 0 : index
    %9 = vector.load %arg7[%c0_6, %c0_7] : memref<16x64xf32, #tpu.memory_space<vmem>>, vector<16x64xf32>
    tpu.vector_store %arg7[%c0_6, %c0_7], %8 {strides = array<i32>} : memref<16x64xf32, #tpu.memory_space<vmem>>, vector<16x64xf32>,
    %c0_i32_8 = arith.constant 0 : i32
    %10 = arith.cmpi eq, %arg2, %c0_i32_8 : i32
    %11 = arith.extui %10 : i1 to i32
    %c0_i32_9 = arith.constant 0 : i32
    %12 = arith.cmpi ne, %11, %c0_i32_9 : i32
    scf.if %12 {
      %c0_10 = arith.constant 0 : index
      %c0_11 = arith.constant 0 : index
      %13 = vector.load %arg7[%c0_10, %c0_11] : memref<16x64xf32, #tpu.memory_space<vmem>>, vector<16x64xf32>
      %c0_12 = arith.constant 0 : index
      %c0_13 = arith.constant 0 : index
      %14 = vector.load %arg5[%c0_12, %c0_13] : memref<1x64xf32, #tpu.memory_space<vmem>>, vector<1x64xf32>
      %15 = vector.broadcast %14 : vector<1x64xf32> to vector<16x64xf32>
      %16 = arith.addf %13, %15 : vector<16x64xf32>
      %c0_14 = arith.constant 0 : index
      %c0_15 = arith.constant 0 : index
      %17 = vector.load %arg6[%c0_14, %c0_15] : memref<16x64xf32, #tpu.memory_space<vmem>>, vector<16x64xf32>
      tpu.vector_store %arg6[%c0_14, %c0_15], %16 {strides = array<i32>} : memref<16x64xf32, #tpu.memory_space<vmem>>, vector<16x64xf32>,
    } else {
    }
    return
  }
  func.func @transform_0(%arg0: i32, %arg1: i32, %arg2: i32) -> (i32, i32) {
    %c0_i32 = arith.constant 0 : i32
    return %arg0, %arg2 : i32, i32
  }
  func.func @transform_1(%arg0: i32, %arg1: i32, %arg2: i32) -> (i32, i32) {
    %c0_i32 = arith.constant 0 : i32
    return %arg2, %arg1 : i32, i32
  }
  func.func @transform_2(%arg0: i32, %arg1: i32, %arg2: i32) -> (i32, i32) {
    %c0_i32 = arith.constant 0 : i32
    %c0_i32_0 = arith.constant 0 : i32
    return %c0_i32, %arg1 : i32, i32
  }
  func.func @transform_3(%arg0: i32, %arg1: i32, %arg2: i32) -> (i32, i32) {
    %c0_i32 = arith.constant 0 : i32
    return %arg0, %arg1 : i32, i32
  }
}

module attributes {stable_mosaic.version = 11 : i64} {
  func.func @_matmul_kernel(%arg0: i32, %arg1: i32, %arg2: i32, %arg3: memref<16x32xf32, #tpu.memory_space<vmem>>, %arg4: memref<32x32xbf16, #tpu.memory_space<vmem>>, %arg5: memref<1x32xf32, #tpu.memory_space<vmem>>, %arg6: memref<16x32xf32, #tpu.memory_space<vmem>>, %arg7: memref<16x32xf32, #tpu.memory_space<vmem>>) attributes {dimension_semantics = [#tpu.dimension_semantics<parallel>, #tpu.dimension_semantics<parallel>, #tpu.dimension_semantics<arbitrary>], iteration_bounds = array<i64: 1, 1, 1>, scalar_prefetch = 0 : i64, scratch_operands = 1 : i64, tpu.core_type = #tpu.core_type<tc>, window_params = [{transform_indices = @transform_0, window_bounds = array<i64: 16, 32>}, {transform_indices = @transform_1, window_bounds = array<i64: 32, 32>}, {transform_indices = @transform_2, window_bounds = array<i64: 1, 32>}, {transform_indices = @transform_3, window_bounds = array<i64: 16, 32>}]} {
    %c0_i32 = arith.constant 0 : i32
    %0 = arith.cmpi eq, %arg2, %c0_i32 : i32
    %1 = arith.extui %0 : i1 to i32
    %c0_i32_0 = arith.constant 0 : i32
    %2 = arith.cmpi ne, %1, %c0_i32_0 : i32
    scf.if %2 {
      %cst_10 = arith.constant 0.000000e+00 : f32
      %13 = vector.broadcast %cst_10 : f32 to vector<16x32xf32>
      %c0_11 = arith.constant 0 : index
      %c0_12 = arith.constant 0 : index
      %14 = vector.load %arg7[%c0_11, %c0_12] : memref<16x32xf32, #tpu.memory_space<vmem>>, vector<16x32xf32>
      tpu.vector_store %arg7[%c0_11, %c0_12], %13 {strides = array<i32>} : memref<16x32xf32, #tpu.memory_space<vmem>>, vector<16x32xf32>,
    } else {
    }
    %c0 = arith.constant 0 : index
    %c0_1 = arith.constant 0 : index
    %3 = vector.load %arg7[%c0, %c0_1] : memref<16x32xf32, #tpu.memory_space<vmem>>, vector<16x32xf32>
    %c0_2 = arith.constant 0 : index
    %c0_3 = arith.constant 0 : index
    %4 = vector.load %arg3[%c0_2, %c0_3] : memref<16x32xf32, #tpu.memory_space<vmem>>, vector<16x32xf32>
    %5 = arith.truncf %4 : vector<16x32xf32> to vector<16x32xbf16>
    %c0_4 = arith.constant 0 : index
    %c0_5 = arith.constant 0 : index
    %6 = vector.load %arg4[%c0_4, %c0_5] : memref<32x32xbf16, #tpu.memory_space<vmem>>, vector<32x32xbf16>
    %cst = arith.constant dense<0.000000e+00> : vector<16x32xf32>
    %7 = tpu.matmul %5, %6, %cst {dimension_numbers = #tpu.dot_dimension_numbers<[1], [0], [0], [1], [0, 0, 1, 1], [], []>} : vector<16x32xbf16>, vector<32x32xbf16>, vector<16x32xf32> -> vector<16x32xf32>
    %8 = arith.addf %3, %7 : vector<16x32xf32>
    %c0_6 = arith.constant 0 : index
    %c0_7 = arith.constant 0 : index
    %9 = vector.load %arg7[%c0_6, %c0_7] : memref<16x32xf32, #tpu.memory_space<vmem>>, vector<16x32xf32>
    tpu.vector_store %arg7[%c0_6, %c0_7], %8 {strides = array<i32>} : memref<16x32xf32, #tpu.memory_space<vmem>>, vector<16x32xf32>,
    %c0_i32_8 = arith.constant 0 : i32
    %10 = arith.cmpi eq, %arg2, %c0_i32_8 : i32
    %11 = arith.extui %10 : i1 to i32
    %c0_i32_9 = arith.constant 0 : i32
    %12 = arith.cmpi ne, %11, %c0_i32_9 : i32
    scf.if %12 {
      %c0_10 = arith.constant 0 : index
      %c0_11 = arith.constant 0 : index
      %13 = vector.load %arg7[%c0_10, %c0_11] : memref<16x32xf32, #tpu.memory_space<vmem>>, vector<16x32xf32>
      %c0_12 = arith.constant 0 : index
      %c0_13 = arith.constant 0 : index
      %14 = vector.load %arg5[%c0_12, %c0_13] : memref<1x32xf32, #tpu.memory_space<vmem>>, vector<1x32xf32>
      %15 = vector.broadcast %14 : vector<1x32xf32> to vector<16x32xf32>
      %16 = arith.addf %13, %15 : vector<16x32xf32>
      %c0_14 = arith.constant 0 : index
      %c0_15 = arith.constant 0 : index
      %17 = vector.load %arg6[%c0_14, %c0_15] : memref<16x32xf32, #tpu.memory_space<vmem>>, vector<16x32xf32>
      tpu.vector_store %arg6[%c0_14, %c0_15], %16 {strides = array<i32>} : memref<16x32xf32, #tpu.memory_space<vmem>>, vector<16x32xf32>,
    } else {
    }
    return
  }
  func.func @transform_0(%arg0: i32, %arg1: i32, %arg2: i32) -> (i32, i32) {
    %c0_i32 = arith.constant 0 : i32
    return %arg0, %arg2 : i32, i32
  }
  func.func @transform_1(%arg0: i32, %arg1: i32, %arg2: i32) -> (i32, i32) {
    %c0_i32 = arith.constant 0 : i32
    return %arg2, %arg1 : i32, i32
  }
  func.func @transform_2(%arg0: i32, %arg1: i32, %arg2: i32) -> (i32, i32) {
    %c0_i32 = arith.constant 0 : i32
    %c0_i32_0 = arith.constant 0 : i32
    return %c0_i32, %arg1 : i32, i32
  }
  func.func @transform_3(%arg0: i32, %arg1: i32, %arg2: i32) -> (i32, i32) {
    %c0_i32 = arith.constant 0 : i32
    return %arg0, %arg1 : i32, i32
  }
}

module attributes {stable_mosaic.version = 11 : i64} {
  func.func @_ffn_addln_kernel(%arg0: i32, %arg1: memref<16x32xf32, #tpu.memory_space<vmem>>, %arg2: memref<32x64xbf16, #tpu.memory_space<vmem>>, %arg3: memref<1x64xf32, #tpu.memory_space<vmem>>, %arg4: memref<64x32xbf16, #tpu.memory_space<vmem>>, %arg5: memref<1x32xf32, #tpu.memory_space<vmem>>, %arg6: memref<1x32xf32, #tpu.memory_space<vmem>>, %arg7: memref<1x32xf32, #tpu.memory_space<vmem>>, %arg8: memref<16x32xf32, #tpu.memory_space<vmem>>) attributes {dimension_semantics = [#tpu.dimension_semantics<parallel>], iteration_bounds = array<i64: 1>, scalar_prefetch = 0 : i64, scratch_operands = 0 : i64, tpu.core_type = #tpu.core_type<tc>, window_params = [{transform_indices = @transform_0, window_bounds = array<i64: 16, 32>}, {pipeline_mode = #tpu.pipeline_mode<synchronous>, transform_indices = @transform_1, window_bounds = array<i64: 32, 64>}, {pipeline_mode = #tpu.pipeline_mode<synchronous>, transform_indices = @transform_2, window_bounds = array<i64: 1, 64>}, {pipeline_mode = #tpu.pipeline_mode<synchronous>, transform_indices = @transform_3, window_bounds = array<i64: 64, 32>}, {pipeline_mode = #tpu.pipeline_mode<synchronous>, transform_indices = @transform_4, window_bounds = array<i64: 1, 32>}, {pipeline_mode = #tpu.pipeline_mode<synchronous>, transform_indices = @transform_5, window_bounds = array<i64: 1, 32>}, {pipeline_mode = #tpu.pipeline_mode<synchronous>, transform_indices = @transform_6, window_bounds = array<i64: 1, 32>}, {transform_indices = @transform_7, window_bounds = array<i64: 16, 32>}]} {
    %c0 = arith.constant 0 : index
    %c0_0 = arith.constant 0 : index
    %0 = vector.load %arg1[%c0, %c0_0] : memref<16x32xf32, #tpu.memory_space<vmem>>, vector<16x32xf32>
    %1 = arith.truncf %0 : vector<16x32xf32> to vector<16x32xbf16>
    %c0_1 = arith.constant 0 : index
    %c0_2 = arith.constant 0 : index
    %2 = vector.load %arg2[%c0_1, %c0_2] : memref<32x64xbf16, #tpu.memory_space<vmem>>, vector<32x64xbf16>
    %cst = arith.constant dense<0.000000e+00> : vector<16x64xf32>
    %3 = tpu.matmul %1, %2, %cst {dimension_numbers = #tpu.dot_dimension_numbers<[1], [0], [0], [1], [0, 0, 1, 1], [], []>} : vector<16x32xbf16>, vector<32x64xbf16>, vector<16x64xf32> -> vector<16x64xf32>
    %c0_3 = arith.constant 0 : index
    %c0_4 = arith.constant 0 : index
    %4 = vector.load %arg3[%c0_3, %c0_4] : memref<1x64xf32, #tpu.memory_space<vmem>>, vector<1x64xf32>
    %5 = vector.broadcast %4 : vector<1x64xf32> to vector<16x64xf32>
    %6 = arith.addf %3, %5 : vector<16x64xf32>
    %cst_5 = arith.constant 0.000000e+00 : f32
    %7 = vector.broadcast %cst_5 : f32 to vector<16x64xf32>
    %8 = arith.maximumf %6, %7 : vector<16x64xf32>
    %9 = arith.truncf %8 : vector<16x64xf32> to vector<16x64xbf16>
    %c0_6 = arith.constant 0 : index
    %c0_7 = arith.constant 0 : index
    %10 = vector.load %arg4[%c0_6, %c0_7] : memref<64x32xbf16, #tpu.memory_space<vmem>>, vector<64x32xbf16>
    %cst_8 = arith.constant dense<0.000000e+00> : vector<16x32xf32>
    %11 = tpu.matmul %9, %10, %cst_8 {dimension_numbers = #tpu.dot_dimension_numbers<[1], [0], [0], [1], [0, 0, 1, 1], [], []>} : vector<16x64xbf16>, vector<64x32xbf16>, vector<16x32xf32> -> vector<16x32xf32>
    %c0_9 = arith.constant 0 : index
    %c0_10 = arith.constant 0 : index
    %12 = vector.load %arg5[%c0_9, %c0_10] : memref<1x32xf32, #tpu.memory_space<vmem>>, vector<1x32xf32>
    %13 = vector.broadcast %12 : vector<1x32xf32> to vector<16x32xf32>
    %14 = arith.addf %11, %13 : vector<16x32xf32>
    %15 = arith.addf %0, %14 : vector<16x32xf32>
    %c0_11 = arith.constant 0 : index
    %c0_12 = arith.constant 0 : index
    %16 = vector.load %arg6[%c0_11, %c0_12] : memref<1x32xf32, #tpu.memory_space<vmem>>, vector<1x32xf32>
    %c0_13 = arith.constant 0 : index
    %c0_14 = arith.constant 0 : index
    %17 = vector.load %arg7[%c0_13, %c0_14] : memref<1x32xf32, #tpu.memory_space<vmem>>, vector<1x32xf32>
    %cst_15 = arith.constant dense<0.000000e+00> : vector<16xf32>
    %18 = vector.multi_reduction <add>, %15, %cst_15 [1] : vector<16x32xf32> to vector<16xf32>
    %19 = vector.shape_cast %18 : vector<16xf32> to vector<16x1xf32>
    %cst_16 = arith.constant 3.200000e+01 : f32
    %20 = vector.broadcast %cst_16 : f32 to vector<16x1xf32>
    %21 = arith.divf %19, %20 : vector<16x1xf32>
    %22 = vector.broadcast %21 : vector<16x1xf32> to vector<16x32xf32>
    %23 = arith.subf %15, %22 : vector<16x32xf32>
    %24 = arith.mulf %23, %23 : vector<16x32xf32>
    %cst_17 = arith.constant dense<0.000000e+00> : vector<16xf32>
    %25 = vector.multi_reduction <add>, %24, %cst_17 [1] : vector<16x32xf32> to vector<16xf32>
    %26 = vector.shape_cast %25 : vector<16xf32> to vector<16x1xf32>
    %cst_18 = arith.constant 3.200000e+01 : f32
    %27 = vector.broadcast %cst_18 : f32 to vector<16x1xf32>
    %28 = arith.divf %26, %27 : vector<16x1xf32>
    %29 = vector.broadcast %21 : vector<16x1xf32> to vector<16x32xf32>
    %30 = arith.subf %15, %29 : vector<16x32xf32>
    %cst_19 = arith.constant 9.99999974E-6 : f32
    %31 = vector.broadcast %cst_19 : f32 to vector<16x1xf32>
    %32 = arith.addf %28, %31 : vector<16x1xf32>
    %33 = math.rsqrt %32 : vector<16x1xf32>
    %34 = vector.broadcast %33 : vector<16x1xf32> to vector<16x32xf32>
    %35 = arith.mulf %30, %34 : vector<16x32xf32>
    %36 = vector.broadcast %16 : vector<1x32xf32> to vector<16x32xf32>
    %37 = arith.mulf %35, %36 : vector<16x32xf32>
    %38 = vector.broadcast %17 : vector<1x32xf32> to vector<16x32xf32>
    %39 = arith.addf %37, %38 : vector<16x32xf32>
    %c0_20 = arith.constant 0 : index
    %c0_21 = arith.constant 0 : index
    %40 = vector.load %arg8[%c0_20, %c0_21] : memref<16x32xf32, #tpu.memory_space<vmem>>, vector<16x32xf32>
    tpu.vector_store %arg8[%c0_20, %c0_21], %39 {strides = array<i32>} : memref<16x32xf32, #tpu.memory_space<vmem>>, vector<16x32xf32>,
    return
  }
  func.func @transform_0(%arg0: i32) -> (i32, i32) {
    %c0_i32 = arith.constant 0 : i32
    %c0_i32_0 = arith.constant 0 : i32
    return %arg0, %c0_i32 : i32, i32
  }
  func.func @transform_1(%arg0: i32) -> (i32, i32) {
    %c0_i32 = arith.constant 0 : i32
    %c0_i32_0 = arith.constant 0 : i32
    %c0_i32_1 = arith.constant 0 : i32
    return %c0_i32, %c0_i32_0 : i32, i32
  }
  func.func @transform_2(%arg0: i32) -> (i32, i32) {
    %c0_i32 = arith.constant 0 : i32
    %c0_i32_0 = arith.constant 0 : i32
    %c0_i32_1 = arith.constant 0 : i32
    return %c0_i32, %c0_i32_0 : i32, i32
  }
  func.func @transform_3(%arg0: i32) -> (i32, i32) {
    %c0_i32 = arith.constant 0 : i32
    %c0_i32_0 = arith.constant 0 : i32
    %c0_i32_1 = arith.constant 0 : i32
    return %c0_i32, %c0_i32_0 : i32, i32
  }
  func.func @transform_4(%arg0: i32) -> (i32, i32) {
    %c0_i32 = arith.constant 0 : i32
    %c0_i32_0 = arith.constant 0 : i32
    %c0_i32_1 = arith.constant 0 : i32
    return %c0_i32, %c0_i32_0 : i32, i32
  }
  func.func @transform_5(%arg0: i32) -> (i32, i32) {
    %c0_i32 = arith.constant 0 : i32
    %c0_i32_0 = arith.constant 0 : i32
    %c0_i32_1 = arith.constant 0 : i32
    return %c0_i32, %c0_i32_0 : i32, i32
  }
  func.func @transform_6(%arg0: i32) -> (i32, i32) {
    %c0_i32 = arith.constant 0 : i32
    %c0_i32_0 = arith.constant 0 : i32
    %c0_i32_1 = arith.constant 0 : i32
    return %c0_i32, %c0_i32_0 : i32, i32
  }
  func.func @transform_7(%arg0: i32) -> (i32, i32) {
    %c0_i32 = arith.constant 0 : i32
    %c0_i32_0 = arith.constant 0 : i32
    return %arg0, %c0_i32 : i32, i32
  }
}

module attributes {stable_mosaic.version = 11 : i64} {
  func.func @_proj_addln_kernel(%arg0: i32, %arg1: memref<16x32xf32, #tpu.memory_space<vmem>>, %arg2: memref<32x32xbf16, #tpu.memory_space<vmem>>, %arg3: memref<1x32xf32, #tpu.memory_space<vmem>>, %arg4: memref<16x32xf32, #tpu.memory_space<vmem>>, %arg5: memref<1x32xf32, #tpu.memory_space<vmem>>, %arg6: memref<1x32xf32, #tpu.memory_space<vmem>>, %arg7: memref<16x32xf32, #tpu.memory_space<vmem>>) attributes {dimension_semantics = [#tpu.dimension_semantics<parallel>], iteration_bounds = array<i64: 1>, scalar_prefetch = 0 : i64, scratch_operands = 0 : i64, tpu.core_type = #tpu.core_type<tc>, window_params = [{transform_indices = @transform_0, window_bounds = array<i64: 16, 32>}, {pipeline_mode = #tpu.pipeline_mode<synchronous>, transform_indices = @transform_1, window_bounds = array<i64: 32, 32>}, {pipeline_mode = #tpu.pipeline_mode<synchronous>, transform_indices = @transform_2, window_bounds = array<i64: 1, 32>}, {transform_indices = @transform_3, window_bounds = array<i64: 16, 32>}, {pipeline_mode = #tpu.pipeline_mode<synchronous>, transform_indices = @transform_4, window_bounds = array<i64: 1, 32>}, {pipeline_mode = #tpu.pipeline_mode<synchronous>, transform_indices = @transform_5, window_bounds = array<i64: 1, 32>}, {transform_indices = @transform_6, window_bounds = array<i64: 16, 32>}]} {
    %c0 = arith.constant 0 : index
    %c0_0 = arith.constant 0 : index
    %0 = vector.load %arg1[%c0, %c0_0] : memref<16x32xf32, #tpu.memory_space<vmem>>, vector<16x32xf32>
    %1 = arith.truncf %0 : vector<16x32xf32> to vector<16x32xbf16>
    %c0_1 = arith.constant 0 : index
    %c0_2 = arith.constant 0 : index
    %2 = vector.load %arg2[%c0_1, %c0_2] : memref<32x32xbf16, #tpu.memory_space<vmem>>, vector<32x32xbf16>
    %cst = arith.constant dense<0.000000e+00> : vector<16x32xf32>
    %3 = tpu.matmul %1, %2, %cst {dimension_numbers = #tpu.dot_dimension_numbers<[1], [0], [0], [1], [0, 0, 1, 1], [], []>} : vector<16x32xbf16>, vector<32x32xbf16>, vector<16x32xf32> -> vector<16x32xf32>
    %c0_3 = arith.constant 0 : index
    %c0_4 = arith.constant 0 : index
    %4 = vector.load %arg3[%c0_3, %c0_4] : memref<1x32xf32, #tpu.memory_space<vmem>>, vector<1x32xf32>
    %5 = vector.broadcast %4 : vector<1x32xf32> to vector<16x32xf32>
    %6 = arith.addf %3, %5 : vector<16x32xf32>
    %c0_5 = arith.constant 0 : index
    %c0_6 = arith.constant 0 : index
    %7 = vector.load %arg4[%c0_5, %c0_6] : memref<16x32xf32, #tpu.memory_space<vmem>>, vector<16x32xf32>
    %8 = arith.addf %7, %6 : vector<16x32xf32>
    %c0_7 = arith.constant 0 : index
    %c0_8 = arith.constant 0 : index
    %9 = vector.load %arg5[%c0_7, %c0_8] : memref<1x32xf32, #tpu.memory_space<vmem>>, vector<1x32xf32>
    %c0_9 = arith.constant 0 : index
    %c0_10 = arith.constant 0 : index
    %10 = vector.load %arg6[%c0_9, %c0_10] : memref<1x32xf32, #tpu.memory_space<vmem>>, vector<1x32xf32>
    %cst_11 = arith.constant dense<0.000000e+00> : vector<16xf32>
    %11 = vector.multi_reduction <add>, %8, %cst_11 [1] : vector<16x32xf32> to vector<16xf32>
    %12 = vector.shape_cast %11 : vector<16xf32> to vector<16x1xf32>
    %cst_12 = arith.constant 3.200000e+01 : f32
    %13 = vector.broadcast %cst_12 : f32 to vector<16x1xf32>
    %14 = arith.divf %12, %13 : vector<16x1xf32>
    %15 = vector.broadcast %14 : vector<16x1xf32> to vector<16x32xf32>
    %16 = arith.subf %8, %15 : vector<16x32xf32>
    %17 = arith.mulf %16, %16 : vector<16x32xf32>
    %cst_13 = arith.constant dense<0.000000e+00> : vector<16xf32>
    %18 = vector.multi_reduction <add>, %17, %cst_13 [1] : vector<16x32xf32> to vector<16xf32>
    %19 = vector.shape_cast %18 : vector<16xf32> to vector<16x1xf32>
    %cst_14 = arith.constant 3.200000e+01 : f32
    %20 = vector.broadcast %cst_14 : f32 to vector<16x1xf32>
    %21 = arith.divf %19, %20 : vector<16x1xf32>
    %22 = vector.broadcast %14 : vector<16x1xf32> to vector<16x32xf32>
    %23 = arith.subf %8, %22 : vector<16x32xf32>
    %cst_15 = arith.constant 9.99999974E-6 : f32
    %24 = vector.broadcast %cst_15 : f32 to vector<16x1xf32>
    %25 = arith.addf %21, %24 : vector<16x1xf32>
    %26 = math.rsqrt %25 : vector<16x1xf32>
    %27 = vector.broadcast %26 : vector<16x1xf32> to vector<16x32xf32>
    %28 = arith.mulf %23, %27 : vector<16x32xf32>
    %29 = vector.broadcast %9 : vector<1x32xf32> to vector<16x32xf32>
    %30 = arith.mulf %28, %29 : vector<16x32xf32>
    %31 = vector.broadcast %10 : vector<1x32xf32> to vector<16x32xf32>
    %32 = arith.addf %30, %31 : vector<16x32xf32>
    %c0_16 = arith.constant 0 : index
    %c0_17 = arith.constant 0 : index
    %33 = vector.load %arg7[%c0_16, %c0_17] : memref<16x32xf32, #tpu.memory_space<vmem>>, vector<16x32xf32>
    tpu.vector_store %arg7[%c0_16, %c0_17], %32 {strides = array<i32>} : memref<16x32xf32, #tpu.memory_space<vmem>>, vector<16x32xf32>,
    return
  }
  func.func @transform_0(%arg0: i32) -> (i32, i32) {
    %c0_i32 = arith.constant 0 : i32
    %c0_i32_0 = arith.constant 0 : i32
    return %arg0, %c0_i32 : i32, i32
  }
  func.func @transform_1(%arg0: i32) -> (i32, i32) {
    %c0_i32 = arith.constant 0 : i32
    %c0_i32_0 = arith.constant 0 : i32
    %c0_i32_1 = arith.constant 0 : i32
    return %c0_i32, %c0_i32_0 : i32, i32
  }
  func.func @transform_2(%arg0: i32) -> (i32, i32) {
    %c0_i32 = arith.constant 0 : i32
    %c0_i32_0 = arith.constant 0 : i32
    %c0_i32_1 = arith.constant 0 : i32
    return %c0_i32, %c0_i32_0 : i32, i32
  }
  func.func @transform_3(%arg0: i32) -> (i32, i32) {
    %c0_i32 = arith.constant 0 : i32
    %c0_i32_0 = arith.constant 0 : i32
    return %arg0, %c0_i32 : i32, i32
  }
  func.func @transform_4(%arg0: i32) -> (i32, i32) {
    %c0_i32 = arith.constant 0 : i32
    %c0_i32_0 = arith.constant 0 : i32
    %c0_i32_1 = arith.constant 0 : i32
    return %c0_i32, %c0_i32_0 : i32, i32
  }
  func.func @transform_5(%arg0: i32) -> (i32, i32) {
    %c0_i32 = arith.constant 0 : i32
    %c0_i32_0 = arith.constant 0 : i32
    %c0_i32_1 = arith.constant 0 : i32
    return %c0_i32, %c0_i32_0 : i32, i32
  }
  func.func @transform_6(%arg0: i32) -> (i32, i32) {
    %c0_i32 = arith.constant 0 : i32
    %c0_i32_0 = arith.constant 0 : i32
    return %arg0, %c0_i32 : i32, i32
  }
}

module attributes {stable_mosaic.version = 11 : i64} {
  func.func @_ffn_addln_kernel(%arg0: i32, %arg1: memref<16x32xf32, #tpu.memory_space<vmem>>, %arg2: memref<32x64xbf16, #tpu.memory_space<vmem>>, %arg3: memref<1x64xf32, #tpu.memory_space<vmem>>, %arg4: memref<64x32xbf16, #tpu.memory_space<vmem>>, %arg5: memref<1x32xf32, #tpu.memory_space<vmem>>, %arg6: memref<1x32xf32, #tpu.memory_space<vmem>>, %arg7: memref<1x32xf32, #tpu.memory_space<vmem>>, %arg8: memref<16x32xf32, #tpu.memory_space<vmem>>) attributes {dimension_semantics = [#tpu.dimension_semantics<parallel>], iteration_bounds = array<i64: 1>, scalar_prefetch = 0 : i64, scratch_operands = 0 : i64, tpu.core_type = #tpu.core_type<tc>, window_params = [{transform_indices = @transform_0, window_bounds = array<i64: 16, 32>}, {pipeline_mode = #tpu.pipeline_mode<synchronous>, transform_indices = @transform_1, window_bounds = array<i64: 32, 64>}, {pipeline_mode = #tpu.pipeline_mode<synchronous>, transform_indices = @transform_2, window_bounds = array<i64: 1, 64>}, {pipeline_mode = #tpu.pipeline_mode<synchronous>, transform_indices = @transform_3, window_bounds = array<i64: 64, 32>}, {pipeline_mode = #tpu.pipeline_mode<synchronous>, transform_indices = @transform_4, window_bounds = array<i64: 1, 32>}, {pipeline_mode = #tpu.pipeline_mode<synchronous>, transform_indices = @transform_5, window_bounds = array<i64: 1, 32>}, {pipeline_mode = #tpu.pipeline_mode<synchronous>, transform_indices = @transform_6, window_bounds = array<i64: 1, 32>}, {transform_indices = @transform_7, window_bounds = array<i64: 16, 32>}]} {
    %c0 = arith.constant 0 : index
    %c0_0 = arith.constant 0 : index
    %0 = vector.load %arg1[%c0, %c0_0] : memref<16x32xf32, #tpu.memory_space<vmem>>, vector<16x32xf32>
    %1 = arith.truncf %0 : vector<16x32xf32> to vector<16x32xbf16>
    %c0_1 = arith.constant 0 : index
    %c0_2 = arith.constant 0 : index
    %2 = vector.load %arg2[%c0_1, %c0_2] : memref<32x64xbf16, #tpu.memory_space<vmem>>, vector<32x64xbf16>
    %cst = arith.constant dense<0.000000e+00> : vector<16x64xf32>
    %3 = tpu.matmul %1, %2, %cst {dimension_numbers = #tpu.dot_dimension_numbers<[1], [0], [0], [1], [0, 0, 1, 1], [], []>} : vector<16x32xbf16>, vector<32x64xbf16>, vector<16x64xf32> -> vector<16x64xf32>
    %c0_3 = arith.constant 0 : index
    %c0_4 = arith.constant 0 : index
    %4 = vector.load %arg3[%c0_3, %c0_4] : memref<1x64xf32, #tpu.memory_space<vmem>>, vector<1x64xf32>
    %5 = vector.broadcast %4 : vector<1x64xf32> to vector<16x64xf32>
    %6 = arith.addf %3, %5 : vector<16x64xf32>
    %cst_5 = arith.constant 0.000000e+00 : f32
    %7 = vector.broadcast %cst_5 : f32 to vector<16x64xf32>
    %8 = arith.maximumf %6, %7 : vector<16x64xf32>
    %9 = arith.truncf %8 : vector<16x64xf32> to vector<16x64xbf16>
    %c0_6 = arith.constant 0 : index
    %c0_7 = arith.constant 0 : index
    %10 = vector.load %arg4[%c0_6, %c0_7] : memref<64x32xbf16, #tpu.memory_space<vmem>>, vector<64x32xbf16>
    %cst_8 = arith.constant dense<0.000000e+00> : vector<16x32xf32>
    %11 = tpu.matmul %9, %10, %cst_8 {dimension_numbers = #tpu.dot_dimension_numbers<[1], [0], [0], [1], [0, 0, 1, 1], [], []>} : vector<16x64xbf16>, vector<64x32xbf16>, vector<16x32xf32> -> vector<16x32xf32>
    %c0_9 = arith.constant 0 : index
    %c0_10 = arith.constant 0 : index
    %12 = vector.load %arg5[%c0_9, %c0_10] : memref<1x32xf32, #tpu.memory_space<vmem>>, vector<1x32xf32>
    %13 = vector.broadcast %12 : vector<1x32xf32> to vector<16x32xf32>
    %14 = arith.addf %11, %13 : vector<16x32xf32>
    %15 = arith.addf %0, %14 : vector<16x32xf32>
    %c0_11 = arith.constant 0 : index
    %c0_12 = arith.constant 0 : index
    %16 = vector.load %arg6[%c0_11, %c0_12] : memref<1x32xf32, #tpu.memory_space<vmem>>, vector<1x32xf32>
    %c0_13 = arith.constant 0 : index
    %c0_14 = arith.constant 0 : index
    %17 = vector.load %arg7[%c0_13, %c0_14] : memref<1x32xf32, #tpu.memory_space<vmem>>, vector<1x32xf32>
    %cst_15 = arith.constant dense<0.000000e+00> : vector<16xf32>
    %18 = vector.multi_reduction <add>, %15, %cst_15 [1] : vector<16x32xf32> to vector<16xf32>
    %19 = vector.shape_cast %18 : vector<16xf32> to vector<16x1xf32>
    %cst_16 = arith.constant 3.200000e+01 : f32
    %20 = vector.broadcast %cst_16 : f32 to vector<16x1xf32>
    %21 = arith.divf %19, %20 : vector<16x1xf32>
    %22 = vector.broadcast %21 : vector<16x1xf32> to vector<16x32xf32>
    %23 = arith.subf %15, %22 : vector<16x32xf32>
    %24 = arith.mulf %23, %23 : vector<16x32xf32>
    %cst_17 = arith.constant dense<0.000000e+00> : vector<16xf32>
    %25 = vector.multi_reduction <add>, %24, %cst_17 [1] : vector<16x32xf32> to vector<16xf32>
    %26 = vector.shape_cast %25 : vector<16xf32> to vector<16x1xf32>
    %cst_18 = arith.constant 3.200000e+01 : f32
    %27 = vector.broadcast %cst_18 : f32 to vector<16x1xf32>
    %28 = arith.divf %26, %27 : vector<16x1xf32>
    %29 = vector.broadcast %21 : vector<16x1xf32> to vector<16x32xf32>
    %30 = arith.subf %15, %29 : vector<16x32xf32>
    %cst_19 = arith.constant 9.99999974E-6 : f32
    %31 = vector.broadcast %cst_19 : f32 to vector<16x1xf32>
    %32 = arith.addf %28, %31 : vector<16x1xf32>
    %33 = math.rsqrt %32 : vector<16x1xf32>
    %34 = vector.broadcast %33 : vector<16x1xf32> to vector<16x32xf32>
    %35 = arith.mulf %30, %34 : vector<16x32xf32>
    %36 = vector.broadcast %16 : vector<1x32xf32> to vector<16x32xf32>
    %37 = arith.mulf %35, %36 : vector<16x32xf32>
    %38 = vector.broadcast %17 : vector<1x32xf32> to vector<16x32xf32>
    %39 = arith.addf %37, %38 : vector<16x32xf32>
    %c0_20 = arith.constant 0 : index
    %c0_21 = arith.constant 0 : index
    %40 = vector.load %arg8[%c0_20, %c0_21] : memref<16x32xf32, #tpu.memory_space<vmem>>, vector<16x32xf32>
    tpu.vector_store %arg8[%c0_20, %c0_21], %39 {strides = array<i32>} : memref<16x32xf32, #tpu.memory_space<vmem>>, vector<16x32xf32>,
    return
  }
  func.func @transform_0(%arg0: i32) -> (i32, i32) {
    %c0_i32 = arith.constant 0 : i32
    %c0_i32_0 = arith.constant 0 : i32
    return %arg0, %c0_i32 : i32, i32
  }
  func.func @transform_1(%arg0: i32) -> (i32, i32) {
    %c0_i32 = arith.constant 0 : i32
    %c0_i32_0 = arith.constant 0 : i32
    %c0_i32_1 = arith.constant 0 : i32
    return %c0_i32, %c0_i32_0 : i32, i32
  }
  func.func @transform_2(%arg0: i32) -> (i32, i32) {
    %c0_i32 = arith.constant 0 : i32
    %c0_i32_0 = arith.constant 0 : i32
    %c0_i32_1 = arith.constant 0 : i32
    return %c0_i32, %c0_i32_0 : i32, i32
  }
  func.func @transform_3(%arg0: i32) -> (i32, i32) {
    %c0_i32 = arith.constant 0 : i32
    %c0_i32_0 = arith.constant 0 : i32
    %c0_i32_1 = arith.constant 0 : i32
    return %c0_i32, %c0_i32_0 : i32, i32
  }
  func.func @transform_4(%arg0: i32) -> (i32, i32) {
    %c0_i32 = arith.constant 0 : i32
    %c0_i32_0 = arith.constant 0 : i32
    %c0_i32_1 = arith.constant 0 : i32
    return %c0_i32, %c0_i32_0 : i32, i32
  }
  func.func @transform_5(%arg0: i32) -> (i32, i32) {
    %c0_i32 = arith.constant 0 : i32
    %c0_i32_0 = arith.constant 0 : i32
    %c0_i32_1 = arith.constant 0 : i32
    return %c0_i32, %c0_i32_0 : i32, i32
  }
  func.func @transform_6(%arg0: i32) -> (i32, i32) {
    %c0_i32 = arith.constant 0 : i32
    %c0_i32_0 = arith.constant 0 : i32
    %c0_i32_1 = arith.constant 0 : i32
    return %c0_i32, %c0_i32_0 : i32, i32
  }
  func.func @transform_7(%arg0: i32) -> (i32, i32) {
    %c0_i32 = arith.constant 0 : i32
    %c0_i32_0 = arith.constant 0 : i32
    return %arg0, %c0_i32 : i32, i32
  }
}

module attributes {stable_mosaic.version = 11 : i64} {
  func.func @_proj_addln_kernel(%arg0: i32, %arg1: memref<16x32xf32, #tpu.memory_space<vmem>>, %arg2: memref<32x32xbf16, #tpu.memory_space<vmem>>, %arg3: memref<1x32xf32, #tpu.memory_space<vmem>>, %arg4: memref<16x32xf32, #tpu.memory_space<vmem>>, %arg5: memref<1x32xf32, #tpu.memory_space<vmem>>, %arg6: memref<1x32xf32, #tpu.memory_space<vmem>>, %arg7: memref<16x32xf32, #tpu.memory_space<vmem>>) attributes {dimension_semantics = [#tpu.dimension_semantics<parallel>], iteration_bounds = array<i64: 1>, scalar_prefetch = 0 : i64, scratch_operands = 0 : i64, tpu.core_type = #tpu.core_type<tc>, window_params = [{transform_indices = @transform_0, window_bounds = array<i64: 16, 32>}, {pipeline_mode = #tpu.pipeline_mode<synchronous>, transform_indices = @transform_1, window_bounds = array<i64: 32, 32>}, {pipeline_mode = #tpu.pipeline_mode<synchronous>, transform_indices = @transform_2, window_bounds = array<i64: 1, 32>}, {transform_indices = @transform_3, window_bounds = array<i64: 16, 32>}, {pipeline_mode = #tpu.pipeline_mode<synchronous>, transform_indices = @transform_4, window_bounds = array<i64: 1, 32>}, {pipeline_mode = #tpu.pipeline_mode<synchronous>, transform_indices = @transform_5, window_bounds = array<i64: 1, 32>}, {transform_indices = @transform_6, window_bounds = array<i64: 16, 32>}]} {
    %c0 = arith.constant 0 : index
    %c0_0 = arith.constant 0 : index
    %0 = vector.load %arg1[%c0, %c0_0] : memref<16x32xf32, #tpu.memory_space<vmem>>, vector<16x32xf32>
    %1 = arith.truncf %0 : vector<16x32xf32> to vector<16x32xbf16>
    %c0_1 = arith.constant 0 : index
    %c0_2 = arith.constant 0 : index
    %2 = vector.load %arg2[%c0_1, %c0_2] : memref<32x32xbf16, #tpu.memory_space<vmem>>, vector<32x32xbf16>
    %cst = arith.constant dense<0.000000e+00> : vector<16x32xf32>
    %3 = tpu.matmul %1, %2, %cst {dimension_numbers = #tpu.dot_dimension_numbers<[1], [0], [0], [1], [0, 0, 1, 1], [], []>} : vector<16x32xbf16>, vector<32x32xbf16>, vector<16x32xf32> -> vector<16x32xf32>
    %c0_3 = arith.constant 0 : index
    %c0_4 = arith.constant 0 : index
    %4 = vector.load %arg3[%c0_3, %c0_4] : memref<1x32xf32, #tpu.memory_space<vmem>>, vector<1x32xf32>
    %5 = vector.broadcast %4 : vector<1x32xf32> to vector<16x32xf32>
    %6 = arith.addf %3, %5 : vector<16x32xf32>
    %c0_5 = arith.constant 0 : index
    %c0_6 = arith.constant 0 : index
    %7 = vector.load %arg4[%c0_5, %c0_6] : memref<16x32xf32, #tpu.memory_space<vmem>>, vector<16x32xf32>
    %8 = arith.addf %7, %6 : vector<16x32xf32>
    %c0_7 = arith.constant 0 : index
    %c0_8 = arith.constant 0 : index
    %9 = vector.load %arg5[%c0_7, %c0_8] : memref<1x32xf32, #tpu.memory_space<vmem>>, vector<1x32xf32>
    %c0_9 = arith.constant 0 : index
    %c0_10 = arith.constant 0 : index
    %10 = vector.load %arg6[%c0_9, %c0_10] : memref<1x32xf32, #tpu.memory_space<vmem>>, vector<1x32xf32>
    %cst_11 = arith.constant dense<0.000000e+00> : vector<16xf32>
    %11 = vector.multi_reduction <add>, %8, %cst_11 [1] : vector<16x32xf32> to vector<16xf32>
    %12 = vector.shape_cast %11 : vector<16xf32> to vector<16x1xf32>
    %cst_12 = arith.constant 3.200000e+01 : f32
    %13 = vector.broadcast %cst_12 : f32 to vector<16x1xf32>
    %14 = arith.divf %12, %13 : vector<16x1xf32>
    %15 = vector.broadcast %14 : vector<16x1xf32> to vector<16x32xf32>
    %16 = arith.subf %8, %15 : vector<16x32xf32>
    %17 = arith.mulf %16, %16 : vector<16x32xf32>
    %cst_13 = arith.constant dense<0.000000e+00> : vector<16xf32>
    %18 = vector.multi_reduction <add>, %17, %cst_13 [1] : vector<16x32xf32> to vector<16xf32>
    %19 = vector.shape_cast %18 : vector<16xf32> to vector<16x1xf32>
    %cst_14 = arith.constant 3.200000e+01 : f32
    %20 = vector.broadcast %cst_14 : f32 to vector<16x1xf32>
    %21 = arith.divf %19, %20 : vector<16x1xf32>
    %22 = vector.broadcast %14 : vector<16x1xf32> to vector<16x32xf32>
    %23 = arith.subf %8, %22 : vector<16x32xf32>
    %cst_15 = arith.constant 9.99999974E-6 : f32
    %24 = vector.broadcast %cst_15 : f32 to vector<16x1xf32>
    %25 = arith.addf %21, %24 : vector<16x1xf32>
    %26 = math.rsqrt %25 : vector<16x1xf32>
    %27 = vector.broadcast %26 : vector<16x1xf32> to vector<16x32xf32>
    %28 = arith.mulf %23, %27 : vector<16x32xf32>
    %29 = vector.broadcast %9 : vector<1x32xf32> to vector<16x32xf32>
    %30 = arith.mulf %28, %29 : vector<16x32xf32>
    %31 = vector.broadcast %10 : vector<1x32xf32> to vector<16x32xf32>
    %32 = arith.addf %30, %31 : vector<16x32xf32>
    %c0_16 = arith.constant 0 : index
    %c0_17 = arith.constant 0 : index
    %33 = vector.load %arg7[%c0_16, %c0_17] : memref<16x32xf32, #tpu.memory_space<vmem>>, vector<16x32xf32>
    tpu.vector_store %arg7[%c0_16, %c0_17], %32 {strides = array<i32>} : memref<16x32xf32, #tpu.memory_space<vmem>>, vector<16x32xf32>,
    return
  }
  func.func @transform_0(%arg0: i32) -> (i32, i32) {
    %c0_i32 = arith.constant 0 : i32
    %c0_i32_0 = arith.constant 0 : i32
    return %arg0, %c0_i32 : i32, i32
  }
  func.func @transform_1(%arg0: i32) -> (i32, i32) {
    %c0_i32 = arith.constant 0 : i32
    %c0_i32_0 = arith.constant 0 : i32
    %c0_i32_1 = arith.constant 0 : i32
    return %c0_i32, %c0_i32_0 : i32, i32
  }
  func.func @transform_2(%arg0: i32) -> (i32, i32) {
    %c0_i32 = arith.constant 0 : i32
    %c0_i32_0 = arith.constant 0 : i32
    %c0_i32_1 = arith.constant 0 : i32
    return %c0_i32, %c0_i32_0 : i32, i32
  }
  func.func @transform_3(%arg0: i32) -> (i32, i32) {
    %c0_i32 = arith.constant 0 : i32
    %c0_i32_0 = arith.constant 0 : i32
    return %arg0, %c0_i32 : i32, i32
  }
  func.func @transform_4(%arg0: i32) -> (i32, i32) {
    %c0_i32 = arith.constant 0 : i32
    %c0_i32_0 = arith.constant 0 : i32
    %c0_i32_1 = arith.constant 0 : i32
    return %c0_i32, %c0_i32_0 : i32, i32
  }
  func.func @transform_5(%arg0: i32) -> (i32, i32) {
    %c0_i32 = arith.constant 0 : i32
    %c0_i32_0 = arith.constant 0 : i32
    %c0_i32_1 = arith.constant 0 : i32
    return %c0_i32, %c0_i32_0 : i32, i32
  }
  func.func @transform_6(%arg0: i32) -> (i32, i32) {
    %c0_i32 = arith.constant 0 : i32
    %c0_i32_0 = arith.constant 0 : i32
    return %arg0, %c0_i32 : i32, i32
  }
}

module attributes {stable_mosaic.version = 11 : i64} {
  func.func @_proj_addln_kernel(%arg0: i32, %arg1: memref<16x32xf32, #tpu.memory_space<vmem>>, %arg2: memref<32x32xbf16, #tpu.memory_space<vmem>>, %arg3: memref<1x32xf32, #tpu.memory_space<vmem>>, %arg4: memref<16x32xf32, #tpu.memory_space<vmem>>, %arg5: memref<1x32xf32, #tpu.memory_space<vmem>>, %arg6: memref<1x32xf32, #tpu.memory_space<vmem>>, %arg7: memref<16x32xf32, #tpu.memory_space<vmem>>) attributes {dimension_semantics = [#tpu.dimension_semantics<parallel>], iteration_bounds = array<i64: 1>, scalar_prefetch = 0 : i64, scratch_operands = 0 : i64, tpu.core_type = #tpu.core_type<tc>, window_params = [{transform_indices = @transform_0, window_bounds = array<i64: 16, 32>}, {pipeline_mode = #tpu.pipeline_mode<synchronous>, transform_indices = @transform_1, window_bounds = array<i64: 32, 32>}, {pipeline_mode = #tpu.pipeline_mode<synchronous>, transform_indices = @transform_2, window_bounds = array<i64: 1, 32>}, {transform_indices = @transform_3, window_bounds = array<i64: 16, 32>}, {pipeline_mode = #tpu.pipeline_mode<synchronous>, transform_indices = @transform_4, window_bounds = array<i64: 1, 32>}, {pipeline_mode = #tpu.pipeline_mode<synchronous>, transform_indices = @transform_5, window_bounds = array<i64: 1, 32>}, {transform_indices = @transform_6, window_bounds = array<i64: 16, 32>}]} {
    %c0 = arith.constant 0 : index
    %c0_0 = arith.constant 0 : index
    %0 = vector.load %arg1[%c0, %c0_0] : memref<16x32xf32, #tpu.memory_space<vmem>>, vector<16x32xf32>
    %1 = arith.truncf %0 : vector<16x32xf32> to vector<16x32xbf16>
    %c0_1 = arith.constant 0 : index
    %c0_2 = arith.constant 0 : index
    %2 = vector.load %arg2[%c0_1, %c0_2] : memref<32x32xbf16, #tpu.memory_space<vmem>>, vector<32x32xbf16>
    %cst = arith.constant dense<0.000000e+00> : vector<16x32xf32>
    %3 = tpu.matmul %1, %2, %cst {dimension_numbers = #tpu.dot_dimension_numbers<[1], [0], [0], [1], [0, 0, 1, 1], [], []>} : vector<16x32xbf16>, vector<32x32xbf16>, vector<16x32xf32> -> vector<16x32xf32>
    %c0_3 = arith.constant 0 : index
    %c0_4 = arith.constant 0 : index
    %4 = vector.load %arg3[%c0_3, %c0_4] : memref<1x32xf32, #tpu.memory_space<vmem>>, vector<1x32xf32>
    %5 = vector.broadcast %4 : vector<1x32xf32> to vector<16x32xf32>
    %6 = arith.addf %3, %5 : vector<16x32xf32>
    %c0_5 = arith.constant 0 : index
    %c0_6 = arith.constant 0 : index
    %7 = vector.load %arg4[%c0_5, %c0_6] : memref<16x32xf32, #tpu.memory_space<vmem>>, vector<16x32xf32>
    %8 = arith.addf %7, %6 : vector<16x32xf32>
    %c0_7 = arith.constant 0 : index
    %c0_8 = arith.constant 0 : index
    %9 = vector.load %arg5[%c0_7, %c0_8] : memref<1x32xf32, #tpu.memory_space<vmem>>, vector<1x32xf32>
    %c0_9 = arith.constant 0 : index
    %c0_10 = arith.constant 0 : index
    %10 = vector.load %arg6[%c0_9, %c0_10] : memref<1x32xf32, #tpu.memory_space<vmem>>, vector<1x32xf32>
    %cst_11 = arith.constant dense<0.000000e+00> : vector<16xf32>
    %11 = vector.multi_reduction <add>, %8, %cst_11 [1] : vector<16x32xf32> to vector<16xf32>
    %12 = vector.shape_cast %11 : vector<16xf32> to vector<16x1xf32>
    %cst_12 = arith.constant 3.200000e+01 : f32
    %13 = vector.broadcast %cst_12 : f32 to vector<16x1xf32>
    %14 = arith.divf %12, %13 : vector<16x1xf32>
    %15 = vector.broadcast %14 : vector<16x1xf32> to vector<16x32xf32>
    %16 = arith.subf %8, %15 : vector<16x32xf32>
    %17 = arith.mulf %16, %16 : vector<16x32xf32>
    %cst_13 = arith.constant dense<0.000000e+00> : vector<16xf32>
    %18 = vector.multi_reduction <add>, %17, %cst_13 [1] : vector<16x32xf32> to vector<16xf32>
    %19 = vector.shape_cast %18 : vector<16xf32> to vector<16x1xf32>
    %cst_14 = arith.constant 3.200000e+01 : f32
    %20 = vector.broadcast %cst_14 : f32 to vector<16x1xf32>
    %21 = arith.divf %19, %20 : vector<16x1xf32>
    %22 = vector.broadcast %14 : vector<16x1xf32> to vector<16x32xf32>
    %23 = arith.subf %8, %22 : vector<16x32xf32>
    %cst_15 = arith.constant 9.99999974E-6 : f32
    %24 = vector.broadcast %cst_15 : f32 to vector<16x1xf32>
    %25 = arith.addf %21, %24 : vector<16x1xf32>
    %26 = math.rsqrt %25 : vector<16x1xf32>
    %27 = vector.broadcast %26 : vector<16x1xf32> to vector<16x32xf32>
    %28 = arith.mulf %23, %27 : vector<16x32xf32>
    %29 = vector.broadcast %9 : vector<1x32xf32> to vector<16x32xf32>
    %30 = arith.mulf %28, %29 : vector<16x32xf32>
    %31 = vector.broadcast %10 : vector<1x32xf32> to vector<16x32xf32>
    %32 = arith.addf %30, %31 : vector<16x32xf32>
    %c0_16 = arith.constant 0 : index
    %c0_17 = arith.constant 0 : index
    %33 = vector.load %arg7[%c0_16, %c0_17] : memref<16x32xf32, #tpu.memory_space<vmem>>, vector<16x32xf32>
    tpu.vector_store %arg7[%c0_16, %c0_17], %32 {strides = array<i32>} : memref<16x32xf32, #tpu.memory_space<vmem>>, vector<16x32xf32>,
    return
  }
  func.func @transform_0(%arg0: i32) -> (i32, i32) {
    %c0_i32 = arith.constant 0 : i32
    %c0_i32_0 = arith.constant 0 : i32
    return %arg0, %c0_i32 : i32, i32
  }
  func.func @transform_1(%arg0: i32) -> (i32, i32) {
    %c0_i32 = arith.constant 0 : i32
    %c0_i32_0 = arith.constant 0 : i32
    %c0_i32_1 = arith.constant 0 : i32
    return %c0_i32, %c0_i32_0 : i32, i32
  }
  func.func @transform_2(%arg0: i32) -> (i32, i32) {
    %c0_i32 = arith.constant 0 : i32
    %c0_i32_0 = arith.constant 0 : i32
    %c0_i32_1 = arith.constant 0 : i32
    return %c0_i32, %c0_i32_0 : i32, i32
  }
  func.func @transform_3(%arg0: i32) -> (i32, i32) {
    %c0_i32 = arith.constant 0 : i32
    %c0_i32_0 = arith.constant 0 : i32
    return %arg0, %c0_i32 : i32, i32
  }
  func.func @transform_4(%arg0: i32) -> (i32, i32) {
    %c0_i32 = arith.constant 0 : i32
    %c0_i32_0 = arith.constant 0 : i32
    %c0_i32_1 = arith.constant 0 : i32
    return %c0_i32, %c0_i32_0 : i32, i32
  }
  func.func @transform_5(%arg0: i32) -> (i32, i32) {
    %c0_i32 = arith.constant 0 : i32
    %c0_i32_0 = arith.constant 0 : i32
    %c0_i32_1 = arith.constant 0 : i32
    return %c0_i32, %c0_i32_0 : i32, i32
  }
  func.func @transform_6(%arg0: i32) -> (i32, i32) {
    %c0_i32 = arith.constant 0 : i32
    %c0_i32_0 = arith.constant 0 : i32
    return %arg0, %c0_i32 : i32, i32
  }
}

module attributes {stable_mosaic.version = 11 : i64} {
  func.func @_matmul_kernel(%arg0: i32, %arg1: i32, %arg2: i32, %arg3: memref<16x32xf32, #tpu.memory_space<vmem>>, %arg4: memref<32x16xbf16, #tpu.memory_space<vmem>>, %arg5: memref<1x16xf32, #tpu.memory_space<vmem>>, %arg6: memref<16x16xf32, #tpu.memory_space<vmem>>, %arg7: memref<16x16xf32, #tpu.memory_space<vmem>>) attributes {dimension_semantics = [#tpu.dimension_semantics<parallel>, #tpu.dimension_semantics<parallel>, #tpu.dimension_semantics<arbitrary>], iteration_bounds = array<i64: 1, 1, 1>, scalar_prefetch = 0 : i64, scratch_operands = 1 : i64, tpu.core_type = #tpu.core_type<tc>, window_params = [{transform_indices = @transform_0, window_bounds = array<i64: 16, 32>}, {transform_indices = @transform_1, window_bounds = array<i64: 32, 16>}, {transform_indices = @transform_2, window_bounds = array<i64: 1, 16>}, {transform_indices = @transform_3, window_bounds = array<i64: 16, 16>}]} {
    %c0_i32 = arith.constant 0 : i32
    %0 = arith.cmpi eq, %arg2, %c0_i32 : i32
    %1 = arith.extui %0 : i1 to i32
    %c0_i32_0 = arith.constant 0 : i32
    %2 = arith.cmpi ne, %1, %c0_i32_0 : i32
    scf.if %2 {
      %cst_10 = arith.constant 0.000000e+00 : f32
      %13 = vector.broadcast %cst_10 : f32 to vector<16x16xf32>
      %c0_11 = arith.constant 0 : index
      %c0_12 = arith.constant 0 : index
      %14 = vector.load %arg7[%c0_11, %c0_12] : memref<16x16xf32, #tpu.memory_space<vmem>>, vector<16x16xf32>
      tpu.vector_store %arg7[%c0_11, %c0_12], %13 {strides = array<i32>} : memref<16x16xf32, #tpu.memory_space<vmem>>, vector<16x16xf32>,
    } else {
    }
    %c0 = arith.constant 0 : index
    %c0_1 = arith.constant 0 : index
    %3 = vector.load %arg7[%c0, %c0_1] : memref<16x16xf32, #tpu.memory_space<vmem>>, vector<16x16xf32>
    %c0_2 = arith.constant 0 : index
    %c0_3 = arith.constant 0 : index
    %4 = vector.load %arg3[%c0_2, %c0_3] : memref<16x32xf32, #tpu.memory_space<vmem>>, vector<16x32xf32>
    %5 = arith.truncf %4 : vector<16x32xf32> to vector<16x32xbf16>
    %c0_4 = arith.constant 0 : index
    %c0_5 = arith.constant 0 : index
    %6 = vector.load %arg4[%c0_4, %c0_5] : memref<32x16xbf16, #tpu.memory_space<vmem>>, vector<32x16xbf16>
    %cst = arith.constant dense<0.000000e+00> : vector<16x16xf32>
    %7 = tpu.matmul %5, %6, %cst {dimension_numbers = #tpu.dot_dimension_numbers<[1], [0], [0], [1], [0, 0, 1, 1], [], []>} : vector<16x32xbf16>, vector<32x16xbf16>, vector<16x16xf32> -> vector<16x16xf32>
    %8 = arith.addf %3, %7 : vector<16x16xf32>
    %c0_6 = arith.constant 0 : index
    %c0_7 = arith.constant 0 : index
    %9 = vector.load %arg7[%c0_6, %c0_7] : memref<16x16xf32, #tpu.memory_space<vmem>>, vector<16x16xf32>
    tpu.vector_store %arg7[%c0_6, %c0_7], %8 {strides = array<i32>} : memref<16x16xf32, #tpu.memory_space<vmem>>, vector<16x16xf32>,
    %c0_i32_8 = arith.constant 0 : i32
    %10 = arith.cmpi eq, %arg2, %c0_i32_8 : i32
    %11 = arith.extui %10 : i1 to i32
    %c0_i32_9 = arith.constant 0 : i32
    %12 = arith.cmpi ne, %11, %c0_i32_9 : i32
    scf.if %12 {
      %c0_10 = arith.constant 0 : index
      %c0_11 = arith.constant 0 : index
      %13 = vector.load %arg7[%c0_10, %c0_11] : memref<16x16xf32, #tpu.memory_space<vmem>>, vector<16x16xf32>
      %c0_12 = arith.constant 0 : index
      %c0_13 = arith.constant 0 : index
      %14 = vector.load %arg5[%c0_12, %c0_13] : memref<1x16xf32, #tpu.memory_space<vmem>>, vector<1x16xf32>
      %15 = vector.broadcast %14 : vector<1x16xf32> to vector<16x16xf32>
      %16 = arith.addf %13, %15 : vector<16x16xf32>
      %c0_14 = arith.constant 0 : index
      %c0_15 = arith.constant 0 : index
      %17 = vector.load %arg6[%c0_14, %c0_15] : memref<16x16xf32, #tpu.memory_space<vmem>>, vector<16x16xf32>
      tpu.vector_store %arg6[%c0_14, %c0_15], %16 {strides = array<i32>} : memref<16x16xf32, #tpu.memory_space<vmem>>, vector<16x16xf32>,
    } else {
    }
    return
  }
  func.func @transform_0(%arg0: i32, %arg1: i32, %arg2: i32) -> (i32, i32) {
    %c0_i32 = arith.constant 0 : i32
    return %arg0, %arg2 : i32, i32
  }
  func.func @transform_1(%arg0: i32, %arg1: i32, %arg2: i32) -> (i32, i32) {
    %c0_i32 = arith.constant 0 : i32
    return %arg2, %arg1 : i32, i32
  }
  func.func @transform_2(%arg0: i32, %arg1: i32, %arg2: i32) -> (i32, i32) {
    %c0_i32 = arith.constant 0 : i32
    %c0_i32_0 = arith.constant 0 : i32
    return %c0_i32, %arg1 : i32, i32
  }
  func.func @transform_3(%arg0: i32, %arg1: i32, %arg2: i32) -> (i32, i32) {
    %c0_i32 = arith.constant 0 : i32
    return %arg0, %arg1 : i32, i32
  }
}

</mosaic_0001>

<bundles_post_ra>
// kernel: transformer_forward.29
= control target key start
LH: loop header
LB: loop body
LE: loop exit
PB: predicated region body
PF: predicated region fallthrough
CT: control target
= control target key end

     0   :  { %vm19_vm0 = vcmask 261120   ;;  %v95_v1 = vmov 0.0   ;;  %s144_s1 = inlined_call_operand.vmem [shape: bf16[32,32], index: 1, kind: input, shape index: {}]   ;;  %s145_s0 = inlined_call_operand.vmem [shape: f32[16,32], index: 0, kind: input, shape index: {}]   ;;  %s146_s2 = inlined_call_operand.vmem [shape: f32[1,32], index: 2, kind: input, shape index: {}]   ;;  %s147_s3 = inlined_call_operand.vmem [shape: f32[16,32], index: 3, kind: output, shape index: {}]  }
   0x1   :  { %v92_v0 = vld [vmem:[%s144_s1 + $0x8] sm:$0xff]  ;;  %20 = vst.msk [vmem:[#allocation2] sm:$0xff] %vm19_vm0, %v95_v1  ;;  %v91_v2 = vld [vmem:[%s144_s1] sm:$0xff] }
   0x2   :  { %21 = vst.msk [vmem:[#allocation2 + $0x8] sm:$0xff] %vm19_vm0, %v95_v1  ;;  %53 = vmatpush.bf16.msra.mxu0 %v92_v0  ;;  %v24_v3 = vld [vmem:[%s145_s0] sm:$0xff]  ;;  %v25_v4 = vld [vmem:[%s145_s0 + $0x8] sm:$0xff] }
   0x3   :  { %v26_v5 = vpack.c.bf16 %v25_v4, %v24_v3  ;;  %v94_v10 = vld [vmem:[%s146_s2] ss:$0 sm:$0xff] }
   0x6   :  { %54 = vmatpush.bf16.msra.mxu0 %v91_v2 }
   0x8   :  { %v22_v6 = vld [vmem:[#allocation2] sm:$0xff] }
   0x9   :  { %90 = vmatmul.msk.bf16.vlgmr.msra.gmra.mxu0 %vm19_vm0, %v26_v5  ;;  %v23_v9 = vld [vmem:[#allocation2 + $0x8] sm:$0xff] }
  0x86   :  { %v56_v7 = vpop.f32.mrf.mxu0 }
  0x87   :  { %v61_v8 = vadd.f32 %v56_v7, %v22_v6 }
  0x89   :  { %63 = vst.msk [vmem:[#allocation2] sm:$0xff] %vm19_vm0, %v61_v8 }
  0x8e   :  { %v58_v11 = vpop.f32.mrf.mxu0 }
  0x8f   :  { %v62_v12 = vadd.f32 %v58_v11, %v23_v9 }
  0x90   :  { %v68_v13 = vld [vmem:[#allocation2] sm:$0xff] }
  0x91   :  { %v74_v14 = vadd.f32 %v94_v10, %v68_v13  ;;  %64 = vst.msk [vmem:[#allocation2 + $0x8] sm:$0xff] %vm19_vm0, %v62_v12 }
  0x93   :  { %76 = vst.msk [vmem:[%s147_s3] sm:$0xff] %vm19_vm0, %v74_v14 }
  0x98   :  { %v69_v15 = vld [vmem:[#allocation2 + $0x8] sm:$0xff] }
  0x99   :  { %v75_v16 = vadd.f32 %v94_v10, %v69_v15 }
  0x9b   :  { %77 = vst.msk [vmem:[%s147_s3 + $0x8] sm:$0xff] %vm19_vm0, %v75_v16 }

// kernel: transformer_forward.32
= control target key start
LH: loop header
LB: loop body
LE: loop exit
PB: predicated region body
PF: predicated region fallthrough
CT: control target
= control target key end

     0   :  { %vm47_vm0 = vcmask 261120   ;;  %v159_v16 = vmov 32.0   ;;  %s235_s1 = inlined_call_operand.vmem [shape: bf16[32,32], index: 1, kind: input, shape index: {}]   ;;  %s236_s0 = inlined_call_operand.vmem [shape: f32[16,32], index: 0, kind: input, shape index: {}]   ;;  %s237_s2 = inlined_call_operand.vmem [shape: f32[1,32], index: 2, kind: input, shape index: {}]   ;;  %s238_s3 = inlined_call_operand.vmem [shape: f32[16,32], index: 3, kind: input, shape index: {}]   ;;  %s239_s4 = inlined_call_operand.vmem [shape: f32[1,32], index: 4, kind: input, shape index: {}]   ;;  %s240_s5 = inlined_call_operand.vmem [shape: f32[1,32], index: 5, kind: input, shape index: {}]   ;;  %s241_s6 = inlined_call_operand.vmem [shape: f32[16,32], index: 6, kind: output, shape index: {}]  }
   0x1   :  { %v148_v0 = vld [vmem:[%s235_s1 + $0x8] sm:$0xff]  ;;  %v147_v1 = vld [vmem:[%s235_s1] sm:$0xff]  ;;  %153 = vrcp.f32 %v159_v16 }
   0x2   :  { %57 = vmatpush.bf16.msra.mxu0 %v148_v0  ;;  %v24_v2 = vld [vmem:[%s236_s0] sm:$0xff]  ;;  %v25_v3 = vld [vmem:[%s236_s0 + $0x8] sm:$0xff] }
   0x3   :  { %v26_v4 = vpack.c.bf16 %v25_v3, %v24_v2  ;;  %v150_v5 = vld [vmem:[%s237_s2] ss:$0 sm:$0xff]  ;;  %v66_v12 = vld [vmem:[%s238_s3 + $0x8] sm:$0xff] }
   0x4   :  { %v65_v7 = vld [vmem:[%s238_s3] sm:$0xff] }
   0x5   :  { %v151_v47 = vld [vmem:[%s239_s4] ss:$0 sm:$0xff] }
   0x6   :  { %58 = vmatpush.bf16.msra.mxu0 %v147_v1  ;;  %v152_v50 = vld [vmem:[%s240_s5] ss:$0 sm:$0xff] }
   0x7   :  { %v154_v17 = vpop.eup %153 }
   0x8   :  { %v78_v18 = vmul.f32 32.0, %v154_v17  ;;  %vm82_vm1 = vweird.f32 %v154_v17 }
   0x9   :  { %146 = vmatmul.msk.bf16.vlgmr.msra.gmra.mxu0 %vm47_vm0, %v26_v4 }
   0xa   :  { %v79_v19 = vsub.f32 1.0, %v78_v18 }
   0xc   :  { %v80_v20 = vmul.f32 %v154_v17, %v79_v19 }
   0xe   :  { %v81_v21 = vadd.f32 %v154_v17, %v80_v20 }
  0x10   :  { %v83_v22 = vsel %vm82_vm1, %v154_v17, %v81_v21 }
  0x86   :  { %v60_v6 = vpop.f32.mrf.mxu0 }
  0x87   :  { %v61_v8 = vadd.f32 %v150_v5, %v60_v6 }
  0x89   :  { %v67_v9 = vadd.f32 %v65_v7, %v61_v8 }
  0x8b   :  { %v71_v10 = vsel %vm47_vm0, %v67_v9, 0.0 }
  0x8c   :  { %72 = vadd.xlane.f32.xlu0 %v71_v10 }
  0x8e   :  { %v62_v11 = vpop.f32.mrf.mxu0 }
  0x8f   :  { %v63_v13 = vadd.f32 %v150_v5, %v62_v11 }
  0x91   :  { %v68_v14 = vadd.f32 %v66_v12, %v63_v13 }
  0x93   :  { %v74_v15 = vsel %vm47_vm0, %v68_v14, 0.0 }
  0x94   :  { %75 = vadd.xlane.f32.xlu0 %v74_v15 }
  0xff   :  { %v73_v23 = vpop.xlane.xlu0 %72 }
 0x100   :  { %v84_v24 = vmul.f32 %v83_v22, %v73_v23 }
 0x102   :  { %v86_v25 = vsub.f32 %v67_v9, %v84_v24 }
 0x104   :  { %v88_v26 = vmul.f32 %v86_v25, %v86_v25 }
 0x106   :  { %v90_v27 = vsel %vm47_vm0, %v88_v26, 0.0 }
 0x107   :  { %91 = vadd.xlane.f32.xlu1 %v90_v27  ;;  %v76_v28 = vpop.xlane.xlu0 %75 }
 0x108   :  { %v85_v29 = vmul.f32 %v83_v22, %v76_v28 }
 0x10a   :  { %v87_v30 = vsub.f32 %v68_v14, %v85_v29 }
 0x10c   :  { %v89_v31 = vmul.f32 %v87_v30, %v87_v30 }
 0x10e   :  { %v93_v32 = vsel %vm47_vm0, %v89_v31, 0.0 }
 0x10f   :  { %94 = vadd.xlane.f32.xlu1 %v93_v32 }
 0x17a   :  { %v92_v33 = vpop.xlane.xlu1 %91 }
 0x17b   :  { %v96_v34 = vmul.f32 %v92_v33, %v83_v22 }
 0x17d   :  { %v98_v35 = vadd.f32 1e-05, %v96_v34 }
 0x17f   :  { %155 = vrsqrt.f32 %v98_v35  ;;  %vm106_vm3 = vweird.f32 %v98_v35 }
 0x182   :  { %v95_v36 = vpop.xlane.xlu1 %94 }
 0x183   :  { %v97_v37 = vmul.f32 %v95_v36, %v83_v22 }
 0x185   :  { %v156_v38 = vpop.eup %155  ;;  %v99_v39 = vadd.f32 1e-05, %v97_v37 }
 0x186   :  { %v101_v40 = vmul.f32 %v156_v38, %v98_v35  ;;  %vm107_vm2 = vweird.f32 %v156_v38 }
 0x187   :  { %157 = vrsqrt.f32 %v99_v39  ;;  %vm108_vm4 = vmor %vm106_vm3, %vm107_vm2  ;;  %vm116_vm6 = vweird.f32 %v99_v39 }
 0x188   :  { %v102_v41 = vmul.f32 %v156_v38, %v101_v40 }
 0x18a   :  { %v103_v42 = vmul.f32 0.5, %v102_v41 }
 0x18c   :  { %v104_v43 = vsub.f32 1.5, %v103_v42 }
 0x18d   :  { %v158_v44 = vpop.eup %157 }
 0x18e   :  { %v105_v45 = vmul.f32 %v156_v38, %v104_v43  ;;  %v111_v46 = vmul.f32 %v158_v44, %v99_v39  ;;  %vm117_vm5 = vweird.f32 %v158_v44 }
 0x18f   :  { %vm118_vm7 = vmor %vm116_vm6, %vm117_vm5 }
 0x190   :  { %v109_v48 = vsel %vm108_vm4, %v156_v38, %v105_v45  ;;  %v112_v49 = vmul.f32 %v158_v44, %v111_v46 }
 0x191   :  { %v120_v51 = vmul.f32 %v109_v48, %v86_v25 }
 0x192   :  { %v113_v52 = vmul.f32 0.5, %v112_v49 }
 0x193   :  { %v125_v53 = vmul.f32 %v151_v47, %v120_v51 }
 0x194   :  { %v114_v54 = vsub.f32 1.5, %v113_v52 }
 0x195   :  { %v130_v55 = vadd.f32 %v152_v50, %v125_v53 }
 0x196   :  { %v115_v56 = vmul.f32 %v158_v44, %v114_v54 }
 0x197   :  { %132 = vst.msk [vmem:[%s241_s6] sm:$0xff] %vm47_vm0, %v130_v55 }
 0x198   :  { %v119_v57 = vsel %vm118_vm7, %v158_v44, %v115_v56 }
 0x199   :  { %v121_v58 = vmul.f32 %v119_v57, %v87_v30 }
 0x19b   :  { %v126_v59 = vmul.f32 %v151_v47, %v121_v58 }
 0x19d   :  { %v131_v60 = vadd.f32 %v152_v50, %v126_v59 }
 0x19f   :  { %133 = vst.msk [vmem:[%s241_s6 + $0x8] sm:$0xff] %vm47_vm0, %v131_v60 }

// kernel: transformer_forward.30
= control target key start
LH: loop header
LB: loop body
LE: loop exit
PB: predicated region body
PF: predicated region fallthrough
CT: control target
= control target key end

     0   :  { %vm19_vm0 = vcmask 523264   ;;  %v96_v1 = vmov 0.0   ;;  %vm43_vm1 = vcmask 261120   ;;  %s144_s1 = inlined_call_operand.vmem [shape: bf16[32,64], index: 1, kind: input, shape index: {}]   ;;  %s145_s0 = inlined_call_operand.vmem [shape: f32[16,32], index: 0, kind: input, shape index: {}]   ;;  %s146_s2 = inlined_call_operand.vmem [shape: f32[1,64], index: 2, kind: input, shape index: {}]   ;;  %s147_s3 = inlined_call_operand.vmem [shape: f32[16,64], index: 3, kind: output, shape index: {}]  }
   0x1   :  { %v93_v0 = vld [vmem:[%s144_s1 + $0x8] sm:$0xff]  ;;  %20 = vst.msk [vmem:[#allocation2] sm:$0xff] %vm19_vm0, %v96_v1  ;;  %v92_v2 = vld [vmem:[%s144_s1] sm:$0xff] }
   0x2   :  { %21 = vst.msk [vmem:[#allocation2 + $0x8] sm:$0xff] %vm19_vm0, %v96_v1  ;;  %53 = vmatpush.bf16.msra.mxu0 %v93_v0  ;;  %v24_v3 = vld [vmem:[%s145_s0] sm:$0xff]  ;;  %v25_v4 = vld [vmem:[%s145_s0 + $0x8] sm:$0xff] }
   0x3   :  { %v26_v5 = vpack.c.bf16 %v25_v4, %v24_v3  ;;  %v95_v10 = vld [vmem:[%s146_s2] ss:$0 sm:$0xff] }
   0x6   :  { %54 = vmatpush.bf16.msra.mxu0 %v92_v2 }
   0x8   :  { %v22_v6 = vld [vmem:[#allocation2] sm:$0xff] }
   0x9   :  { %91 = vmatmul.msk.bf16.vlgmr.msra.gmra.mxu0 %vm43_vm1, %v26_v5  ;;  %v23_v9 = vld [vmem:[#allocation2 + $0x8] sm:$0xff] }
  0x86   :  { %v56_v7 = vpop.f32.mrf.mxu0 }
  0x87   :  { %v61_v8 = vadd.f32 %v56_v7, %v22_v6 }
  0x89   :  { %64 = vst.msk [vmem:[#allocation2] sm:$0xff] %vm19_vm0, %v61_v8 }
  0x8e   :  { %v58_v11 = vpop.f32.mrf.mxu0 }
  0x8f   :  { %v62_v12 = vadd.f32 %v58_v11, %v23_v9 }
  0x90   :  { %v69_v13 = vld [vmem:[#allocation2] sm:$0xff] }
  0x91   :  { %v75_v14 = vadd.f32 %v95_v10, %v69_v13  ;;  %65 = vst.msk [vmem:[#allocation2 + $0x8] sm:$0xff] %vm19_vm0, %v62_v12 }
  0x93   :  { %77 = vst.msk [vmem:[%s147_s3] sm:$0xff] %vm19_vm0, %v75_v14 }
  0x98   :  { %v70_v15 = vld [vmem:[#allocation2 + $0x8] sm:$0xff] }
  0x99   :  { %v76_v16 = vadd.f32 %v95_v10, %v70_v15 }
  0x9b   :  { %78 = vst.msk [vmem:[%s147_s3 + $0x8] sm:$0xff] %vm19_vm0, %v76_v16 }

// kernel: transformer_forward.31
= control target key start
LH: loop header
LB: loop body
LE: loop exit
PB: predicated region body
PF: predicated region fallthrough
CT: control target
= control target key end

     0   :  { %s627_s12 = smov 0   ;;  %s697_s0 = inlined_call_operand.vmem [shape: f32[2,8,32], index: 0, kind: input, shape index: {}]   ;;  %s698_s1 = inlined_call_operand.vmem [shape: f32[2,8,64], index: 1, kind: input, shape index: {}]   ;;  %s699_s2 = inlined_call_operand.vmem [shape: s32[2,8,8], index: 2, kind: input, shape index: {}]   ;;  %s700_s3 = inlined_call_operand.vmem [shape: f32[2,8,32], index: 3, kind: output, shape index: {}]  }
   0x1 LB: > { %s536_s13 = sadd.s32 4294967295, %s595_s12   ;;  %p540_p0 = scmp.ge.s32.totalorder %s595_s12, 1  ;;  %s595_s12 = sphi %s627_s12, %s13_s12  }
   0x2   : > { %p154_p1 = scmp.lt.s32.totalorder %s595_s12, 3 }
   0x4   : > { %p155_p2 = pnand %p540_p0, %p154_p1 }
   0x5   : > { %p184_p3 = scmp.lt.s32.totalorder (!%p155_p2), %s536_s13, 1  ;;  %s597_s21 = smov (!%p155_p2), 96  }
   0x6   : > { %158 = sbr.rel (%p155_p2) target bundleno = 1076 (0x434), region = 32  ;;  %s598_s22 = smov (!%p155_p2), 112  }
   0x7   : > { %s599_s23 = smov (!%p155_p2), 104   ;;  %s600_s27 = smov (!%p155_p2), 120  }
   0x8   : > { %s601_s28 = smov (!%p155_p2), 88   ;;  %s602_s29 = smov (!%p155_p2), 80  }
   0x9   : > { %s603_s30 = smov (!%p155_p2), 72   ;;  %s604_s4 = smov (!%p155_p2), 8  }
   0xa   : > { %s605_s5 = smov (!%p155_p2), 24   ;;  %s606_s6 = smov (!%p155_p2), 16  }
   0xb   : > { %s702_s13 = smov (!%p184_p3, %s536_s13), 1  ;;  %vm208_vm0 = vcmask 64512   ;;  %vm249_vm2 = vcmask 1043456   ;;  %vm453_vm3 = vcmask 130048   ;;  %vm455_vm4 = vcmask 195584  }
   0xc   : > { %s635_s14 = sshll.u32 %s702_s13, 3  ;;  %vm457_vm5 = vcmask 261120  }
   0xd   : > { %s191_s17 = scalar_lea.vmem %s698_s1, %s635_s14  ;;  %s187_s20 = scalar_lea.vmem %s697_s0, %s635_s14 }
   0xe   : > { %v202_v0 = vld [vmem:[%s191_s17] sm:$0xff]  ;;  %s195_s26 = scalar_lea.vmem %s699_s2, %s635_s14  ;;  %s199_s9 = scalar_lea.vmem %s700_s3, %s635_s14 }
   0xf   : > { %v201_v1 = vld [vmem:[%s187_s20] sm:$0xff]  ;;  %v206_v2 = vpack.c.bf16 %v202_v0, %v202_v0 }
  0x10   : > { %v204_v4 = vmul.f32 0.35355338, %v201_v1  ;;  %v203_v10 = vld [vmem:[%s195_s26] sm:$0xff] }
  0x11   : > { %v213_v3 = vsel %vm208_vm0, %v206_v2, 0  ;;  %v242_v6 = vunpack.c.l.b16 %v206_v2  ;;  %vm207_vm1 = vcmp.eq.s32.totalorder %v203_v10, 0 }
  0x12   : > { %222 = vmatpush.bf16.xpose.msra.mxu0 %v213_v3  ;;  %v205_v5 = vpack.c.bf16 %v204_v4, %v204_v4 }
  0x13   : > { %v647_v7 = vpack.c.b16 %v242_v6, %v242_v6 }
  0x14   : > { %v267_v8 = vunpack.c.l.b16 %v205_v5 }
  0x15   : > { %244 = vrot.lane.b32.xlu2 %v647_v7, %s597_s21 }
  0x16   : > { %v268_v9 = vpack.c.b16 %v267_v8, %v267_v8 }
  0x19   : > { %545 = vmatmul.msk.bf16.vlgmr.msra.gmra.mxu0 %vm208_vm0, %v205_v5 }
  0x1d   : > { %328 = vrot.lane.b32.xlu2 %v647_v7, %s598_s22 }
  0x25   : > { %385 = vrot.lane.b32.xlu2 %v647_v7, %s599_s23 }
  0x2d   : > { %326 = vrot.lane.b32.xlu2 %v268_v9, %s598_s22 }
  0x6f   : > { %v245_v15 = vpop.permute.xlu2 %244 }
  0x70   : > { %v251_v26 = vsel %vm249_vm2, %v245_v15, 0 }
  0x71   : > { %260 = vmatpush.bf16.msra.mxu1 %v251_v26 }
  0x77   : > { %v329_v16 = vpop.permute.xlu2 %328 }
  0x78   : > { %v334_v27 = vsel %vm208_vm0, %v329_v16, 0 }
  0x79   : > { %343 = vmatpush.bf16.xpose.msrb.mxu1 %v334_v27 }
  0x7f   : > { %v386_v20 = vpop.permute.xlu2 %385 }
  0x80   : > { %v391_v21 = vsel %vm208_vm0, %v386_v20, 0 }
  0x81   : > { %400 = vmatpush.bf16.xpose.msrb.mxu0 %v391_v21 }
  0x87   : > { %v327_v34 = vpop.permute.xlu2 %326 }
  0x96   : > { %v224_v11 = vpop.f32.mrf.mxu0 }
  0x97   : > { %v228_v12 = vsel %vm207_vm1, -1e+09, %v224_v11 }
  0x98   : > { %v229_v13 = vsel %vm208_vm0, %v228_v12, -inf }
  0x99   : > { %230 = vmax.xlane.f32.xlu0 %v229_v13 }
  0x9e   : > { %v226_v14 = vpop.f32.mrf.mxu0 }
  0xad   : > { %271 = vrot.lane.b32.xlu0 %v647_v7, %s600_s27 }
  0xb5   : > { %383 = vrot.lane.b32.xlu0 %v268_v9, %s599_s23 }
 0x10c   : > { %v231_v17 = vpop.xlane.xlu0 %230 }
 0x10d   : > { %v232_v18 = vsub.f32 %v228_v12, %v231_v17 }
 0x10f   : > { %v233_v19 = vmul.f32 1.442695, %v232_v18 }
 0x111   : > { %573 = vpow2.f32 %v233_v19 }
 0x117   : > { %v574_v22 = vpop.eup %573 }
 0x118   : > { %v235_v23 = vsel %vm208_vm0, %v574_v22, 0.0 }
 0x119   : > { %236 = vadd.xlane.f32.xlu1 %v235_v23 }
 0x11f   : > { %v272_v24 = vpop.permute.xlu0 %271 }
 0x120   : > { %v277_v28 = vsel %vm208_vm0, %v272_v24, 0 }
 0x121   : > { %286 = vmatpush.bf16.xpose.msra.mxu2 %v277_v28 }
 0x127   : > { %v384_v25 = vpop.permute.xlu0 %383 }
 0x128   : > { %551 = vmatmul.msk.bf16.vlgmr.msrb.gmra.mxu0 %vm208_vm0, %v384_v25 }
 0x132   : > { %269 = vrot.lane.b32.xlu1 %v268_v9, %s600_s27 }
 0x18c   : > { %v237_v29 = vpop.xlane.xlu1 %236 }
 0x18d   : > { %575 = vrcp.f32 %v237_v29 }
 0x193   : > { %v576_v30 = vpop.eup %575 }
 0x194   : > { %v239_v31 = vmul.f32 %v576_v30, %v574_v22 }
 0x196   : > { %v240_v32 = vpack.c.bf16 %v239_v31, %v239_v31 }
 0x198   : > { %546 = vmatmul.msk.bf16.vlgmr.msra.gmra.mxu1 %vm208_vm0, %v240_v32 }
 0x1a4   : > { %v270_v33 = vpop.permute.xlu1 %269 }
 0x1a5   : > { %547 = vmatmul.msk.bf16.vlgmr.msra.gmra.mxu2 %vm208_vm0, %v270_v33  ;;  %v402_v35 = vpop.f32.mrf.mxu0 }
 0x1a6   : > { %v406_v36 = vsel %vm207_vm1, -1e+09, %v402_v35 }
 0x1a7   : > { %v407_v37 = vsel %vm208_vm0, %v406_v36, -inf }
 0x1a8   : > { %549 = vmatmul.msk.bf16.vlgmr.msrb.gmra.mxu1 %vm208_vm0, %v327_v34  ;;  %408 = vmax.xlane.f32.xlu0 %v407_v37 }
 0x1ad   : > { %v404_v38 = vpop.f32.mrf.mxu0 }
 0x215   : > { %v670_v39 = vpop.f32.mrf.mxu1 }
 0x21b   : > { %v409_v51 = vpop.xlane.xlu0 %408 }
 0x21c   : > { %v410_v55 = vsub.f32 %v406_v36, %v409_v51 }
 0x21d   : > { %v264_v40 = vpop.f32.mrf.mxu1 }
 0x21e   : > { %v411_v57 = vmul.f32 1.442695, %v410_v55 }
 0x225   : > { %v345_v41 = vpop.f32.mrf.mxu1 }
 0x226   : > { %v349_v42 = vsel %vm207_vm1, -1e+09, %v345_v41 }
 0x227   : > { %v350_v43 = vsel %vm208_vm0, %v349_v42, -inf }
 0x228   : > { %351 = vmax.xlane.f32.xlu1 %v350_v43  ;;  %v288_v44 = vpop.f32.mrf.mxu2 }
 0x229   : > { %v292_v45 = vsel %vm207_vm1, -1e+09, %v288_v44 }
 0x22a   : > { %v293_v46 = vsel %vm208_vm0, %v292_v45, -inf }
 0x22b   : > { %294 = vmax.xlane.f32.xlu2 %v293_v46 }
 0x22d   : > { %v347_v47 = vpop.f32.mrf.mxu1 }
 0x230   : > { %v290_v48 = vpop.f32.mrf.mxu2 }
 0x241   : > { %305 = vrot.lane.b32.xlu1 %v647_v7, %s601_s28 }
 0x29b   : > { %v352_v49 = vpop.xlane.xlu1 %351 }
 0x29c   : > { %v353_v50 = vsub.f32 %v349_v42, %v352_v49 }
 0x29e   : > { %v354_v52 = vmul.f32 1.442695, %v353_v50  ;;  %v295_v53 = vpop.xlane.xlu2 %294 }
 0x29f   : > { %v296_v54 = vsub.f32 %v292_v45, %v295_v53 }
 0x2a0   : > { %577 = vpow2.f32 %v354_v52 }
 0x2a1   : > { %v297_v56 = vmul.f32 1.442695, %v296_v54 }
 0x2a3   : > { %579 = vpow2.f32 %v297_v56 }
 0x2a4   : > { %581 = vpow2.f32 %v411_v57 }
 0x2a6   : > { %v578_v58 = vpop.eup %577 }
 0x2a7   : > { %v356_v59 = vsel %vm208_vm0, %v578_v58, 0.0 }
 0x2a8   : > { %357 = vadd.xlane.f32.xlu0 %v356_v59 }
 0x2a9   : > { %v580_v60 = vpop.eup %579 }
 0x2aa   : > { %v299_v61 = vsel %vm208_vm0, %v580_v60, 0.0  ;;  %v582_v62 = vpop.eup %581 }
 0x2ab   : > { %300 = vadd.xlane.f32.xlu2 %v299_v61  ;;  %v413_v63 = vsel %vm208_vm0, %v582_v62, 0.0 }
 0x2b3   : > { %414 = vadd.xlane.f32.xlu2 %v413_v63  ;;  %v306_v0 = vpop.permute.xlu1 %305 }
 0x2b4   : > { %v311_v1 = vsel %vm249_vm2, %v306_v0, 0 }
 0x2b5   : > { %320 = vmatpush.bf16.msra.mxu3 %v311_v1 }
 0x2bc   : > { %362 = vrot.lane.b32.xlu0 %v647_v7, %s602_s29 }
 0x2cb   : > { %419 = vrot.lane.b32.xlu2 %v647_v7, %s603_s30 }
 0x31b   : > { %v358_v4 = vpop.xlane.xlu0 %357 }
 0x31e   : > { %v301_v2 = vpop.xlane.xlu2 %300 }
 0x31f   : > { %583 = vrcp.f32 %v301_v2 }
 0x325   : > { %v584_v3 = vpop.eup %583 }
 0x326   : > { %v415_v5 = vpop.xlane.xlu2 %414  ;;  %v303_v6 = vmul.f32 %v584_v3, %v580_v60 }
 0x327   : > { %585 = vrcp.f32 %v415_v5 }
 0x328   : > { %v304_v8 = vpack.c.bf16 %v303_v6, %v303_v6  ;;  %587 = vrcp.f32 %v358_v4 }
 0x32a   : > { %548 = vmatmul.msk.bf16.vlgmr.msra.gmra.mxu3 %vm208_vm0, %v304_v8 }
 0x32d   : > { %v586_v9 = vpop.eup %585 }
 0x32e   : > { %v417_v10 = vmul.f32 %v586_v9, %v582_v62  ;;  %v420_v11 = vpop.permute.xlu2 %419  ;;  %v363_v12 = vpop.permute.xlu0 %362 }
 0x32f   : > { %v368_v7 = vsel %vm249_vm2, %v363_v12, 0  ;;  %v425_v13 = vsel %vm249_vm2, %v420_v11, 0  ;;  %v588_v15 = vpop.eup %587 }
 0x330   : > { %377 = vmatpush.bf16.msrb.mxu3 %v368_v7  ;;  %434 = vmatpush.bf16.msrb.mxu2 %v425_v13  ;;  %v418_v14 = vpack.c.bf16 %v417_v10, %v417_v10  ;;  %v360_v16 = vmul.f32 %v588_v15, %v578_v58 }
 0x332   : > { %v361_v17 = vpack.c.bf16 %v360_v16, %v360_v16 }
 0x333   : > { %552 = vmatmul.msk.bf16.vlgmr.msrb.gmra.mxu2 %vm208_vm0, %v418_v14 }
 0x33a   : > { %550 = vmatmul.msk.bf16.vlgmr.msrb.gmra.mxu3 %vm208_vm0, %v361_v17 }
 0x3ad   : > { %v322_v18 = vpop.f32.mrf.mxu3 }
 0x3ae   : > { %441 = vrot.lane.b32.xlu1 %v322_v18, %s604_s4 }
 0x3b5   : > { %v324_v19 = vpop.f32.mrf.mxu3 }
 0x3b6   : > { %v436_v20 = vpop.f32.mrf.mxu2 }
 0x3b7   : > { %449 = vrot.lane.b32.xlu1 %v436_v20, %s605_s5 }
 0x3bd   : > { %v379_v21 = vpop.f32.mrf.mxu3 }
 0x3be   : > { %v438_v22 = vpop.f32.mrf.mxu2  ;;  %445 = vrot.lane.b32.xlu0 %v379_v21, %s606_s6 }
 0x3c5   : > { %v381_v23 = vpop.f32.mrf.mxu3 }
 0x420   : > { %v442_v24 = vpop.permute.xlu1 %441 }
 0x421   : > { %v452_v25 = vsel %vm208_vm0, %v670_v39, %v442_v24 }
 0x429   : > { %v450_v27 = vpop.permute.xlu1 %449 }
 0x430   : > { %v446_v26 = vpop.permute.xlu0 %445 }
 0x431   : > { %v454_v28 = vsel %vm453_vm3, %v452_v25, %v446_v26 }
 0x432   : > { %v456_v29 = vsel %vm455_vm4, %v454_v28, %v450_v27 }
 0x433   : > { %458 = vst.msk [vmem:[%s199_s9] sm:$0xff] %vm457_vm5, %v456_v29 }
 0x434 PF: > { %s13_s12 = sadd.s32 1, %s595_s12  }
 0x435   : > { %p10_p4 = scmp.ge.s32.totalorder %s13_s12, 4  }
 0x437   :  { %12 = sbr.rel (!%p10_p4) target bundleno = 1 (0x1), region = 68 }

// kernel: transformer_forward.43
= control target key start
LH: loop header
LB: loop body
LE: loop exit
PB: predicated region body
PF: predicated region fallthrough
CT: control target
= control target key end

     0   :  { %8 = vsyncpa [#allocation4], 0  ;;  %s137_s15 = smov [#allocation3]   ;;  %s187_s0 = inlined_call_operand.vmem [shape: f32[16,32], index: 0, kind: input, shape index: {}]   ;;  %s188_s1 = inlined_call_operand.vmem [shape: bf16[32,32], index: 1, kind: input, shape index: {}]   ;;  %s189_s2 = inlined_call_operand.hbm [shape: f32[1,32], index: 2, kind: input, shape index: {}]   ;;  %s190_s3 = inlined_call_operand.vmem [shape: f32[16,32], index: 3, kind: output, shape index: {}]  }
   0x1   :  { %s18_s14 = sshll.u32 %s189_s2, 4  ;;  %s20_s16 = sshll.u32 %s137_s15, 4  ;;  %s19_s14 = int_to_ptr.hbm [resolvable:$true] %s18_s14  ;;  %s21_s16 = int_to_ptr.vmem [resolvable:$true] %s20_s16 }
   0x2   :  { %23 = dma.hbm_to_vmem [thread:$0]  %s19_s14, 16, %s21_s16, [#allocation4]  }
   0x3   :  { %135 = dma.done.wait [#allocation4], 16  }
   0x4   :  { %136 = vsyncadd [#allocation4], 4294967280  ;;  %vm33_vm0 = vcmask 261120   ;;  %v138_v0 = vmov 0.0   ;;  %v107_v1 = vld [vmem:[%s188_s1 + $0x8] sm:$0xff]  ;;  %v106_v2 = vld [vmem:[%s188_s1] sm:$0xff] }
   0x5   :  { %34 = vst.msk [vmem:[#allocation2] sm:$0xff] %vm33_vm0, %v138_v0  ;;  %67 = vmatpush.bf16.msra.mxu0 %v107_v1  ;;  %v38_v3 = vld [vmem:[%s187_s0] sm:$0xff]  ;;  %v39_v4 = vld [vmem:[%s187_s0 + $0x8] sm:$0xff]  ;;  %v110_v10 = vld [vmem:[#allocation3] ss:$0 sm:$0xff] }
   0x6   :  { %35 = vst.msk [vmem:[#allocation2 + $0x8] sm:$0xff] %vm33_vm0, %v138_v0  ;;  %v40_v5 = vpack.c.bf16 %v39_v4, %v38_v3 }
   0x9   :  { %68 = vmatpush.bf16.msra.mxu0 %v106_v2 }
   0xc   :  { %105 = vmatmul.msk.bf16.vlgmr.msra.gmra.mxu0 %vm33_vm0, %v40_v5  ;;  %v36_v6 = vld [vmem:[#allocation2] sm:$0xff] }
   0xd   :  { %v37_v9 = vld [vmem:[#allocation2 + $0x8] sm:$0xff] }
  0x89   :  { %v70_v7 = vpop.f32.mrf.mxu0 }
  0x8a   :  { %v75_v8 = vadd.f32 %v70_v7, %v36_v6 }
  0x8c   :  { %77 = vst.msk [vmem:[#allocation2] sm:$0xff] %vm33_vm0, %v75_v8 }
  0x91   :  { %v72_v11 = vpop.f32.mrf.mxu0 }
  0x92   :  { %v76_v12 = vadd.f32 %v72_v11, %v37_v9 }
  0x93   :  { %v82_v13 = vld [vmem:[#allocation2] sm:$0xff] }
  0x94   :  { %v88_v14 = vadd.f32 %v110_v10, %v82_v13  ;;  %78 = vst.msk [vmem:[#allocation2 + $0x8] sm:$0xff] %vm33_vm0, %v76_v12 }
  0x96   :  { %90 = vst.msk [vmem:[%s190_s3] sm:$0xff] %vm33_vm0, %v88_v14 }
  0x9b   :  { %v83_v15 = vld [vmem:[#allocation2 + $0x8] sm:$0xff] }
  0x9c   :  { %v89_v16 = vadd.f32 %v110_v10, %v83_v15 }
  0x9e   :  { %91 = vst.msk [vmem:[%s190_s3 + $0x8] sm:$0xff] %vm33_vm0, %v89_v16 }
  0x9f   :  { %96 = vsyncpa [#allocation4], 1 }

// kernel: transformer_forward.44
= control target key start
LH: loop header
LB: loop body
LE: loop exit
PB: predicated region body
PF: predicated region fallthrough
CT: control target
= control target key end

     0   :  { %8 = vsyncpa [#allocation4], 0  ;;  %s138_s15 = smov [#allocation3]   ;;  %s187_s0 = inlined_call_operand.vmem [shape: f32[16,32], index: 0, kind: input, shape index: {}]   ;;  %s188_s1 = inlined_call_operand.vmem [shape: bf16[32,64], index: 1, kind: input, shape index: {}]   ;;  %s189_s2 = inlined_call_operand.hbm [shape: f32[1,64], index: 2, kind: input, shape index: {}]   ;;  %s190_s3 = inlined_call_operand.vmem [shape: f32[16,64], index: 3, kind: output, shape index: {}]  }
   0x1   :  { %s18_s14 = sshll.u32 %s189_s2, 4  ;;  %s20_s16 = sshll.u32 %s138_s15, 4  ;;  %s19_s14 = int_to_ptr.hbm [resolvable:$true] %s18_s14  ;;  %s21_s16 = int_to_ptr.vmem [resolvable:$true] %s20_s16 }
   0x2   :  { %23 = dma.hbm_to_vmem [thread:$0]  %s19_s14, 16, %s21_s16, [#allocation4]  }
   0x3   :  { %136 = dma.done.wait [#allocation4], 16  }
   0x4   :  { %137 = vsyncadd [#allocation4], 4294967280  ;;  %vm33_vm0 = vcmask 523264   ;;  %v139_v0 = vmov 0.0   ;;  %v108_v1 = vld [vmem:[%s188_s1 + $0x8] sm:$0xff]  ;;  %v107_v2 = vld [vmem:[%s188_s1] sm:$0xff] }
   0x5   :  { %34 = vst.msk [vmem:[#allocation2] sm:$0xff] %vm33_vm0, %v139_v0  ;;  %67 = vmatpush.bf16.msra.mxu0 %v108_v1  ;;  %v38_v3 = vld [vmem:[%s187_s0] sm:$0xff]  ;;  %v39_v4 = vld [vmem:[%s187_s0 + $0x8] sm:$0xff]  ;;  %vm57_vm1 = vcmask 261120   ;;  %v111_v10 = vld [vmem:[#allocation3] ss:$0 sm:$0xff] }
   0x6   :  { %35 = vst.msk [vmem:[#allocation2 + $0x8] sm:$0xff] %vm33_vm0, %v139_v0  ;;  %v40_v5 = vpack.c.bf16 %v39_v4, %v38_v3 }
   0x9   :  { %68 = vmatpush.bf16.msra.mxu0 %v107_v2 }
   0xc   :  { %106 = vmatmul.msk.bf16.vlgmr.msra.gmra.mxu0 %vm57_vm1, %v40_v5  ;;  %v36_v6 = vld [vmem:[#allocation2] sm:$0xff] }
   0xd   :  { %v37_v9 = vld [vmem:[#allocation2 + $0x8] sm:$0xff] }
  0x89   :  { %v70_v7 = vpop.f32.mrf.mxu0 }
  0x8a   :  { %v75_v8 = vadd.f32 %v70_v7, %v36_v6 }
  0x8c   :  { %78 = vst.msk [vmem:[#allocation2] sm:$0xff] %vm33_vm0, %v75_v8 }
  0x91   :  { %v72_v11 = vpop.f32.mrf.mxu0 }
  0x92   :  { %v76_v12 = vadd.f32 %v72_v11, %v37_v9 }
  0x93   :  { %v83_v13 = vld [vmem:[#allocation2] sm:$0xff] }
  0x94   :  { %v89_v14 = vadd.f32 %v111_v10, %v83_v13  ;;  %79 = vst.msk [vmem:[#allocation2 + $0x8] sm:$0xff] %vm33_vm0, %v76_v12 }
  0x96   :  { %91 = vst.msk [vmem:[%s190_s3] sm:$0xff] %vm33_vm0, %v89_v14 }
  0x9b   :  { %v84_v15 = vld [vmem:[#allocation2 + $0x8] sm:$0xff] }
  0x9c   :  { %v90_v16 = vadd.f32 %v111_v10, %v84_v15 }
  0x9e   :  { %92 = vst.msk [vmem:[%s190_s3 + $0x8] sm:$0xff] %vm33_vm0, %v90_v16 }
  0x9f   :  { %97 = vsyncpa [#allocation4], 1 }

// kernel: transformer_forward.33
= control target key start
LH: loop header
LB: loop body
LE: loop exit
PB: predicated region body
PF: predicated region fallthrough
CT: control target
= control target key end

     0   :  { %vm50_vm0 = vcmask 261120   ;;  %vm107_vm1 = vcmask 523264   ;;  %v239_v26 = vmov 32.0   ;;  %s329_s1 = inlined_call_operand.vmem [shape: bf16[32,64], index: 1, kind: input, shape index: {}]   ;;  %s330_s0 = inlined_call_operand.vmem [shape: f32[16,32], index: 0, kind: input, shape index: {}]   ;;  %s331_s2 = inlined_call_operand.vmem [shape: f32[1,64], index: 2, kind: input, shape index: {}]   ;;  %s332_s4 = inlined_call_operand.vmem [shape: f32[1,32], index: 4, kind: input, shape index: {}]   ;;  %s333_s3 = inlined_call_operand.vmem [shape: bf16[64,32], index: 3, kind: input, shape index: {}]   ;;  %s334_s5 = inlined_call_operand.vmem [shape: f32[1,32], index: 5, kind: input, shape index: {}]   ;;  %s335_s6 = inlined_call_operand.vmem [shape: f32[1,32], index: 6, kind: input, shape index: {}]   ;;  %s336_s7 = inlined_call_operand.vmem [shape: f32[16,32], index: 7, kind: output, shape index: {}]  }
   0x1   :  { %v223_v0 = vld [vmem:[%s329_s1 + $0x8] sm:$0xff]  ;;  %v222_v1 = vld [vmem:[%s329_s1] sm:$0xff]  ;;  %v227_v5 = vld [vmem:[%s333_s3 + $0x18] sm:$0xff]  ;;  %233 = vrcp.f32 %v239_v26 }
   0x2   :  { %60 = vmatpush.bf16.msra.mxu0 %v223_v0  ;;  %v27_v2 = vld [vmem:[%s330_s0] sm:$0xff]  ;;  %v28_v3 = vld [vmem:[%s330_s0 + $0x8] sm:$0xff]  ;;  %115 = vmatpush.bf16.msra.mxu1 %v227_v5  ;;  %v226_v6 = vld [vmem:[%s333_s3 + $0x10] sm:$0xff] }
   0x3   :  { %v29_v4 = vpack.c.bf16 %v28_v3, %v27_v2  ;;  %v225_v7 = vld [vmem:[%s333_s3 + $0x8] sm:$0xff]  ;;  %v224_v8 = vld [vmem:[%s333_s3] sm:$0xff] }
   0x4   :  { %v229_v10 = vld [vmem:[%s331_s2] ss:$0 sm:$0xff] }
   0x5   :  { %v230_v17 = vld [vmem:[%s332_s4] ss:$0 sm:$0xff] }
   0x6   :  { %61 = vmatpush.bf16.msra.mxu0 %v222_v1  ;;  %116 = vmatpush.bf16.msra.mxu1 %v226_v6  ;;  %v231_v57 = vld [vmem:[%s334_s5] ss:$0 sm:$0xff] }
   0x7   :  { %v234_v27 = vpop.eup %233  ;;  %v232_v60 = vld [vmem:[%s335_s6] ss:$0 sm:$0xff] }
   0x8   :  { %v136_v28 = vmul.f32 32.0, %v234_v27  ;;  %vm140_vm2 = vweird.f32 %v234_v27 }
   0x9   :  { %204 = vmatmul.msk.bf16.vlgmr.msra.gmra.mxu0 %vm50_vm0, %v29_v4 }
   0xa   :  { %117 = vmatpush.bf16.msra.mxu1 %v225_v7  ;;  %v137_v29 = vsub.f32 1.0, %v136_v28 }
   0xc   :  { %v138_v30 = vmul.f32 %v234_v27, %v137_v29 }
   0xe   :  { %118 = vmatpush.bf16.msra.mxu1 %v224_v8  ;;  %v139_v31 = vadd.f32 %v234_v27, %v138_v30 }
  0x10   :  { %v141_v32 = vsel %vm140_vm2, %v234_v27, %v139_v31 }
  0x86   :  { %v63_v9 = vpop.f32.mrf.mxu0 }
  0x87   :  { %v64_v11 = vadd.f32 %v229_v10, %v63_v9 }
  0x89   :  { %v68_v14 = vmax.f32 %v64_v11, 0.0 }
  0x8e   :  { %v65_v12 = vpop.f32.mrf.mxu0 }
  0x8f   :  { %v66_v13 = vadd.f32 %v229_v10, %v65_v12 }
  0x91   :  { %v69_v15 = vmax.f32 %v66_v13, 0.0 }
  0x93   :  { %v70_v16 = vpack.c.bf16 %v69_v15, %v68_v14 }
  0x95   :  { %221 = vmatmul.msk.bf16.vlgmr.msra.gmra.mxu1 %vm107_vm1, %v70_v16 }
 0x112   :  { %v120_v18 = vpop.f32.mrf.mxu1 }
 0x113   :  { %v121_v19 = vadd.f32 %v230_v17, %v120_v18 }
 0x115   :  { %v125_v20 = vadd.f32 %v121_v19, %v27_v2 }
 0x117   :  { %v129_v21 = vsel %vm50_vm0, %v125_v20, 0.0 }
 0x118   :  { %130 = vadd.xlane.f32.xlu0 %v129_v21 }
 0x11a   :  { %v122_v22 = vpop.f32.mrf.mxu1 }
 0x11b   :  { %v123_v23 = vadd.f32 %v230_v17, %v122_v22 }
 0x11d   :  { %v126_v24 = vadd.f32 %v123_v23, %v28_v3 }
 0x11f   :  { %v132_v25 = vsel %vm50_vm0, %v126_v24, 0.0 }
 0x120   :  { %133 = vadd.xlane.f32.xlu0 %v132_v25 }
 0x18b   :  { %v131_v33 = vpop.xlane.xlu0 %130 }
 0x18c   :  { %v142_v34 = vmul.f32 %v141_v32, %v131_v33 }
 0x18e   :  { %v144_v35 = vsub.f32 %v125_v20, %v142_v34 }
 0x190   :  { %v146_v36 = vmul.f32 %v144_v35, %v144_v35 }
 0x192   :  { %v148_v37 = vsel %vm50_vm0, %v146_v36, 0.0 }
 0x193   :  { %149 = vadd.xlane.f32.xlu1 %v148_v37  ;;  %v134_v38 = vpop.xlane.xlu0 %133 }
 0x194   :  { %v143_v39 = vmul.f32 %v141_v32, %v134_v38 }
 0x196   :  { %v145_v40 = vsub.f32 %v126_v24, %v143_v39 }
 0x198   :  { %v147_v41 = vmul.f32 %v145_v40, %v145_v40 }
 0x19a   :  { %v151_v42 = vsel %vm50_vm0, %v147_v41, 0.0 }
 0x19b   :  { %152 = vadd.xlane.f32.xlu1 %v151_v42 }
 0x206   :  { %v150_v43 = vpop.xlane.xlu1 %149 }
 0x207   :  { %v154_v44 = vmul.f32 %v150_v43, %v141_v32 }
 0x209   :  { %v156_v45 = vadd.f32 1e-05, %v154_v44 }
 0x20b   :  { %235 = vrsqrt.f32 %v156_v45  ;;  %vm164_vm4 = vweird.f32 %v156_v45 }
 0x20e   :  { %v153_v46 = vpop.xlane.xlu1 %152 }
 0x20f   :  { %v155_v47 = vmul.f32 %v153_v46, %v141_v32 }
 0x211   :  { %v236_v48 = vpop.eup %235  ;;  %v157_v49 = vadd.f32 1e-05, %v155_v47 }
 0x212   :  { %v159_v50 = vmul.f32 %v236_v48, %v156_v45  ;;  %vm165_vm3 = vweird.f32 %v236_v48 }
 0x213   :  { %237 = vrsqrt.f32 %v157_v49  ;;  %vm166_vm5 = vmor %vm164_vm4, %vm165_vm3  ;;  %vm174_vm7 = vweird.f32 %v157_v49 }
 0x214   :  { %v160_v51 = vmul.f32 %v236_v48, %v159_v50 }
 0x216   :  { %v161_v52 = vmul.f32 0.5, %v160_v51 }
 0x218   :  { %v162_v53 = vsub.f32 1.5, %v161_v52 }
 0x219   :  { %v238_v54 = vpop.eup %237 }
 0x21a   :  { %v163_v55 = vmul.f32 %v236_v48, %v162_v53  ;;  %v169_v56 = vmul.f32 %v238_v54, %v157_v49  ;;  %vm175_vm6 = vweird.f32 %v238_v54 }
 0x21b   :  { %vm176_vm8 = vmor %vm174_vm7, %vm175_vm6 }
 0x21c   :  { %v167_v58 = vsel %vm166_vm5, %v236_v48, %v163_v55  ;;  %v170_v59 = vmul.f32 %v238_v54, %v169_v56 }
 0x21d   :  { %v178_v61 = vmul.f32 %v167_v58, %v144_v35 }
 0x21e   :  { %v171_v62 = vmul.f32 0.5, %v170_v59 }
 0x21f   :  { %v183_v63 = vmul.f32 %v231_v57, %v178_v61 }
 0x220   :  { %v172_v0 = vsub.f32 1.5, %v171_v62 }
 0x221   :  { %v188_v1 = vadd.f32 %v232_v60, %v183_v63 }
 0x222   :  { %v173_v2 = vmul.f32 %v238_v54, %v172_v0 }
 0x223   :  { %190 = vst.msk [vmem:[%s336_s7] sm:$0xff] %vm50_vm0, %v188_v1 }
 0x224   :  { %v177_v3 = vsel %vm176_vm8, %v238_v54, %v173_v2 }
 0x225   :  { %v179_v4 = vmul.f32 %v177_v3, %v145_v40 }
 0x227   :  { %v184_v5 = vmul.f32 %v231_v57, %v179_v4 }
 0x229   :  { %v189_v6 = vadd.f32 %v232_v60, %v184_v5 }
 0x22b   :  { %191 = vst.msk [vmem:[%s336_s7 + $0x8] sm:$0xff] %vm50_vm0, %v189_v6 }

// kernel: transformer_forward.46
= control target key start
LH: loop header
LB: loop body
LE: loop exit
PB: predicated region body
PF: predicated region fallthrough
CT: control target
= control target key end

     0   :  { %11 = vsyncpa [#allocation3], 0  ;;  %s360_s0 = inlined_call_operand.vmem [shape: f32[16,32], index: 0, kind: input, shape index: {}]   ;;  %s361_s1 = inlined_call_operand.vmem [shape: bf16[32,32], index: 1, kind: input, shape index: {}]   ;;  %s362_s2 = inlined_call_operand.hbm [shape: f32[1,32], index: 2, kind: input, shape index: {}]   ;;  %s363_s3 = inlined_call_operand.vmem [shape: f32[16,32], index: 3, kind: input, shape index: {}]   ;;  %s364_s4 = inlined_call_operand.hbm [shape: f32[1,32], index: 4, kind: input, shape index: {}]   ;;  %s365_s5 = inlined_call_operand.hbm [shape: f32[1,32], index: 5, kind: input, shape index: {}]   ;;  %s366_s6 = inlined_call_operand.vmem [shape: f32[16,32], index: 6, kind: output, shape index: {}]  }
   0x1   :  { %12 = vsyncpa [#allocation5], 0  ;;  %s35_s23 = sshll.u32 %s364_s4, 4  ;;  %s281_s24 = smov [#allocation4]   ;;  %s36_s23 = int_to_ptr.hbm [resolvable:$true] %s35_s23 }
   0x2   :  { %s37_s25 = sshll.u32 %s281_s24, 4  ;;  %s22_s28 = sshll.u32 %s362_s2, 4  ;;  %s38_s25 = int_to_ptr.vmem [resolvable:$true] %s37_s25  ;;  %s23_s28 = int_to_ptr.hbm [resolvable:$true] %s22_s28 }
   0x3   :  { %40 = dma.hbm_to_vmem [thread:$0]  %s36_s23, 16, %s38_s25, [#allocation5]  }
   0x4   :  { %s282_s29 = smov [#allocation2]   ;;  %s46_s9 = sshll.u32 %s365_s5, 4  ;;  %s47_s9 = int_to_ptr.hbm [resolvable:$true] %s46_s9 }
   0x5   :  { %s24_s30 = sshll.u32 %s282_s29, 4  ;;  %s283_s4 = smov [#allocation6]   ;;  %s25_s30 = int_to_ptr.vmem [resolvable:$true] %s24_s30 }
   0x6   :  { %27 = dma.hbm_to_vmem [thread:$0]  %s23_s28, 16, %s25_s30, [#allocation3]  }
   0x7   :  { %s48_s10 = sshll.u32 %s283_s4, 4  ;;  %s49_s10 = int_to_ptr.vmem [resolvable:$true] %s48_s10 }
   0x8   :  { %51 = dma.hbm_to_vmem [thread:$0]  %s47_s9, 16, %s49_s10, [#allocation5]  }
   0x9   :  { %277 = dma.done.wait [#allocation3], 16  }
   0xa   :  { %278 = vsyncadd [#allocation3], 4294967280 }
   0xb   :  { %279 = dma.done.wait [#allocation5], 32  }
   0xc   :  { %280 = vsyncadd [#allocation5], 4294967264  ;;  %v191_v0 = vld [vmem:[%s361_s1 + $0x8] sm:$0xff]  ;;  %v190_v1 = vld [vmem:[%s361_s1] sm:$0xff]  ;;  %vm88_vm0 = vcmask 261120   ;;  %v284_v16 = vmov 32.0  }
   0xd   :  { %v65_v2 = vld [vmem:[%s360_s0] sm:$0xff]  ;;  %98 = vmatpush.bf16.msra.mxu0 %v191_v0  ;;  %v66_v3 = vld [vmem:[%s360_s0 + $0x8] sm:$0xff]  ;;  %199 = vrcp.f32 %v284_v16 }
   0xe   :  { %v67_v4 = vpack.c.bf16 %v66_v3, %v65_v2  ;;  %v196_v5 = vld [vmem:[#allocation2] ss:$0 sm:$0xff]  ;;  %v107_v12 = vld [vmem:[%s363_s3 + $0x8] sm:$0xff]  ;;  %v197_v47 = vld [vmem:[#allocation4] ss:$0 sm:$0xff] }
   0xf   :  { %v106_v7 = vld [vmem:[%s363_s3] sm:$0xff] }
  0x10   :  { %v198_v50 = vld [vmem:[#allocation6] ss:$0 sm:$0xff] }
  0x11   :  { %99 = vmatpush.bf16.msra.mxu0 %v190_v1 }
  0x13   :  { %v200_v17 = vpop.eup %199 }
  0x14   :  { %189 = vmatmul.msk.bf16.vlgmr.msra.gmra.mxu0 %vm88_vm0, %v67_v4  ;;  %v119_v18 = vmul.f32 32.0, %v200_v17  ;;  %vm123_vm1 = vweird.f32 %v200_v17 }
  0x16   :  { %v120_v19 = vsub.f32 1.0, %v119_v18 }
  0x18   :  { %v121_v20 = vmul.f32 %v200_v17, %v120_v19 }
  0x1a   :  { %v122_v21 = vadd.f32 %v200_v17, %v121_v20 }
  0x1c   :  { %v124_v22 = vsel %vm123_vm1, %v200_v17, %v122_v21 }
  0x91   :  { %v101_v6 = vpop.f32.mrf.mxu0 }
  0x92   :  { %v102_v8 = vadd.f32 %v196_v5, %v101_v6 }
  0x94   :  { %v108_v9 = vadd.f32 %v106_v7, %v102_v8 }
  0x96   :  { %v112_v10 = vsel %vm88_vm0, %v108_v9, 0.0 }
  0x97   :  { %113 = vadd.xlane.f32.xlu0 %v112_v10 }
  0x99   :  { %v103_v11 = vpop.f32.mrf.mxu0 }
  0x9a   :  { %v104_v13 = vadd.f32 %v196_v5, %v103_v11 }
  0x9c   :  { %v109_v14 = vadd.f32 %v107_v12, %v104_v13 }
  0x9e   :  { %v115_v15 = vsel %vm88_vm0, %v109_v14, 0.0 }
  0x9f   :  { %116 = vadd.xlane.f32.xlu0 %v115_v15 }
 0x10a   :  { %v114_v23 = vpop.xlane.xlu0 %113 }
 0x10b   :  { %v125_v24 = vmul.f32 %v124_v22, %v114_v23 }
 0x10d   :  { %v127_v25 = vsub.f32 %v108_v9, %v125_v24 }
 0x10f   :  { %v129_v26 = vmul.f32 %v127_v25, %v127_v25 }
 0x111   :  { %v131_v27 = vsel %vm88_vm0, %v129_v26, 0.0 }
 0x112   :  { %132 = vadd.xlane.f32.xlu1 %v131_v27  ;;  %v117_v28 = vpop.xlane.xlu0 %116 }
 0x113   :  { %v126_v29 = vmul.f32 %v124_v22, %v117_v28 }
 0x115   :  { %v128_v30 = vsub.f32 %v109_v14, %v126_v29 }
 0x117   :  { %v130_v31 = vmul.f32 %v128_v30, %v128_v30 }
 0x119   :  { %v134_v32 = vsel %vm88_vm0, %v130_v31, 0.0 }
 0x11a   :  { %135 = vadd.xlane.f32.xlu1 %v134_v32 }
 0x185   :  { %v133_v33 = vpop.xlane.xlu1 %132 }
 0x186   :  { %v137_v34 = vmul.f32 %v133_v33, %v124_v22 }
 0x188   :  { %v139_v35 = vadd.f32 1e-05, %v137_v34 }
 0x18a   :  { %201 = vrsqrt.f32 %v139_v35  ;;  %vm147_vm3 = vweird.f32 %v139_v35 }
 0x18d   :  { %v136_v36 = vpop.xlane.xlu1 %135 }
 0x18e   :  { %v138_v37 = vmul.f32 %v136_v36, %v124_v22 }
 0x190   :  { %v202_v38 = vpop.eup %201  ;;  %v140_v39 = vadd.f32 1e-05, %v138_v37 }
 0x191   :  { %v142_v40 = vmul.f32 %v202_v38, %v139_v35  ;;  %vm148_vm2 = vweird.f32 %v202_v38 }
 0x192   :  { %203 = vrsqrt.f32 %v140_v39  ;;  %vm149_vm4 = vmor %vm147_vm3, %vm148_vm2  ;;  %vm157_vm6 = vweird.f32 %v140_v39 }
 0x193   :  { %v143_v41 = vmul.f32 %v202_v38, %v142_v40 }
 0x195   :  { %v144_v42 = vmul.f32 0.5, %v143_v41 }
 0x197   :  { %v145_v43 = vsub.f32 1.5, %v144_v42 }
 0x198   :  { %v204_v44 = vpop.eup %203 }
 0x199   :  { %v146_v45 = vmul.f32 %v202_v38, %v145_v43  ;;  %v152_v46 = vmul.f32 %v204_v44, %v140_v39  ;;  %vm158_vm5 = vweird.f32 %v204_v44 }
 0x19a   :  { %vm159_vm7 = vmor %vm157_vm6, %vm158_vm5 }
 0x19b   :  { %v150_v48 = vsel %vm149_vm4, %v202_v38, %v146_v45  ;;  %v153_v49 = vmul.f32 %v204_v44, %v152_v46 }
 0x19c   :  { %v161_v51 = vmul.f32 %v150_v48, %v127_v25 }
 0x19d   :  { %v154_v52 = vmul.f32 0.5, %v153_v49 }
 0x19e   :  { %v166_v53 = vmul.f32 %v197_v47, %v161_v51 }
 0x19f   :  { %v155_v54 = vsub.f32 1.5, %v154_v52 }
 0x1a0   :  { %v171_v55 = vadd.f32 %v198_v50, %v166_v53 }
 0x1a1   :  { %v156_v56 = vmul.f32 %v204_v44, %v155_v54 }
 0x1a2   :  { %173 = vst.msk [vmem:[%s366_s6] sm:$0xff] %vm88_vm0, %v171_v55 }
 0x1a3   :  { %v160_v57 = vsel %vm159_vm7, %v204_v44, %v156_v56 }
 0x1a4   :  { %v162_v58 = vmul.f32 %v160_v57, %v128_v30 }
 0x1a6   :  { %v167_v59 = vmul.f32 %v197_v47, %v162_v58 }
 0x1a8   :  { %v172_v60 = vadd.f32 %v198_v50, %v167_v59 }
 0x1aa   :  { %174 = vst.msk [vmem:[%s366_s6 + $0x8] sm:$0xff] %vm88_vm0, %v172_v60 }
 0x1ab   :  { %179 = vsyncpa [#allocation3], 1 }
 0x1ac   :  { %180 = vsyncpa [#allocation5], 1 }

// kernel: transformer_forward.47
= control target key start
LH: loop header
LB: loop body
LE: loop exit
PB: predicated region body
PF: predicated region fallthrough
CT: control target
= control target key end

     0   :  { %12 = vsyncpa [#allocation3], 0  ;;  %s454_s0 = inlined_call_operand.vmem [shape: f32[16,32], index: 0, kind: input, shape index: {}]   ;;  %s455_s1 = inlined_call_operand.vmem [shape: bf16[32,64], index: 1, kind: input, shape index: {}]   ;;  %s456_s2 = inlined_call_operand.vmem [shape: f32[1,64], index: 2, kind: input, shape index: {}]   ;;  %s457_s3 = inlined_call_operand.vmem [shape: bf16[64,32], index: 3, kind: input, shape index: {}]   ;;  %s458_s4 = inlined_call_operand.hbm [shape: f32[1,32], index: 4, kind: input, shape index: {}]   ;;  %s459_s5 = inlined_call_operand.hbm [shape: f32[1,32], index: 5, kind: input, shape index: {}]   ;;  %s460_s6 = inlined_call_operand.hbm [shape: f32[1,32], index: 6, kind: input, shape index: {}]   ;;  %s461_s7 = inlined_call_operand.vmem [shape: f32[16,32], index: 7, kind: output, shape index: {}]  }
   0x1   :  { %13 = vsyncpa [#allocation5], 0  ;;  %s38_s26 = sshll.u32 %s459_s5, 4  ;;  %s361_s27 = smov [#allocation4]   ;;  %s39_s26 = int_to_ptr.hbm [resolvable:$true] %s38_s26 }
   0x2   :  { %s40_s28 = sshll.u32 %s361_s27, 4  ;;  %s27_s8 = sshll.u32 %s458_s4, 4  ;;  %s41_s28 = int_to_ptr.vmem [resolvable:$true] %s40_s28  ;;  %s28_s8 = int_to_ptr.hbm [resolvable:$true] %s27_s8 }
   0x3   :  { %43 = dma.hbm_to_vmem [thread:$0]  %s39_s26, 16, %s41_s28, [#allocation5]  }
   0x4   :  { %s362_s9 = smov [#allocation2]   ;;  %s49_s13 = sshll.u32 %s460_s6, 4  ;;  %s50_s13 = int_to_ptr.hbm [resolvable:$true] %s49_s13 }
   0x5   :  { %s29_s10 = sshll.u32 %s362_s9, 4  ;;  %s363_s5 = smov [#allocation6]   ;;  %s30_s10 = int_to_ptr.vmem [resolvable:$true] %s29_s10 }
   0x6   :  { %32 = dma.hbm_to_vmem [thread:$0]  %s28_s8, 16, %s30_s10, [#allocation3]  }
   0x7   :  { %s51_s14 = sshll.u32 %s363_s5, 4  ;;  %s52_s14 = int_to_ptr.vmem [resolvable:$true] %s51_s14 }
   0x8   :  { %54 = dma.hbm_to_vmem [thread:$0]  %s50_s13, 16, %s52_s14, [#allocation5]  }
   0x9   :  { %357 = dma.done.wait [#allocation3], 16  }
   0xa   :  { %358 = vsyncadd [#allocation3], 4294967280 }
   0xb   :  { %359 = dma.done.wait [#allocation5], 32  }
   0xc   :  { %360 = vsyncadd [#allocation5], 4294967264  ;;  %v266_v0 = vld [vmem:[%s455_s1 + $0x8] sm:$0xff]  ;;  %v265_v1 = vld [vmem:[%s455_s1] sm:$0xff]  ;;  %vm91_vm0 = vcmask 261120   ;;  %vm148_vm1 = vcmask 523264  }
   0xd   :  { %v68_v2 = vld [vmem:[%s454_s0] sm:$0xff]  ;;  %v69_v3 = vld [vmem:[%s454_s0 + $0x8] sm:$0xff]  ;;  %101 = vmatpush.bf16.msra.mxu0 %v266_v0  ;;  %v270_v5 = vld [vmem:[%s457_s3 + $0x18] sm:$0xff]  ;;  %v364_v26 = vmov 32.0  }
   0xe   :  { %v70_v4 = vpack.c.bf16 %v69_v3, %v68_v2  ;;  %156 = vmatpush.bf16.msra.mxu1 %v270_v5  ;;  %v269_v6 = vld [vmem:[%s457_s3 + $0x10] sm:$0xff]  ;;  %v268_v7 = vld [vmem:[%s457_s3 + $0x8] sm:$0xff]  ;;  %v267_v8 = vld [vmem:[%s457_s3] sm:$0xff]  ;;  %279 = vrcp.f32 %v364_v26 }
   0xf   :  { %v275_v10 = vld [vmem:[%s456_s2] ss:$0 sm:$0xff]  ;;  %v277_v57 = vld [vmem:[#allocation4] ss:$0 sm:$0xff]  ;;  %v278_v60 = vld [vmem:[#allocation6] ss:$0 sm:$0xff] }
  0x10   :  { %v276_v17 = vld [vmem:[#allocation2] ss:$0 sm:$0xff] }
  0x11   :  { %102 = vmatpush.bf16.msra.mxu0 %v265_v1 }
  0x12   :  { %157 = vmatpush.bf16.msra.mxu1 %v269_v6 }
  0x14   :  { %247 = vmatmul.msk.bf16.vlgmr.msra.gmra.mxu0 %vm91_vm0, %v70_v4  ;;  %v280_v27 = vpop.eup %279 }
  0x15   :  { %v177_v28 = vmul.f32 32.0, %v280_v27  ;;  %vm181_vm2 = vweird.f32 %v280_v27 }
  0x16   :  { %158 = vmatpush.bf16.msra.mxu1 %v268_v7 }
  0x17   :  { %v178_v29 = vsub.f32 1.0, %v177_v28 }
  0x19   :  { %v179_v30 = vmul.f32 %v280_v27, %v178_v29 }
  0x1a   :  { %159 = vmatpush.bf16.msra.mxu1 %v267_v8 }
  0x1b   :  { %v180_v31 = vadd.f32 %v280_v27, %v179_v30 }
  0x1d   :  { %v182_v32 = vsel %vm181_vm2, %v280_v27, %v180_v31 }
  0x91   :  { %v104_v9 = vpop.f32.mrf.mxu0 }
  0x92   :  { %v105_v11 = vadd.f32 %v275_v10, %v104_v9 }
  0x94   :  { %v109_v14 = vmax.f32 %v105_v11, 0.0 }
  0x99   :  { %v106_v12 = vpop.f32.mrf.mxu0 }
  0x9a   :  { %v107_v13 = vadd.f32 %v275_v10, %v106_v12 }
  0x9c   :  { %v110_v15 = vmax.f32 %v107_v13, 0.0 }
  0x9e   :  { %v111_v16 = vpack.c.bf16 %v110_v15, %v109_v14 }
  0xa0   :  { %264 = vmatmul.msk.bf16.vlgmr.msra.gmra.mxu1 %vm148_vm1, %v111_v16 }
 0x11d   :  { %v161_v18 = vpop.f32.mrf.mxu1 }
 0x11e   :  { %v162_v19 = vadd.f32 %v276_v17, %v161_v18 }
 0x120   :  { %v166_v20 = vadd.f32 %v162_v19, %v68_v2 }
 0x122   :  { %v170_v21 = vsel %vm91_vm0, %v166_v20, 0.0 }
 0x123   :  { %171 = vadd.xlane.f32.xlu0 %v170_v21 }
 0x125   :  { %v163_v22 = vpop.f32.mrf.mxu1 }
 0x126   :  { %v164_v23 = vadd.f32 %v276_v17, %v163_v22 }
 0x128   :  { %v167_v24 = vadd.f32 %v164_v23, %v69_v3 }
 0x12a   :  { %v173_v25 = vsel %vm91_vm0, %v167_v24, 0.0 }
 0x12b   :  { %174 = vadd.xlane.f32.xlu0 %v173_v25 }
 0x196   :  { %v172_v33 = vpop.xlane.xlu0 %171 }
 0x197   :  { %v183_v34 = vmul.f32 %v182_v32, %v172_v33 }
 0x199   :  { %v185_v35 = vsub.f32 %v166_v20, %v183_v34 }
 0x19b   :  { %v187_v36 = vmul.f32 %v185_v35, %v185_v35 }
 0x19d   :  { %v189_v37 = vsel %vm91_vm0, %v187_v36, 0.0 }
 0x19e   :  { %190 = vadd.xlane.f32.xlu1 %v189_v37  ;;  %v175_v38 = vpop.xlane.xlu0 %174 }
 0x19f   :  { %v184_v39 = vmul.f32 %v182_v32, %v175_v38 }
 0x1a1   :  { %v186_v40 = vsub.f32 %v167_v24, %v184_v39 }
 0x1a3   :  { %v188_v41 = vmul.f32 %v186_v40, %v186_v40 }
 0x1a5   :  { %v192_v42 = vsel %vm91_vm0, %v188_v41, 0.0 }
 0x1a6   :  { %193 = vadd.xlane.f32.xlu1 %v192_v42 }
 0x211   :  { %v191_v43 = vpop.xlane.xlu1 %190 }
 0x212   :  { %v195_v44 = vmul.f32 %v191_v43, %v182_v32 }
 0x214   :  { %v197_v45 = vadd.f32 1e-05, %v195_v44 }
 0x216   :  { %281 = vrsqrt.f32 %v197_v45  ;;  %vm205_vm4 = vweird.f32 %v197_v45 }
 0x219   :  { %v194_v46 = vpop.xlane.xlu1 %193 }
 0x21a   :  { %v196_v47 = vmul.f32 %v194_v46, %v182_v32 }
 0x21c   :  { %v282_v48 = vpop.eup %281  ;;  %v198_v49 = vadd.f32 1e-05, %v196_v47 }
 0x21d   :  { %v200_v50 = vmul.f32 %v282_v48, %v197_v45  ;;  %vm206_vm3 = vweird.f32 %v282_v48 }
 0x21e   :  { %283 = vrsqrt.f32 %v198_v49  ;;  %vm207_vm5 = vmor %vm205_vm4, %vm206_vm3  ;;  %vm215_vm7 = vweird.f32 %v198_v49 }
 0x21f   :  { %v201_v51 = vmul.f32 %v282_v48, %v200_v50 }
 0x221   :  { %v202_v52 = vmul.f32 0.5, %v201_v51 }
 0x223   :  { %v203_v53 = vsub.f32 1.5, %v202_v52 }
 0x224   :  { %v284_v54 = vpop.eup %283 }
 0x225   :  { %v204_v55 = vmul.f32 %v282_v48, %v203_v53  ;;  %v210_v56 = vmul.f32 %v284_v54, %v198_v49  ;;  %vm216_vm6 = vweird.f32 %v284_v54 }
 0x226   :  { %vm217_vm8 = vmor %vm215_vm7, %vm216_vm6 }
 0x227   :  { %v208_v58 = vsel %vm207_vm5, %v282_v48, %v204_v55  ;;  %v211_v59 = vmul.f32 %v284_v54, %v210_v56 }
 0x228   :  { %v219_v61 = vmul.f32 %v208_v58, %v185_v35 }
 0x229   :  { %v212_v62 = vmul.f32 0.5, %v211_v59 }
 0x22a   :  { %v224_v63 = vmul.f32 %v277_v57, %v219_v61 }
 0x22b   :  { %v213_v0 = vsub.f32 1.5, %v212_v62 }
 0x22c   :  { %v229_v1 = vadd.f32 %v278_v60, %v224_v63 }
 0x22d   :  { %v214_v2 = vmul.f32 %v284_v54, %v213_v0 }
 0x22e   :  { %231 = vst.msk [vmem:[%s461_s7] sm:$0xff] %vm91_vm0, %v229_v1 }
 0x22f   :  { %v218_v3 = vsel %vm217_vm8, %v284_v54, %v214_v2 }
 0x230   :  { %v220_v4 = vmul.f32 %v218_v3, %v186_v40 }
 0x232   :  { %v225_v5 = vmul.f32 %v277_v57, %v220_v4 }
 0x234   :  { %v230_v6 = vadd.f32 %v278_v60, %v225_v5 }
 0x236   :  { %232 = vst.msk [vmem:[%s461_s7 + $0x8] sm:$0xff] %vm91_vm0, %v230_v6 }
 0x237   :  { %237 = vsyncpa [#allocation3], 1 }
 0x238   :  { %238 = vsyncpa [#allocation5], 1 }

// kernel: transformer_forward.51
= control target key start
LH: loop header
LB: loop body
LE: loop exit
PB: predicated region body
PF: predicated region fallthrough
CT: control target
= control target key end

     0   :  { %11 = vsyncpa [#allocation3], 0  ;;  %s201_s24 = smov [#allocation2]   ;;  %s278_s0 = inlined_call_operand.vmem [shape: f32[16,32], index: 0, kind: input, shape index: {}]   ;;  %s279_s1 = inlined_call_operand.vmem [shape: bf16[32,32], index: 1, kind: input, shape index: {}]   ;;  %s280_s2 = inlined_call_operand.vmem [shape: f32[1,32], index: 2, kind: input, shape index: {}]   ;;  %s281_s3 = inlined_call_operand.vmem [shape: f32[16,32], index: 3, kind: input, shape index: {}]   ;;  %s282_s4 = inlined_call_operand.vmem [shape: f32[1,32], index: 4, kind: input, shape index: {}]   ;;  %s283_s5 = inlined_call_operand.hbm [shape: f32[1,32], index: 5, kind: input, shape index: {}]   ;;  %s284_s6 = inlined_call_operand.vmem [shape: f32[16,32], index: 6, kind: output, shape index: {}]  }
   0x1   :  { %s27_s23 = sshll.u32 %s283_s5, 4  ;;  %s29_s25 = sshll.u32 %s201_s24, 4  ;;  %s28_s23 = int_to_ptr.hbm [resolvable:$true] %s27_s23  ;;  %s30_s25 = int_to_ptr.vmem [resolvable:$true] %s29_s25 }
   0x2   :  { %32 = dma.hbm_to_vmem [thread:$0]  %s28_s23, 16, %s30_s25, [#allocation3]  }
   0x3   :  { %199 = dma.done.wait [#allocation3], 16  }
   0x4   :  { %200 = vsyncadd [#allocation3], 4294967280  ;;  %v163_v0 = vld [vmem:[%s279_s1 + $0x8] sm:$0xff]  ;;  %v162_v1 = vld [vmem:[%s279_s1] sm:$0xff]  ;;  %vm61_vm0 = vcmask 261120   ;;  %v202_v16 = vmov 32.0  }
   0x5   :  { %v38_v2 = vld [vmem:[%s278_s0] sm:$0xff]  ;;  %71 = vmatpush.bf16.msra.mxu0 %v163_v0  ;;  %v39_v3 = vld [vmem:[%s278_s0 + $0x8] sm:$0xff]  ;;  %169 = vrcp.f32 %v202_v16 }
   0x6   :  { %v40_v4 = vpack.c.bf16 %v39_v3, %v38_v2  ;;  %v166_v5 = vld [vmem:[%s280_s2] ss:$0 sm:$0xff]  ;;  %v80_v12 = vld [vmem:[%s281_s3 + $0x8] sm:$0xff] }
   0x7   :  { %v79_v7 = vld [vmem:[%s281_s3] sm:$0xff] }
   0x8   :  { %v167_v47 = vld [vmem:[%s282_s4] ss:$0 sm:$0xff] }
   0x9   :  { %72 = vmatpush.bf16.msra.mxu0 %v162_v1  ;;  %v168_v50 = vld [vmem:[#allocation2] ss:$0 sm:$0xff] }
   0xb   :  { %v170_v17 = vpop.eup %169 }
   0xc   :  { %161 = vmatmul.msk.bf16.vlgmr.msra.gmra.mxu0 %vm61_vm0, %v40_v4  ;;  %v92_v18 = vmul.f32 32.0, %v170_v17  ;;  %vm96_vm1 = vweird.f32 %v170_v17 }
   0xe   :  { %v93_v19 = vsub.f32 1.0, %v92_v18 }
  0x10   :  { %v94_v20 = vmul.f32 %v170_v17, %v93_v19 }
  0x12   :  { %v95_v21 = vadd.f32 %v170_v17, %v94_v20 }
  0x14   :  { %v97_v22 = vsel %vm96_vm1, %v170_v17, %v95_v21 }
  0x89   :  { %v74_v6 = vpop.f32.mrf.mxu0 }
  0x8a   :  { %v75_v8 = vadd.f32 %v166_v5, %v74_v6 }
  0x8c   :  { %v81_v9 = vadd.f32 %v79_v7, %v75_v8 }
  0x8e   :  { %v85_v10 = vsel %vm61_vm0, %v81_v9, 0.0 }
  0x8f   :  { %86 = vadd.xlane.f32.xlu0 %v85_v10 }
  0x91   :  { %v76_v11 = vpop.f32.mrf.mxu0 }
  0x92   :  { %v77_v13 = vadd.f32 %v166_v5, %v76_v11 }
  0x94   :  { %v82_v14 = vadd.f32 %v80_v12, %v77_v13 }
  0x96   :  { %v88_v15 = vsel %vm61_vm0, %v82_v14, 0.0 }
  0x97   :  { %89 = vadd.xlane.f32.xlu0 %v88_v15 }
 0x102   :  { %v87_v23 = vpop.xlane.xlu0 %86 }
 0x103   :  { %v98_v24 = vmul.f32 %v97_v22, %v87_v23 }
 0x105   :  { %v100_v25 = vsub.f32 %v81_v9, %v98_v24 }
 0x107   :  { %v102_v26 = vmul.f32 %v100_v25, %v100_v25 }
 0x109   :  { %v104_v27 = vsel %vm61_vm0, %v102_v26, 0.0 }
 0x10a   :  { %105 = vadd.xlane.f32.xlu1 %v104_v27  ;;  %v90_v28 = vpop.xlane.xlu0 %89 }
 0x10b   :  { %v99_v29 = vmul.f32 %v97_v22, %v90_v28 }
 0x10d   :  { %v101_v30 = vsub.f32 %v82_v14, %v99_v29 }
 0x10f   :  { %v103_v31 = vmul.f32 %v101_v30, %v101_v30 }
 0x111   :  { %v107_v32 = vsel %vm61_vm0, %v103_v31, 0.0 }
 0x112   :  { %108 = vadd.xlane.f32.xlu1 %v107_v32 }
 0x17d   :  { %v106_v33 = vpop.xlane.xlu1 %105 }
 0x17e   :  { %v110_v34 = vmul.f32 %v106_v33, %v97_v22 }
 0x180   :  { %v112_v35 = vadd.f32 1e-05, %v110_v34 }
 0x182   :  { %171 = vrsqrt.f32 %v112_v35  ;;  %vm120_vm3 = vweird.f32 %v112_v35 }
 0x185   :  { %v109_v36 = vpop.xlane.xlu1 %108 }
 0x186   :  { %v111_v37 = vmul.f32 %v109_v36, %v97_v22 }
 0x188   :  { %v172_v38 = vpop.eup %171  ;;  %v113_v39 = vadd.f32 1e-05, %v111_v37 }
 0x189   :  { %v115_v40 = vmul.f32 %v172_v38, %v112_v35  ;;  %vm121_vm2 = vweird.f32 %v172_v38 }
 0x18a   :  { %173 = vrsqrt.f32 %v113_v39  ;;  %vm122_vm4 = vmor %vm120_vm3, %vm121_vm2  ;;  %vm130_vm6 = vweird.f32 %v113_v39 }
 0x18b   :  { %v116_v41 = vmul.f32 %v172_v38, %v115_v40 }
 0x18d   :  { %v117_v42 = vmul.f32 0.5, %v116_v41 }
 0x18f   :  { %v118_v43 = vsub.f32 1.5, %v117_v42 }
 0x190   :  { %v174_v44 = vpop.eup %173 }
 0x191   :  { %v119_v45 = vmul.f32 %v172_v38, %v118_v43  ;;  %v125_v46 = vmul.f32 %v174_v44, %v113_v39  ;;  %vm131_vm5 = vweird.f32 %v174_v44 }
 0x192   :  { %vm132_vm7 = vmor %vm130_vm6, %vm131_vm5 }
 0x193   :  { %v123_v48 = vsel %vm122_vm4, %v172_v38, %v119_v45  ;;  %v126_v49 = vmul.f32 %v174_v44, %v125_v46 }
 0x194   :  { %v134_v51 = vmul.f32 %v123_v48, %v100_v25 }
 0x195   :  { %v127_v52 = vmul.f32 0.5, %v126_v49 }
 0x196   :  { %v139_v53 = vmul.f32 %v167_v47, %v134_v51 }
 0x197   :  { %v128_v54 = vsub.f32 1.5, %v127_v52 }
 0x198   :  { %v144_v55 = vadd.f32 %v168_v50, %v139_v53 }
 0x199   :  { %v129_v56 = vmul.f32 %v174_v44, %v128_v54 }
 0x19a   :  { %146 = vst.msk [vmem:[%s284_s6] sm:$0xff] %vm61_vm0, %v144_v55 }
 0x19b   :  { %v133_v57 = vsel %vm132_vm7, %v174_v44, %v129_v56 }
 0x19c   :  { %v135_v58 = vmul.f32 %v133_v57, %v101_v30 }
 0x19e   :  { %v140_v59 = vmul.f32 %v167_v47, %v135_v58 }
 0x1a0   :  { %v145_v60 = vadd.f32 %v168_v50, %v140_v59 }
 0x1a2   :  { %147 = vst.msk [vmem:[%s284_s6 + $0x8] sm:$0xff] %vm61_vm0, %v145_v60 }
 0x1a3   :  { %152 = vsyncpa [#allocation3], 1 }

// kernel: transformer_forward.55
= control target key start
LH: loop header
LB: loop body
LE: loop exit
PB: predicated region body
PF: predicated region fallthrough
CT: control target
= control target key end

     0   :  { %11 = vsyncpa [#allocation3], 0  ;;  %s321_s0 = inlined_call_operand.vmem [shape: f32[16,32], index: 0, kind: input, shape index: {}]   ;;  %s322_s1 = inlined_call_operand.vmem [shape: bf16[32,32], index: 1, kind: input, shape index: {}]   ;;  %s323_s2 = inlined_call_operand.vmem [shape: f32[1,32], index: 2, kind: input, shape index: {}]   ;;  %s324_s3 = inlined_call_operand.vmem [shape: f32[16,32], index: 3, kind: input, shape index: {}]   ;;  %s325_s4 = inlined_call_operand.hbm [shape: f32[1,32], index: 4, kind: input, shape index: {}]   ;;  %s326_s5 = inlined_call_operand.hbm [shape: f32[1,32], index: 5, kind: input, shape index: {}]   ;;  %s327_s6 = inlined_call_operand.vmem [shape: f32[16,32], index: 6, kind: output, shape index: {}]  }
   0x1   :  { %s26_s23 = sshll.u32 %s325_s4, 4  ;;  %s27_s23 = int_to_ptr.hbm [resolvable:$true] %s26_s23 }
   0x2   :  { %12 = vsyncpa [#allocation5], 0  ;;  %s243_s24 = smov [#allocation2]   ;;  %s37_s28 = sshll.u32 %s326_s5, 4  ;;  %s38_s28 = int_to_ptr.hbm [resolvable:$true] %s37_s28 }
   0x3   :  { %s28_s25 = sshll.u32 %s243_s24, 4  ;;  %s244_s29 = smov [#allocation4]   ;;  %s29_s25 = int_to_ptr.vmem [resolvable:$true] %s28_s25 }
   0x4   :  { %31 = dma.hbm_to_vmem [thread:$0]  %s27_s23, 16, %s29_s25, [#allocation3]  }
   0x5   :  { %s39_s30 = sshll.u32 %s244_s29, 4  ;;  %s40_s30 = int_to_ptr.vmem [resolvable:$true] %s39_s30 }
   0x6   :  { %42 = dma.hbm_to_vmem [thread:$0]  %s38_s28, 16, %s40_s30, [#allocation5]  }
   0x7   :  { %239 = dma.done.wait [#allocation3], 16  }
   0x8   :  { %240 = vsyncadd [#allocation3], 4294967280 }
   0x9   :  { %241 = dma.done.wait [#allocation5], 16  }
   0xa   :  { %242 = vsyncadd [#allocation5], 4294967280  ;;  %v178_v0 = vld [vmem:[%s322_s1 + $0x8] sm:$0xff]  ;;  %v177_v1 = vld [vmem:[%s322_s1] sm:$0xff]  ;;  %vm75_vm0 = vcmask 261120   ;;  %v245_v16 = vmov 32.0  }
   0xb   :  { %v52_v2 = vld [vmem:[%s321_s0] sm:$0xff]  ;;  %85 = vmatpush.bf16.msra.mxu0 %v178_v0  ;;  %v53_v3 = vld [vmem:[%s321_s0 + $0x8] sm:$0xff]  ;;  %185 = vrcp.f32 %v245_v16 }
   0xc   :  { %v54_v4 = vpack.c.bf16 %v53_v3, %v52_v2  ;;  %v182_v5 = vld [vmem:[%s323_s2] ss:$0 sm:$0xff]  ;;  %v94_v12 = vld [vmem:[%s324_s3 + $0x8] sm:$0xff]  ;;  %v184_v50 = vld [vmem:[#allocation4] ss:$0 sm:$0xff] }
   0xd   :  { %v93_v7 = vld [vmem:[%s324_s3] sm:$0xff] }
   0xe   :  { %v183_v47 = vld [vmem:[#allocation2] ss:$0 sm:$0xff] }
   0xf   :  { %86 = vmatpush.bf16.msra.mxu0 %v177_v1 }
  0x11   :  { %v186_v17 = vpop.eup %185 }
  0x12   :  { %176 = vmatmul.msk.bf16.vlgmr.msra.gmra.mxu0 %vm75_vm0, %v54_v4  ;;  %v106_v18 = vmul.f32 32.0, %v186_v17  ;;  %vm110_vm1 = vweird.f32 %v186_v17 }
  0x14   :  { %v107_v19 = vsub.f32 1.0, %v106_v18 }
  0x16   :  { %v108_v20 = vmul.f32 %v186_v17, %v107_v19 }
  0x18   :  { %v109_v21 = vadd.f32 %v186_v17, %v108_v20 }
  0x1a   :  { %v111_v22 = vsel %vm110_vm1, %v186_v17, %v109_v21 }
  0x8f   :  { %v88_v6 = vpop.f32.mrf.mxu0 }
  0x90   :  { %v89_v8 = vadd.f32 %v182_v5, %v88_v6 }
  0x92   :  { %v95_v9 = vadd.f32 %v93_v7, %v89_v8 }
  0x94   :  { %v99_v10 = vsel %vm75_vm0, %v95_v9, 0.0 }
  0x95   :  { %100 = vadd.xlane.f32.xlu0 %v99_v10 }
  0x97   :  { %v90_v11 = vpop.f32.mrf.mxu0 }
  0x98   :  { %v91_v13 = vadd.f32 %v182_v5, %v90_v11 }
  0x9a   :  { %v96_v14 = vadd.f32 %v94_v12, %v91_v13 }
  0x9c   :  { %v102_v15 = vsel %vm75_vm0, %v96_v14, 0.0 }
  0x9d   :  { %103 = vadd.xlane.f32.xlu0 %v102_v15 }
 0x108   :  { %v101_v23 = vpop.xlane.xlu0 %100 }
 0x109   :  { %v112_v24 = vmul.f32 %v111_v22, %v101_v23 }
 0x10b   :  { %v114_v25 = vsub.f32 %v95_v9, %v112_v24 }
 0x10d   :  { %v116_v26 = vmul.f32 %v114_v25, %v114_v25 }
 0x10f   :  { %v118_v27 = vsel %vm75_vm0, %v116_v26, 0.0 }
 0x110   :  { %119 = vadd.xlane.f32.xlu1 %v118_v27  ;;  %v104_v28 = vpop.xlane.xlu0 %103 }
 0x111   :  { %v113_v29 = vmul.f32 %v111_v22, %v104_v28 }
 0x113   :  { %v115_v30 = vsub.f32 %v96_v14, %v113_v29 }
 0x115   :  { %v117_v31 = vmul.f32 %v115_v30, %v115_v30 }
 0x117   :  { %v121_v32 = vsel %vm75_vm0, %v117_v31, 0.0 }
 0x118   :  { %122 = vadd.xlane.f32.xlu1 %v121_v32 }
 0x183   :  { %v120_v33 = vpop.xlane.xlu1 %119 }
 0x184   :  { %v124_v34 = vmul.f32 %v120_v33, %v111_v22 }
 0x186   :  { %v126_v35 = vadd.f32 1e-05, %v124_v34 }
 0x188   :  { %187 = vrsqrt.f32 %v126_v35  ;;  %vm134_vm3 = vweird.f32 %v126_v35 }
 0x18b   :  { %v123_v36 = vpop.xlane.xlu1 %122 }
 0x18c   :  { %v125_v37 = vmul.f32 %v123_v36, %v111_v22 }
 0x18e   :  { %v188_v38 = vpop.eup %187  ;;  %v127_v39 = vadd.f32 1e-05, %v125_v37 }
 0x18f   :  { %v129_v40 = vmul.f32 %v188_v38, %v126_v35  ;;  %vm135_vm2 = vweird.f32 %v188_v38 }
 0x190   :  { %189 = vrsqrt.f32 %v127_v39  ;;  %vm136_vm4 = vmor %vm134_vm3, %vm135_vm2  ;;  %vm144_vm6 = vweird.f32 %v127_v39 }
 0x191   :  { %v130_v41 = vmul.f32 %v188_v38, %v129_v40 }
 0x193   :  { %v131_v42 = vmul.f32 0.5, %v130_v41 }
 0x195   :  { %v132_v43 = vsub.f32 1.5, %v131_v42 }
 0x196   :  { %v190_v44 = vpop.eup %189 }
 0x197   :  { %v133_v45 = vmul.f32 %v188_v38, %v132_v43  ;;  %v139_v46 = vmul.f32 %v190_v44, %v127_v39  ;;  %vm145_vm5 = vweird.f32 %v190_v44 }
 0x198   :  { %vm146_vm7 = vmor %vm144_vm6, %vm145_vm5 }
 0x199   :  { %v137_v48 = vsel %vm136_vm4, %v188_v38, %v133_v45  ;;  %v140_v49 = vmul.f32 %v190_v44, %v139_v46 }
 0x19a   :  { %v148_v51 = vmul.f32 %v137_v48, %v114_v25 }
 0x19b   :  { %v141_v52 = vmul.f32 0.5, %v140_v49 }
 0x19c   :  { %v153_v53 = vmul.f32 %v183_v47, %v148_v51 }
 0x19d   :  { %v142_v54 = vsub.f32 1.5, %v141_v52 }
 0x19e   :  { %v158_v55 = vadd.f32 %v184_v50, %v153_v53 }
 0x19f   :  { %v143_v56 = vmul.f32 %v190_v44, %v142_v54 }
 0x1a0   :  { %160 = vst.msk [vmem:[%s327_s6] sm:$0xff] %vm75_vm0, %v158_v55 }
 0x1a1   :  { %v147_v57 = vsel %vm146_vm7, %v190_v44, %v143_v56 }
 0x1a2   :  { %v149_v58 = vmul.f32 %v147_v57, %v115_v30 }
 0x1a4   :  { %v154_v59 = vmul.f32 %v183_v47, %v149_v58 }
 0x1a6   :  { %v159_v60 = vadd.f32 %v184_v50, %v154_v59 }
 0x1a8   :  { %161 = vst.msk [vmem:[%s327_s6 + $0x8] sm:$0xff] %vm75_vm0, %v159_v60 }
 0x1a9   :  { %166 = vsyncpa [#allocation3], 1 }
 0x1aa   :  { %167 = vsyncpa [#allocation5], 1 }

// kernel: transformer_forward.57
= control target key start
LH: loop header
LB: loop body
LE: loop exit
PB: predicated region body
PF: predicated region fallthrough
CT: control target
= control target key end

     0   :  { %vm20_vm0 = vcmask 130048   ;;  %v140_v1 = vmov 0.0   ;;  %s188_s0 = inlined_call_operand.vmem [shape: f32[16,32], index: 0, kind: input, shape index: {}]   ;;  %s189_s1 = inlined_call_operand.vmem [shape: bf16[32,16], index: 1, kind: input, shape index: {}]   ;;  %s190_s2 = inlined_call_operand.vmem [shape: f32[1,16], index: 2, kind: input, shape index: {}]   ;;  %s191_s3 = inlined_call_operand.hbm [shape: f32[16,16], index: 3, kind: output, shape index: {}]  }
   0x1   :  { %v108_v0 = vld [vmem:[%s189_s1 + $0x8] sm:$0xff]  ;;  %21 = vst.msk [vmem:[#allocation2] sm:$0xff] %vm20_vm0, %v140_v1 }
   0x2   :  { %8 = vsyncpa [#allocation4], 0  ;;  %54 = vmatpush.bf16.msra.mxu0 %v108_v0  ;;  %v107_v2 = vld [vmem:[%s189_s1] sm:$0xff]  ;;  %v26_v4 = vld [vmem:[%s188_s0 + $0x8] sm:$0xff]  ;;  %22 = vst.msk [vmem:[#allocation2 + $0x8] sm:$0xff] %vm20_vm0, %v140_v1  ;;  %vm44_vm1 = vcmask 261120  }
   0x3   :  { %v25_v3 = vld [vmem:[%s188_s0] sm:$0xff]  ;;  %s141_s0 = smov [#allocation3]   ;;  %s86_s24 = sshll.u32 %s191_s3, 4  ;;  %s87_s24 = int_to_ptr.hbm [resolvable:$true] %s86_s24 }
   0x4   :  { %v27_v5 = vpack.c.bf16 %v26_v4, %v25_v3  ;;  %v113_v10 = vld [vmem:[%s190_s2] ss:$0 sm:$0xff]  ;;  %s84_s21 = sshll.u32 %s141_s0, 4  ;;  %s142_s2 = smov 128   ;;  %s85_s21 = int_to_ptr.vmem [resolvable:$true] %s84_s21 }
   0x5   :  { %s143_s25 = smov 8  }
   0x6   :  { %55 = vmatpush.bf16.msra.mxu0 %v107_v2 }
   0x8   :  { %v23_v6 = vld [vmem:[#allocation2] sm:$0xff] }
   0x9   :  { %106 = vmatmul.msk.bf16.vlgmr.msra.gmra.mxu0 %vm44_vm1, %v27_v5  ;;  %v24_v9 = vld [vmem:[#allocation2 + $0x8] sm:$0xff] }
  0x86   :  { %v57_v7 = vpop.f32.mrf.mxu0 }
  0x87   :  { %v62_v8 = vadd.f32 %v57_v7, %v23_v6 }
  0x89   :  { %65 = vst.msk [vmem:[#allocation2] sm:$0xff] %vm20_vm0, %v62_v8 }
  0x8e   :  { %v59_v11 = vpop.f32.mrf.mxu0 }
  0x8f   :  { %v63_v12 = vadd.f32 %v59_v11, %v24_v9 }
  0x90   :  { %v70_v13 = vld [vmem:[#allocation2] sm:$0xff] }
  0x91   :  { %66 = vst.msk [vmem:[#allocation2 + $0x8] sm:$0xff] %vm20_vm0, %v63_v12  ;;  %v76_v14 = vadd.f32 %v113_v10, %v70_v13 }
  0x93   :  { %78 = vst.msk [vmem:[#allocation3] sm:$0xff] %vm20_vm0, %v76_v14 }
  0x98   :  { %v71_v15 = vld [vmem:[#allocation2 + $0x8] sm:$0xff] }
  0x99   :  { %v77_v16 = vadd.f32 %v113_v10, %v71_v15 }
  0x9b   :  { %79 = vst.msk [vmem:[#allocation3 + $0x8] sm:$0xff] %vm20_vm0, %v77_v16 }
  0x9c   :  { %92 = dma.vmem_to_hbm [thread:$0]  %s85_s21, 256, %s87_s24, [#allocation4], %s142_s2, %s142_s2, %s143_s25  }
  0x9d   :  { %138 = dma.done.wait [#allocation4], 256  }
  0x9e   :  { %139 = vsyncadd [#allocation4], 4294967040 }
  0x9f   :  { %97 = vsyncpa [#allocation4], 1 }

</bundles_post_ra>
